<compile_context>
chip_gen: v6e
topology: v6e:2x2x1
jax: 0.10.0
libtpu: 0.0.40
codegen_flags: <defaults>
</compile_context>

<pallas_src>
import functools
import math

import jax
import jax.numpy as jnp
from jax.experimental import pallas as pl
from jax.experimental.pallas import tpu as pltpu

EPS = 1e-5  # LayerNorm eps (PyTorch default)


# --------------------------------------------------------------------------
# small in-kernel helpers
# --------------------------------------------------------------------------
def _erf(x):
    # Abramowitz & Stegun 7.1.26 polynomial, max abs error ~1.5e-7.
    # Keeps nn.GELU's *exact* erf semantics using only exp/mul/add (all VPU/EUP).
    a1, a2, a3, a4, a5 = (0.254829592, -0.284496736, 1.421413741,
                          -1.453152027, 1.061405429)
    p = 0.3275911
    ax = jnp.abs(x)
    t = 1.0 / (1.0 + p * ax)
    poly = ((((a5 * t + a4) * t + a3) * t + a2) * t + a1) * t
    y = 1.0 - poly * jnp.exp(-(ax * ax))
    return jnp.where(x >= 0, y, -y)


def _gelu_exact(x):
    return 0.5 * x * (1.0 + _erf(x * 0.7071067811865476))


def _layernorm(x, gamma, beta):
    mu = jnp.mean(x, axis=-1, keepdims=True)
    var = jnp.mean((x - mu) ** 2, axis=-1, keepdims=True)
    return (x - mu) * jax.lax.rsqrt(var + EPS) * gamma + beta


# --------------------------------------------------------------------------
# kernel 1: per-level patch projection   (grid over levels, "parallel")
# --------------------------------------------------------------------------
def patch_proj_kernel(p_ref, w_ref, b_ref, o_ref):
    """p_ref: (1,B,N,P)  w_ref: (1,P,D)  b_ref: (1,1,D)  o_ref: (1,B,N,D)."""
    _, B, N, P = p_ref.shape
    D = o_ref.shape[-1]
    x = p_ref[0].reshape(B * N, P)                       # lane-dense (B*N, 256)
    y = jnp.dot(x, w_ref[0], preferred_element_type=jnp.float32) + b_ref[0]
    o_ref[0] = y.reshape(B, N, D)


# --------------------------------------------------------------------------
# kernel 2: one fused TransformerBlock    (grid over batch, "parallel")
# --------------------------------------------------------------------------
def transformer_block_kernel(x_ref, rope_ref,
                             g1_ref, be1_ref,
                             wq_ref, wk_ref, wv_ref,
                             bq_ref, bk_ref, bv_ref,
                             wo_ref, bo_ref,
                             g2_ref, be2_ref,
                             w1_ref, b1_ref, w2_ref, b2_ref,
                             out_ref, *, heads):
    """One TransformerBlock for one batch element (block = (1, N, D))."""
    N, D = x_ref.shape[1], x_ref.shape[2]
    hd = D // heads
    half = hd // 2
    scale = 1.0 / math.sqrt(hd)

    x = x_ref[0]                                          # (N, D)

    # ---------------- LayerNorm 1 ----------------
    xn = _layernorm(x, g1_ref[...], be1_ref[...])

    # ------- RoPE on q/k  (module semantics: "sin" and "cos" are both the
    #         raw freqs, since rope_emb = cat(freqs, freqs)) ----------------
    rope = rope_ref[...]                                  # (N, hd)
    sin = rope[:, :half]
    cos = rope[:, half:]
    rot_parts = []
    for h in range(heads):                                # static unroll
        b0 = h * hd
        x1 = xn[:, b0:b0 + half]
        x2 = xn[:, b0 + half:b0 + hd]
        rot_parts.append(x1 * cos - x2 * sin)
        rot_parts.append(x1 * sin + x2 * cos)
    qk_in = jnp.concatenate(rot_parts, axis=-1)           # (N, D)

    # ---------------- in-projection (Q,K from rotated, V from x_norm) -----
    q = jnp.dot(qk_in, wq_ref[...], preferred_element_type=jnp.float32) + bq_ref[...]
    k = jnp.dot(qk_in, wk_ref[...], preferred_element_type=jnp.float32) + bk_ref[...]
    v = jnp.dot(xn,    wv_ref[...], preferred_element_type=jnp.float32) + bv_ref[...]

    # ---------------- multi-head attention --------------------------------
    head_outs = []
    for h in range(heads):                                # static unroll
        sl = slice(h * hd, (h + 1) * hd)
        qh, kh, vh = q[:, sl], k[:, sl], v[:, sl]         # (N, hd)
        s = jnp.dot(qh, kh.T, preferred_element_type=jnp.float32) * scale
        s = s - jnp.max(s, axis=-1, keepdims=True)
        e = jnp.exp(s)
        a = e / jnp.sum(e, axis=-1, keepdims=True)
        head_outs.append(jnp.dot(a, vh, preferred_element_type=jnp.float32))
    attn = jnp.concatenate(head_outs, axis=-1)            # (N, D)
    attn = jnp.dot(attn, wo_ref[...], preferred_element_type=jnp.float32) + bo_ref[...]

    x = x + attn                                          # residual 1

    # ---------------- LayerNorm 2 + MLP ------------------------------------
    xn2 = _layernorm(x, g2_ref[...], be2_ref[...])
    h1 = jnp.dot(xn2, w1_ref[...], preferred_element_type=jnp.float32) + b1_ref[...]
    h1 = _gelu_exact(h1)
    h2 = jnp.dot(h1, w2_ref[...], preferred_element_type=jnp.float32) + b2_ref[...]

    out_ref[0] = x + h2                                   # residual 2


# --------------------------------------------------------------------------
# kernel 3: mean-pool + fc_out  (grid over levels, resident accumulator)
# --------------------------------------------------------------------------
def pool_fc_kernel(tok_ref, w_ref, b_ref, out_ref):
    """tok_ref: (1,B,N,D)  w_ref: (1,D,Dout)  b_ref: (1,Dout)  out: (B,Dout).

    Output block index is constant across the level axis, so it stays
    resident in VMEM and accumulates concat(pooled_l) @ W^T level by level.
    """
    @pl.when(pl.program_id(0) == 0)
    def _():
        out_ref[...] = jnp.broadcast_to(b_ref[...], out_ref.shape)

    pooled = jnp.mean(tok_ref[0], axis=1)                 # (B, D)
    out_ref[...] += jnp.dot(pooled, w_ref[0],
                            preferred_element_type=jnp.float32)


# --------------------------------------------------------------------------
# pallas_call wrappers
# --------------------------------------------------------------------------
def _replicated(arr):
    zeros = (0,) * arr.ndim
    return pl.BlockSpec(arr.shape, lambda b: zeros)


def patch_proj_pallas(patches, wp_t, bp):
    L, B, N, P = patches.shape
    D = wp_t.shape[-1]
    return pl.pallas_call(
        patch_proj_kernel,
        out_shape=jax.ShapeDtypeStruct((L, B, N, D), jnp.float32),
        grid=(L,),
        in_specs=[pl.BlockSpec((1, B, N, P), lambda l: (l, 0, 0, 0)),
                  pl.BlockSpec((1, P, D), lambda l: (l, 0, 0)),
                  pl.BlockSpec((1, 1, D), lambda l: (l, 0, 0))],
        out_specs=pl.BlockSpec((1, B, N, D), lambda l: (l, 0, 0, 0)),
        compiler_params=pltpu.CompilerParams(
            dimension_semantics=("parallel",)),
    )(patches, wp_t, bp)


def transformer_block_pallas(x, rope, blk, heads):
    B, N, D = x.shape
    wq, wk, wv = jnp.split(blk["w_in"], 3, axis=0)
    bq, bk, bv = jnp.split(blk["b_in"], 3)
    row = lambda v: v.reshape(1, -1)

    weight_args = (rope,
                   row(blk["g1"]), row(blk["be1"]),
                   wq.T, wk.T, wv.T, row(bq), row(bk), row(bv),
                   blk["wo"].T, row(blk["bo"]),
                   row(blk["g2"]), row(blk["be2"]),
                   blk["w1"].T, row(blk["b1"]),
                   blk["w2"].T, row(blk["b2"]))

    in_specs = ([pl.BlockSpec((1, N, D), lambda b: (b, 0, 0))]
                + [_replicated(a) for a in weight_args])

    return pl.pallas_call(
        functools.partial(transformer_block_kernel, heads=heads),
        out_shape=jax.ShapeDtypeStruct((B, N, D), jnp.float32),
        grid=(B,),
        in_specs=in_specs,
        out_specs=pl.BlockSpec((1, N, D), lambda b: (b, 0, 0)),
        compiler_params=pltpu.CompilerParams(
            dimension_semantics=("parallel",)),   # shards over v7x's 2 TCs
    )(x, *weight_args)


def pool_fc_pallas(tokens, w_out_t, b_out):
    L, B, N, D = tokens.shape
    Dout = w_out_t.shape[-1]
    return pl.pallas_call(
        pool_fc_kernel,
        out_shape=jax.ShapeDtypeStruct((B, Dout), jnp.float32),
        grid=(L,),
        in_specs=[pl.BlockSpec((1, B, N, D), lambda l: (l, 0, 0, 0)),
                  pl.BlockSpec((1, D, Dout), lambda l: (l, 0, 0)),
                  pl.BlockSpec((1, Dout), lambda l: (0, 0))],
        out_specs=pl.BlockSpec((B, Dout), lambda l: (0, 0)),
        compiler_params=pltpu.CompilerParams(
            dimension_semantics=("arbitrary",)),  # reduction over levels
    )(tokens, w_out_t, b_out)


# --------------------------------------------------------------------------
# host-side glue (pure layout) + full forward
# --------------------------------------------------------------------------
def rope_embedding(n, head_dim):
    inv_freq = 1.0 / (10000.0 ** (jnp.arange(0, head_dim, 2, dtype=jnp.float32)
                                  / head_dim))
    t = jnp.arange(n, dtype=jnp.float32)
    freqs = t[:, None] * inv_freq[None, :]
    return jnp.concatenate([freqs, freqs], axis=-1)       # (n, head_dim)


def extract_patches(x, patch):
    """x: (B, L, C, H, W) -> (L, B, N, C*p*p), matching torch's
    unfold(2,p,p).unfold(3,p,p).permute(0,2,3,1,4,5).view(B,-1,C*p*p)."""
    B, L, C, H, W = x.shape
    p = patch
    xp = x.reshape(B, L, C, H // p, p, W // p, p)
    xp = xp.transpose(1, 0, 3, 5, 2, 4, 6)                # (L,B,Hp,Wp,C,p,p)
    return xp.reshape(L, B, (H // p) * (W // p), C * p * p)


def vit_encoder_forward(x, params, *, patch_size, heads):
    x = x.astype(jnp.float32)
    levels = params["levels"]
    L = len(levels)

    patches = extract_patches(x, patch_size)              # (L, B, N, P)
    wp_t = jnp.stack([lvl["wp"].T for lvl in levels])     # (L, P, D)
    bp = jnp.stack([lvl["bp"].reshape(1, -1) for lvl in levels])  # (L, 1, D)
    tokens = patch_proj_pallas(patches, wp_t, bp)         # (L, B, N, D)

    D = tokens.shape[-1]
    N = tokens.shape[2]
    rope = rope_embedding(N, D // heads)                  # (N, head_dim)

    outs = []
    for i, lvl in enumerate(levels):
        t = tokens[i]
        for blk in lvl["blocks"]:                         # sequential dependence
            t = transformer_block_pallas(t, rope, blk, heads)
        outs.append(t)
    stacked = jnp.stack(outs)                             # (L, B, N, D)

    Dout = params["w_out"].shape[0]
    w_out_t = params["w_out"].T.reshape(L, D, Dout)       # (L, D, Dout)
    b_out = params["b_out"].reshape(1, -1)
    return pool_fc_pallas(stacked, w_out_t, b_out)        # (B, Dout)


# --------------------------------------------------------------------------
# pure-JAX reference (mirrors the PyTorch module op-for-op)
# --------------------------------------------------------------------------
def _ln_ref(x, g, b):
    mu = x.mean(-1, keepdims=True)
    var = ((x - mu) ** 2).mean(-1, keepdims=True)
    return (x - mu) / jnp.sqrt(var + EPS) * g + b


def _block_ref(x, p, heads):
    B, N, D = x.shape
    hd = D // heads
    half = hd // 2
    xn = _ln_ref(x, p["g1"], p["be1"])

    rope = rope_embedding(N, hd)
    sin = rope[:, :half][None, :, None, :]
    cos = rope[:, half:][None, :, None, :]
    xh = xn.reshape(B, N, heads, hd)
    x1, x2 = xh[..., :half], xh[..., half:]
    rot = jnp.concatenate([x1 * cos - x2 * sin, x1 * sin + x2 * cos], axis=-1)
    qk = rot.reshape(B, N, D)

    wq, wk, wv = jnp.split(p["w_in"], 3, axis=0)
    bq, bk, bv = jnp.split(p["b_in"], 3)
    Q = qk @ wq.T + bq
    K = qk @ wk.T + bk
    V = xn @ wv.T + bv
    Qh = Q.reshape(B, N, heads, hd).transpose(0, 2, 1, 3)
    Kh = K.reshape(B, N, heads, hd).transpose(0, 2, 1, 3)
    Vh = V.reshape(B, N, heads, hd).transpose(0, 2, 1, 3)
    s = jnp.einsum("bhqd,bhkd->bhqk", Qh, Kh) / jnp.sqrt(float(hd))
    a = jax.nn.softmax(s, axis=-1)
    o = jnp.einsum("bhqk,bhkd->bhqd", a, Vh).transpose(0, 2, 1, 3).reshape(B, N, D)
    x = x + (o @ p["wo"].T + p["bo"])

    xn2 = _ln_ref(x, p["g2"], p["be2"])
    h = jax.nn.gelu(xn2 @ p["w1"].T + p["b1"], approximate=False)
    return x + (h @ p["w2"].T + p["b2"])


def reference_forward(x, params, *, patch_size, heads):
    x = x.astype(jnp.float32)
    levels = params["levels"]
    patches = extract_patches(x, patch_size)              # (L, B, N, P)
    feats = []
    for i, lvl in enumerate(levels):
        tok = patches[i] @ lvl["wp"].T + lvl["bp"]
        for blk in lvl["blocks"]:
            tok = _block_ref(tok, blk, heads)
        feats.append(tok.mean(axis=1))
    h = jnp.concatenate(feats, axis=-1)
    return h @ params["w_out"].T + params["b_out"]


# --------------------------------------------------------------------------
# parameter construction
# --------------------------------------------------------------------------
def init_params(key, *, num_levels, depth, in_chans, patch_size,
                embed_dim, mlp_ratio):
    P = in_chans * patch_size * patch_size
    Dh = embed_dim * mlp_ratio
    Dout = embed_dim * num_levels
    keys = iter(jax.random.split(key, 256))

    def nrm(shape, scale):
        return (scale * jax.random.normal(next(keys), shape)).astype(jnp.float32)

    levels = []
    for _ in range(num_levels):
        blocks = []
        for _ in range(depth):
            blocks.append(dict(
                g1=1.0 + nrm((embed_dim,), 0.02),
                be1=nrm((embed_dim,), 0.02),
                w_in=nrm((3 * embed_dim, embed_dim), 1.0 / math.sqrt(embed_dim)),
                b_in=nrm((3 * embed_dim,), 0.02),
                wo=nrm((embed_dim, embed_dim), 1.0 / math.sqrt(embed_dim)),
                bo=nrm((embed_dim,), 0.02),
                g2=1.0 + nrm((embed_dim,), 0.02),
                be2=nrm((embed_dim,), 0.02),
                w1=nrm((Dh, embed_dim), 1.0 / math.sqrt(embed_dim)),
                b1=nrm((Dh,), 0.02),
                w2=nrm((embed_dim, Dh), 1.0 / math.sqrt(Dh)),
                b2=nrm((embed_dim,), 0.02),
            ))
        levels.append(dict(
            wp=nrm((embed_dim, P), 1.0 / math.sqrt(P)),
            bp=nrm((embed_dim,), 0.02),
            blocks=blocks,
        ))
    return dict(levels=levels,
                w_out=nrm((Dout, Dout), 1.0 / math.sqrt(Dout)),
                b_out=nrm((Dout,), 0.02))


# --------------------------------------------------------------------------
if __name__ == "__main__":
    # ViTEncoder(view_size=32, patch_size=8, in_chans=4, embed_dim=128,
    #            depth=2, num_levels=3); blocks use heads=8, mlp_ratio=8.
    B, L, C, H, W = 2, 3, 4, 32, 32
    PATCH, EMBED, DEPTH, HEADS, MLP = 8, 128, 2, 8, 8

    key = jax.random.PRNGKey(0)
    kp, kx = jax.random.split(key)
    params = init_params(kp, num_levels=L, depth=DEPTH, in_chans=C,
                         patch_size=PATCH, embed_dim=EMBED, mlp_ratio=MLP)
    x = jax.random.normal(kx, (B, L, C, H, W), jnp.float32)

    fwd = jax.jit(functools.partial(vit_encoder_forward,
                                    patch_size=PATCH, heads=HEADS))
    out = jax.block_until_ready(fwd(x, params))
    ref = jax.block_until_ready(
        reference_forward(x, params, patch_size=PATCH, heads=HEADS))

    assert out.shape == (B, EMBED * L), out.shape
    max_err = float(jnp.max(jnp.abs(out - ref)))
    assert max_err < 2e-3, f"mismatch vs reference, max abs err = {max_err}"
    print("KERNEL_OK")
</pallas_src>

<mosaic_0001>
module attributes {stable_mosaic.version = 11 : i64} {
  func.func @patch_proj_kernel(%arg0: i32, %arg1: memref<1x2x16x256xf32, #tpu.memory_space<vmem>>, %arg2: memref<1x256x128xf32, #tpu.memory_space<vmem>>, %arg3: memref<1x1x128xf32, #tpu.memory_space<vmem>>, %arg4: memref<1x2x16x128xf32, #tpu.memory_space<vmem>>) attributes {dimension_semantics = [#tpu.dimension_semantics<parallel>], iteration_bounds = array<i64: 3>, scalar_prefetch = 0 : i64, scratch_operands = 0 : i64, tpu.core_type = #tpu.core_type<tc>, window_params = [{transform_indices = @transform_0, window_bounds = array<i64: 1, 2, 16, 256>}, {transform_indices = @transform_1, window_bounds = array<i64: 1, 256, 128>}, {transform_indices = @transform_2, window_bounds = array<i64: 1, 1, 128>}, {transform_indices = @transform_3, window_bounds = array<i64: 1, 2, 16, 128>}]} {
    %c0 = arith.constant 0 : index
    %c0_0 = arith.constant 0 : index
    %c0_1 = arith.constant 0 : index
    %c0_2 = arith.constant 0 : index
    %0 = vector.load %arg1[%c0, %c0_0, %c0_1, %c0_2] : memref<1x2x16x256xf32, #tpu.memory_space<vmem>>, vector<1x2x16x256xf32>
    %1 = vector.shape_cast %0 : vector<1x2x16x256xf32> to vector<2x16x256xf32>
    %2 = vector.shape_cast %1 : vector<2x16x256xf32> to vector<32x256xf32>
    %c0_3 = arith.constant 0 : index
    %c0_4 = arith.constant 0 : index
    %c0_5 = arith.constant 0 : index
    %3 = vector.load %arg2[%c0_3, %c0_4, %c0_5] : memref<1x256x128xf32, #tpu.memory_space<vmem>>, vector<1x256x128xf32>
    %4 = vector.shape_cast %3 : vector<1x256x128xf32> to vector<256x128xf32>
    %cst = arith.constant dense<0.000000e+00> : vector<32x128xf32>
    %5 = tpu.matmul %2, %4, %cst {dimension_numbers = #tpu.dot_dimension_numbers<[1], [0], [0], [1], [0, 0, 1, 1], [], []>} : vector<32x256xf32>, vector<256x128xf32>, vector<32x128xf32> -> vector<32x128xf32>
    %c0_6 = arith.constant 0 : index
    %c0_7 = arith.constant 0 : index
    %c0_8 = arith.constant 0 : index
    %6 = vector.load %arg3[%c0_6, %c0_7, %c0_8] : memref<1x1x128xf32, #tpu.memory_space<vmem>>, vector<1x1x128xf32>
    %7 = vector.shape_cast %6 : vector<1x1x128xf32> to vector<1x128xf32>
    %8 = vector.broadcast %7 : vector<1x128xf32> to vector<32x128xf32>
    %9 = arith.addf %5, %8 : vector<32x128xf32>
    %10 = vector.shape_cast %9 : vector<32x128xf32> to vector<2x16x128xf32>
    %c0_9 = arith.constant 0 : index
    %c0_10 = arith.constant 0 : index
    %c0_11 = arith.constant 0 : index
    %c0_12 = arith.constant 0 : index
    %11 = vector.load %arg4[%c0_9, %c0_10, %c0_11, %c0_12] : memref<1x2x16x128xf32, #tpu.memory_space<vmem>>, vector<1x2x16x128xf32>
    %12 = vector.shape_cast %11 : vector<1x2x16x128xf32> to vector<2x16x128xf32>
    %13 = vector.shape_cast %10 : vector<2x16x128xf32> to vector<1x2x16x128xf32>
    tpu.vector_store %arg4[%c0_9, %c0_10, %c0_11, %c0_12], %13 {strides = array<i32>} : memref<1x2x16x128xf32, #tpu.memory_space<vmem>>, vector<1x2x16x128xf32>,
    return
  }
  func.func @transform_0(%arg0: i32) -> (i32, i32, i32, i32) {
    %c0_i32 = arith.constant 0 : i32
    %c0_i32_0 = arith.constant 0 : i32
    %c0_i32_1 = arith.constant 0 : i32
    %c0_i32_2 = arith.constant 0 : i32
    return %arg0, %c0_i32, %c0_i32_0, %c0_i32_1 : i32, i32, i32, i32
  }
  func.func @transform_1(%arg0: i32) -> (i32, i32, i32) {
    %c0_i32 = arith.constant 0 : i32
    %c0_i32_0 = arith.constant 0 : i32
    %c0_i32_1 = arith.constant 0 : i32
    return %arg0, %c0_i32, %c0_i32_0 : i32, i32, i32
  }
  func.func @transform_2(%arg0: i32) -> (i32, i32, i32) {
    %c0_i32 = arith.constant 0 : i32
    %c0_i32_0 = arith.constant 0 : i32
    %c0_i32_1 = arith.constant 0 : i32
    return %arg0, %c0_i32, %c0_i32_0 : i32, i32, i32
  }
  func.func @transform_3(%arg0: i32) -> (i32, i32, i32, i32) {
    %c0_i32 = arith.constant 0 : i32
    %c0_i32_0 = arith.constant 0 : i32
    %c0_i32_1 = arith.constant 0 : i32
    %c0_i32_2 = arith.constant 0 : i32
    return %arg0, %c0_i32, %c0_i32_0, %c0_i32_1 : i32, i32, i32, i32
  }
}

module attributes {stable_mosaic.version = 11 : i64} {
  func.func @transformer_block_kernel(%arg0: i32, %arg1: memref<1x16x128xf32, #tpu.memory_space<vmem>>, %arg2: memref<16x16xf32, #tpu.memory_space<vmem>>, %arg3: memref<1x128xf32, #tpu.memory_space<vmem>>, %arg4: memref<1x128xf32, #tpu.memory_space<vmem>>, %arg5: memref<128x128xf32, #tpu.memory_space<vmem>>, %arg6: memref<128x128xf32, #tpu.memory_space<vmem>>, %arg7: memref<128x128xf32, #tpu.memory_space<vmem>>, %arg8: memref<1x128xf32, #tpu.memory_space<vmem>>, %arg9: memref<1x128xf32, #tpu.memory_space<vmem>>, %arg10: memref<1x128xf32, #tpu.memory_space<vmem>>, %arg11: memref<128x128xf32, #tpu.memory_space<vmem>>, %arg12: memref<1x128xf32, #tpu.memory_space<vmem>>, %arg13: memref<1x128xf32, #tpu.memory_space<vmem>>, %arg14: memref<1x128xf32, #tpu.memory_space<vmem>>, %arg15: memref<128x1024xf32, #tpu.memory_space<vmem>>, %arg16: memref<1x1024xf32, #tpu.memory_space<vmem>>, %arg17: memref<1024x128xf32, #tpu.memory_space<vmem>>, %arg18: memref<1x128xf32, #tpu.memory_space<vmem>>, %arg19: memref<1x16x128xf32, #tpu.memory_space<vmem>>) attributes {dimension_semantics = [#tpu.dimension_semantics<parallel>], iteration_bounds = array<i64: 2>, scalar_prefetch = 0 : i64, scratch_operands = 0 : i64, tpu.core_type = #tpu.core_type<tc>, window_params = [{transform_indices = @transform_0, window_bounds = array<i64: 1, 16, 128>}, {pipeline_mode = #tpu.pipeline_mode<synchronous>, transform_indices = @transform_1, window_bounds = array<i64: 16, 16>}, {pipeline_mode = #tpu.pipeline_mode<synchronous>, transform_indices = @transform_2, window_bounds = array<i64: 1, 128>}, {pipeline_mode = #tpu.pipeline_mode<synchronous>, transform_indices = @transform_3, window_bounds = array<i64: 1, 128>}, {pipeline_mode = #tpu.pipeline_mode<synchronous>, transform_indices = @transform_4, window_bounds = array<i64: 128, 128>}, {pipeline_mode = #tpu.pipeline_mode<synchronous>, transform_indices = @transform_5, window_bounds = array<i64: 128, 128>}, {pipeline_mode = #tpu.pipeline_mode<synchronous>, transform_indices = @transform_6, window_bounds = array<i64: 128, 128>}, {pipeline_mode = #tpu.pipeline_mode<synchronous>, transform_indices = @transform_7, window_bounds = array<i64: 1, 128>}, {pipeline_mode = #tpu.pipeline_mode<synchronous>, transform_indices = @transform_8, window_bounds = array<i64: 1, 128>}, {pipeline_mode = #tpu.pipeline_mode<synchronous>, transform_indices = @transform_9, window_bounds = array<i64: 1, 128>}, {pipeline_mode = #tpu.pipeline_mode<synchronous>, transform_indices = @transform_10, window_bounds = array<i64: 128, 128>}, {pipeline_mode = #tpu.pipeline_mode<synchronous>, transform_indices = @transform_11, window_bounds = array<i64: 1, 128>}, {pipeline_mode = #tpu.pipeline_mode<synchronous>, transform_indices = @transform_12, window_bounds = array<i64: 1, 128>}, {pipeline_mode = #tpu.pipeline_mode<synchronous>, transform_indices = @transform_13, window_bounds = array<i64: 1, 128>}, {pipeline_mode = #tpu.pipeline_mode<synchronous>, transform_indices = @transform_14, window_bounds = array<i64: 128, 1024>}, {pipeline_mode = #tpu.pipeline_mode<synchronous>, transform_indices = @transform_15, window_bounds = array<i64: 1, 1024>}, {pipeline_mode = #tpu.pipeline_mode<synchronous>, transform_indices = @transform_16, window_bounds = array<i64: 1024, 128>}, {pipeline_mode = #tpu.pipeline_mode<synchronous>, transform_indices = @transform_17, window_bounds = array<i64: 1, 128>}, {transform_indices = @transform_18, window_bounds = array<i64: 1, 16, 128>}]} {
    %c0 = arith.constant 0 : index
    %c0_0 = arith.constant 0 : index
    %c0_1 = arith.constant 0 : index
    %0 = vector.load %arg1[%c0, %c0_0, %c0_1] : memref<1x16x128xf32, #tpu.memory_space<vmem>>, vector<1x16x128xf32>
    %1 = vector.shape_cast %0 : vector<1x16x128xf32> to vector<16x128xf32>
    %c0_2 = arith.constant 0 : index
    %c0_3 = arith.constant 0 : index
    %2 = vector.load %arg3[%c0_2, %c0_3] : memref<1x128xf32, #tpu.memory_space<vmem>>, vector<1x128xf32>
    %c0_4 = arith.constant 0 : index
    %c0_5 = arith.constant 0 : index
    %3 = vector.load %arg4[%c0_4, %c0_5] : memref<1x128xf32, #tpu.memory_space<vmem>>, vector<1x128xf32>
    %cst = arith.constant dense<0.000000e+00> : vector<16xf32>
    %4 = vector.multi_reduction <add>, %1, %cst [1] : vector<16x128xf32> to vector<16xf32>
    %5 = vector.shape_cast %4 : vector<16xf32> to vector<16x1xf32>
    %cst_6 = arith.constant 1.280000e+02 : f32
    %6 = vector.broadcast %cst_6 : f32 to vector<16x1xf32>
    %7 = arith.divf %5, %6 : vector<16x1xf32>
    %8 = vector.broadcast %7 : vector<16x1xf32> to vector<16x128xf32>
    %9 = arith.subf %1, %8 : vector<16x128xf32>
    %10 = arith.mulf %9, %9 : vector<16x128xf32>
    %cst_7 = arith.constant dense<0.000000e+00> : vector<16xf32>
    %11 = vector.multi_reduction <add>, %10, %cst_7 [1] : vector<16x128xf32> to vector<16xf32>
    %12 = vector.shape_cast %11 : vector<16xf32> to vector<16x1xf32>
    %cst_8 = arith.constant 1.280000e+02 : f32
    %13 = vector.broadcast %cst_8 : f32 to vector<16x1xf32>
    %14 = arith.divf %12, %13 : vector<16x1xf32>
    %15 = vector.broadcast %7 : vector<16x1xf32> to vector<16x128xf32>
    %16 = arith.subf %1, %15 : vector<16x128xf32>
    %cst_9 = arith.constant 9.99999974E-6 : f32
    %17 = vector.broadcast %cst_9 : f32 to vector<16x1xf32>
    %18 = arith.addf %14, %17 : vector<16x1xf32>
    %19 = math.rsqrt %18 : vector<16x1xf32>
    %20 = vector.broadcast %19 : vector<16x1xf32> to vector<16x128xf32>
    %21 = arith.mulf %16, %20 : vector<16x128xf32>
    %22 = vector.broadcast %2 : vector<1x128xf32> to vector<16x128xf32>
    %23 = arith.mulf %21, %22 : vector<16x128xf32>
    %24 = vector.broadcast %3 : vector<1x128xf32> to vector<16x128xf32>
    %25 = arith.addf %23, %24 : vector<16x128xf32>
    %c0_10 = arith.constant 0 : index
    %c0_11 = arith.constant 0 : index
    %26 = vector.load %arg2[%c0_10, %c0_11] : memref<16x16xf32, #tpu.memory_space<vmem>>, vector<16x16xf32>
    %27 = vector.extract_strided_slice %26 {offsets = [0, 0], sizes = [16, 8], strides = [1, 1]} : vector<16x16xf32> to vector<16x8xf32>
    %28 = vector.extract_strided_slice %26 {offsets = [0, 8], sizes = [16, 8], strides = [1, 1]} : vector<16x16xf32> to vector<16x8xf32>
    %29 = vector.extract_strided_slice %25 {offsets = [0, 0], sizes = [16, 8], strides = [1, 1]} : vector<16x128xf32> to vector<16x8xf32>
    %30 = vector.extract_strided_slice %25 {offsets = [0, 8], sizes = [16, 8], strides = [1, 1]} : vector<16x128xf32> to vector<16x8xf32>
    %31 = arith.mulf %29, %28 : vector<16x8xf32>
    %32 = arith.mulf %30, %27 : vector<16x8xf32>
    %33 = arith.subf %31, %32 : vector<16x8xf32>
    %34 = arith.mulf %29, %27 : vector<16x8xf32>
    %35 = arith.mulf %30, %28 : vector<16x8xf32>
    %36 = arith.addf %34, %35 : vector<16x8xf32>
    %37 = vector.extract_strided_slice %25 {offsets = [0, 16], sizes = [16, 8], strides = [1, 1]} : vector<16x128xf32> to vector<16x8xf32>
    %38 = vector.extract_strided_slice %25 {offsets = [0, 24], sizes = [16, 8], strides = [1, 1]} : vector<16x128xf32> to vector<16x8xf32>
    %39 = arith.mulf %37, %28 : vector<16x8xf32>
    %40 = arith.mulf %38, %27 : vector<16x8xf32>
    %41 = arith.subf %39, %40 : vector<16x8xf32>
    %42 = arith.mulf %37, %27 : vector<16x8xf32>
    %43 = arith.mulf %38, %28 : vector<16x8xf32>
    %44 = arith.addf %42, %43 : vector<16x8xf32>
    %45 = vector.extract_strided_slice %25 {offsets = [0, 32], sizes = [16, 8], strides = [1, 1]} : vector<16x128xf32> to vector<16x8xf32>
    %46 = vector.extract_strided_slice %25 {offsets = [0, 40], sizes = [16, 8], strides = [1, 1]} : vector<16x128xf32> to vector<16x8xf32>
    %47 = arith.mulf %45, %28 : vector<16x8xf32>
    %48 = arith.mulf %46, %27 : vector<16x8xf32>
    %49 = arith.subf %47, %48 : vector<16x8xf32>
    %50 = arith.mulf %45, %27 : vector<16x8xf32>
    %51 = arith.mulf %46, %28 : vector<16x8xf32>
    %52 = arith.addf %50, %51 : vector<16x8xf32>
    %53 = vector.extract_strided_slice %25 {offsets = [0, 48], sizes = [16, 8], strides = [1, 1]} : vector<16x128xf32> to vector<16x8xf32>
    %54 = vector.extract_strided_slice %25 {offsets = [0, 56], sizes = [16, 8], strides = [1, 1]} : vector<16x128xf32> to vector<16x8xf32>
    %55 = arith.mulf %53, %28 : vector<16x8xf32>
    %56 = arith.mulf %54, %27 : vector<16x8xf32>
    %57 = arith.subf %55, %56 : vector<16x8xf32>
    %58 = arith.mulf %53, %27 : vector<16x8xf32>
    %59 = arith.mulf %54, %28 : vector<16x8xf32>
    %60 = arith.addf %58, %59 : vector<16x8xf32>
    %61 = vector.extract_strided_slice %25 {offsets = [0, 64], sizes = [16, 8], strides = [1, 1]} : vector<16x128xf32> to vector<16x8xf32>
    %62 = vector.extract_strided_slice %25 {offsets = [0, 72], sizes = [16, 8], strides = [1, 1]} : vector<16x128xf32> to vector<16x8xf32>
    %63 = arith.mulf %61, %28 : vector<16x8xf32>
    %64 = arith.mulf %62, %27 : vector<16x8xf32>
    %65 = arith.subf %63, %64 : vector<16x8xf32>
    %66 = arith.mulf %61, %27 : vector<16x8xf32>
    %67 = arith.mulf %62, %28 : vector<16x8xf32>
    %68 = arith.addf %66, %67 : vector<16x8xf32>
    %69 = vector.extract_strided_slice %25 {offsets = [0, 80], sizes = [16, 8], strides = [1, 1]} : vector<16x128xf32> to vector<16x8xf32>
    %70 = vector.extract_strided_slice %25 {offsets = [0, 88], sizes = [16, 8], strides = [1, 1]} : vector<16x128xf32> to vector<16x8xf32>
    %71 = arith.mulf %69, %28 : vector<16x8xf32>
    %72 = arith.mulf %70, %27 : vector<16x8xf32>
    %73 = arith.subf %71, %72 : vector<16x8xf32>
    %74 = arith.mulf %69, %27 : vector<16x8xf32>
    %75 = arith.mulf %70, %28 : vector<16x8xf32>
    %76 = arith.addf %74, %75 : vector<16x8xf32>
    %77 = vector.extract_strided_slice %25 {offsets = [0, 96], sizes = [16, 8], strides = [1, 1]} : vector<16x128xf32> to vector<16x8xf32>
    %78 = vector.extract_strided_slice %25 {offsets = [0, 104], sizes = [16, 8], strides = [1, 1]} : vector<16x128xf32> to vector<16x8xf32>
    %79 = arith.mulf %77, %28 : vector<16x8xf32>
    %80 = arith.mulf %78, %27 : vector<16x8xf32>
    %81 = arith.subf %79, %80 : vector<16x8xf32>
    %82 = arith.mulf %77, %27 : vector<16x8xf32>
    %83 = arith.mulf %78, %28 : vector<16x8xf32>
    %84 = arith.addf %82, %83 : vector<16x8xf32>
    %85 = vector.extract_strided_slice %25 {offsets = [0, 112], sizes = [16, 8], strides = [1, 1]} : vector<16x128xf32> to vector<16x8xf32>
    %86 = vector.extract_strided_slice %25 {offsets = [0, 120], sizes = [16, 8], strides = [1, 1]} : vector<16x128xf32> to vector<16x8xf32>
    %87 = arith.mulf %85, %28 : vector<16x8xf32>
    %88 = arith.mulf %86, %27 : vector<16x8xf32>
    %89 = arith.subf %87, %88 : vector<16x8xf32>
    %90 = arith.mulf %85, %27 : vector<16x8xf32>
    %91 = arith.mulf %86, %28 : vector<16x8xf32>
    %92 = arith.addf %90, %91 : vector<16x8xf32>
    %93 = tpu.concatenate %33, %36, %41, %44, %49, %52, %57, %60, %65, %68, %73, %76, %81, %84, %89, %92 in 1 : vector<16x8xf32>, vector<16x8xf32>, vector<16x8xf32>, vector<16x8xf32>, vector<16x8xf32>, vector<16x8xf32>, vector<16x8xf32>, vector<16x8xf32>, vector<16x8xf32>, vector<16x8xf32>, vector<16x8xf32>, vector<16x8xf32>, vector<16x8xf32>, vector<16x8xf32>, vector<16x8xf32>, vector<16x8xf32> -> vector<16x128xf32>
    %c0_12 = arith.constant 0 : index
    %c0_13 = arith.constant 0 : index
    %94 = vector.load %arg5[%c0_12, %c0_13] : memref<128x128xf32, #tpu.memory_space<vmem>>, vector<128x128xf32>
    %cst_14 = arith.constant dense<0.000000e+00> : vector<16x128xf32>
    %95 = tpu.matmul %93, %94, %cst_14 {dimension_numbers = #tpu.dot_dimension_numbers<[1], [0], [0], [1], [0, 0, 1, 1], [], []>} : vector<16x128xf32>, vector<128x128xf32>, vector<16x128xf32> -> vector<16x128xf32>
    %c0_15 = arith.constant 0 : index
    %c0_16 = arith.constant 0 : index
    %96 = vector.load %arg8[%c0_15, %c0_16] : memref<1x128xf32, #tpu.memory_space<vmem>>, vector<1x128xf32>
    %97 = vector.broadcast %96 : vector<1x128xf32> to vector<16x128xf32>
    %98 = arith.addf %95, %97 : vector<16x128xf32>
    %c0_17 = arith.constant 0 : index
    %c0_18 = arith.constant 0 : index
    %99 = vector.load %arg6[%c0_17, %c0_18] : memref<128x128xf32, #tpu.memory_space<vmem>>, vector<128x128xf32>
    %cst_19 = arith.constant dense<0.000000e+00> : vector<16x128xf32>
    %100 = tpu.matmul %93, %99, %cst_19 {dimension_numbers = #tpu.dot_dimension_numbers<[1], [0], [0], [1], [0, 0, 1, 1], [], []>} : vector<16x128xf32>, vector<128x128xf32>, vector<16x128xf32> -> vector<16x128xf32>
    %c0_20 = arith.constant 0 : index
    %c0_21 = arith.constant 0 : index
    %101 = vector.load %arg9[%c0_20, %c0_21] : memref<1x128xf32, #tpu.memory_space<vmem>>, vector<1x128xf32>
    %102 = vector.broadcast %101 : vector<1x128xf32> to vector<16x128xf32>
    %103 = arith.addf %100, %102 : vector<16x128xf32>
    %c0_22 = arith.constant 0 : index
    %c0_23 = arith.constant 0 : index
    %104 = vector.load %arg7[%c0_22, %c0_23] : memref<128x128xf32, #tpu.memory_space<vmem>>, vector<128x128xf32>
    %cst_24 = arith.constant dense<0.000000e+00> : vector<16x128xf32>
    %105 = tpu.matmul %25, %104, %cst_24 {dimension_numbers = #tpu.dot_dimension_numbers<[1], [0], [0], [1], [0, 0, 1, 1], [], []>} : vector<16x128xf32>, vector<128x128xf32>, vector<16x128xf32> -> vector<16x128xf32>
    %c0_25 = arith.constant 0 : index
    %c0_26 = arith.constant 0 : index
    %106 = vector.load %arg10[%c0_25, %c0_26] : memref<1x128xf32, #tpu.memory_space<vmem>>, vector<1x128xf32>
    %107 = vector.broadcast %106 : vector<1x128xf32> to vector<16x128xf32>
    %108 = arith.addf %105, %107 : vector<16x128xf32>
    %109 = vector.extract_strided_slice %98 {offsets = [0, 0], sizes = [16, 16], strides = [1, 1]} : vector<16x128xf32> to vector<16x16xf32>
    %110 = vector.extract_strided_slice %103 {offsets = [0, 0], sizes = [16, 16], strides = [1, 1]} : vector<16x128xf32> to vector<16x16xf32>
    %111 = vector.extract_strided_slice %108 {offsets = [0, 0], sizes = [16, 16], strides = [1, 1]} : vector<16x128xf32> to vector<16x16xf32>
    %112 = tpu.transpose %110, [1, 0] : vector<16x16xf32> -> vector<16x16xf32>
    %cst_27 = arith.constant dense<0.000000e+00> : vector<16x16xf32>
    %113 = tpu.matmul %109, %112, %cst_27 {dimension_numbers = #tpu.dot_dimension_numbers<[1], [0], [0], [1], [0, 0, 1, 1], [], []>} : vector<16x16xf32>, vector<16x16xf32>, vector<16x16xf32> -> vector<16x16xf32>
    %cst_28 = arith.constant 2.500000e-01 : f32
    %114 = vector.broadcast %cst_28 : f32 to vector<16x16xf32>
    %115 = arith.mulf %113, %114 : vector<16x16xf32>
    %cst_29 = arith.constant dense<0xFF800000> : vector<16xf32>
    %116 = vector.multi_reduction <maximumf>, %115, %cst_29 [1] : vector<16x16xf32> to vector<16xf32>
    %117 = vector.shape_cast %116 : vector<16xf32> to vector<16x1xf32>
    %118 = vector.broadcast %117 : vector<16x1xf32> to vector<16x16xf32>
    %119 = arith.subf %115, %118 : vector<16x16xf32>
    %120 = math.exp %119 : vector<16x16xf32>
    %cst_30 = arith.constant dense<0.000000e+00> : vector<16xf32>
    %121 = vector.multi_reduction <add>, %120, %cst_30 [1] : vector<16x16xf32> to vector<16xf32>
    %122 = vector.shape_cast %121 : vector<16xf32> to vector<16x1xf32>
    %123 = vector.broadcast %122 : vector<16x1xf32> to vector<16x16xf32>
    %124 = arith.divf %120, %123 : vector<16x16xf32>
    %cst_31 = arith.constant dense<0.000000e+00> : vector<16x16xf32>
    %125 = tpu.matmul %124, %111, %cst_31 {dimension_numbers = #tpu.dot_dimension_numbers<[1], [0], [0], [1], [0, 0, 1, 1], [], []>} : vector<16x16xf32>, vector<16x16xf32>, vector<16x16xf32> -> vector<16x16xf32>
    %126 = vector.extract_strided_slice %98 {offsets = [0, 16], sizes = [16, 16], strides = [1, 1]} : vector<16x128xf32> to vector<16x16xf32>
    %127 = vector.extract_strided_slice %103 {offsets = [0, 16], sizes = [16, 16], strides = [1, 1]} : vector<16x128xf32> to vector<16x16xf32>
    %128 = vector.extract_strided_slice %108 {offsets = [0, 16], sizes = [16, 16], strides = [1, 1]} : vector<16x128xf32> to vector<16x16xf32>
    %129 = tpu.transpose %127, [1, 0] : vector<16x16xf32> -> vector<16x16xf32>
    %cst_32 = arith.constant dense<0.000000e+00> : vector<16x16xf32>
    %130 = tpu.matmul %126, %129, %cst_32 {dimension_numbers = #tpu.dot_dimension_numbers<[1], [0], [0], [1], [0, 0, 1, 1], [], []>} : vector<16x16xf32>, vector<16x16xf32>, vector<16x16xf32> -> vector<16x16xf32>
    %cst_33 = arith.constant 2.500000e-01 : f32
    %131 = vector.broadcast %cst_33 : f32 to vector<16x16xf32>
    %132 = arith.mulf %130, %131 : vector<16x16xf32>
    %cst_34 = arith.constant dense<0xFF800000> : vector<16xf32>
    %133 = vector.multi_reduction <maximumf>, %132, %cst_34 [1] : vector<16x16xf32> to vector<16xf32>
    %134 = vector.shape_cast %133 : vector<16xf32> to vector<16x1xf32>
    %135 = vector.broadcast %134 : vector<16x1xf32> to vector<16x16xf32>
    %136 = arith.subf %132, %135 : vector<16x16xf32>
    %137 = math.exp %136 : vector<16x16xf32>
    %cst_35 = arith.constant dense<0.000000e+00> : vector<16xf32>
    %138 = vector.multi_reduction <add>, %137, %cst_35 [1] : vector<16x16xf32> to vector<16xf32>
    %139 = vector.shape_cast %138 : vector<16xf32> to vector<16x1xf32>
    %140 = vector.broadcast %139 : vector<16x1xf32> to vector<16x16xf32>
    %141 = arith.divf %137, %140 : vector<16x16xf32>
    %cst_36 = arith.constant dense<0.000000e+00> : vector<16x16xf32>
    %142 = tpu.matmul %141, %128, %cst_36 {dimension_numbers = #tpu.dot_dimension_numbers<[1], [0], [0], [1], [0, 0, 1, 1], [], []>} : vector<16x16xf32>, vector<16x16xf32>, vector<16x16xf32> -> vector<16x16xf32>
    %143 = vector.extract_strided_slice %98 {offsets = [0, 32], sizes = [16, 16], strides = [1, 1]} : vector<16x128xf32> to vector<16x16xf32>
    %144 = vector.extract_strided_slice %103 {offsets = [0, 32], sizes = [16, 16], strides = [1, 1]} : vector<16x128xf32> to vector<16x16xf32>
    %145 = vector.extract_strided_slice %108 {offsets = [0, 32], sizes = [16, 16], strides = [1, 1]} : vector<16x128xf32> to vector<16x16xf32>
    %146 = tpu.transpose %144, [1, 0] : vector<16x16xf32> -> vector<16x16xf32>
    %cst_37 = arith.constant dense<0.000000e+00> : vector<16x16xf32>
    %147 = tpu.matmul %143, %146, %cst_37 {dimension_numbers = #tpu.dot_dimension_numbers<[1], [0], [0], [1], [0, 0, 1, 1], [], []>} : vector<16x16xf32>, vector<16x16xf32>, vector<16x16xf32> -> vector<16x16xf32>
    %cst_38 = arith.constant 2.500000e-01 : f32
    %148 = vector.broadcast %cst_38 : f32 to vector<16x16xf32>
    %149 = arith.mulf %147, %148 : vector<16x16xf32>
    %cst_39 = arith.constant dense<0xFF800000> : vector<16xf32>
    %150 = vector.multi_reduction <maximumf>, %149, %cst_39 [1] : vector<16x16xf32> to vector<16xf32>
    %151 = vector.shape_cast %150 : vector<16xf32> to vector<16x1xf32>
    %152 = vector.broadcast %151 : vector<16x1xf32> to vector<16x16xf32>
    %153 = arith.subf %149, %152 : vector<16x16xf32>
    %154 = math.exp %153 : vector<16x16xf32>
    %cst_40 = arith.constant dense<0.000000e+00> : vector<16xf32>
    %155 = vector.multi_reduction <add>, %154, %cst_40 [1] : vector<16x16xf32> to vector<16xf32>
    %156 = vector.shape_cast %155 : vector<16xf32> to vector<16x1xf32>
    %157 = vector.broadcast %156 : vector<16x1xf32> to vector<16x16xf32>
    %158 = arith.divf %154, %157 : vector<16x16xf32>
    %cst_41 = arith.constant dense<0.000000e+00> : vector<16x16xf32>
    %159 = tpu.matmul %158, %145, %cst_41 {dimension_numbers = #tpu.dot_dimension_numbers<[1], [0], [0], [1], [0, 0, 1, 1], [], []>} : vector<16x16xf32>, vector<16x16xf32>, vector<16x16xf32> -> vector<16x16xf32>
    %160 = vector.extract_strided_slice %98 {offsets = [0, 48], sizes = [16, 16], strides = [1, 1]} : vector<16x128xf32> to vector<16x16xf32>
    %161 = vector.extract_strided_slice %103 {offsets = [0, 48], sizes = [16, 16], strides = [1, 1]} : vector<16x128xf32> to vector<16x16xf32>
    %162 = vector.extract_strided_slice %108 {offsets = [0, 48], sizes = [16, 16], strides = [1, 1]} : vector<16x128xf32> to vector<16x16xf32>
    %163 = tpu.transpose %161, [1, 0] : vector<16x16xf32> -> vector<16x16xf32>
    %cst_42 = arith.constant dense<0.000000e+00> : vector<16x16xf32>
    %164 = tpu.matmul %160, %163, %cst_42 {dimension_numbers = #tpu.dot_dimension_numbers<[1], [0], [0], [1], [0, 0, 1, 1], [], []>} : vector<16x16xf32>, vector<16x16xf32>, vector<16x16xf32> -> vector<16x16xf32>
    %cst_43 = arith.constant 2.500000e-01 : f32
    %165 = vector.broadcast %cst_43 : f32 to vector<16x16xf32>
    %166 = arith.mulf %164, %165 : vector<16x16xf32>
    %cst_44 = arith.constant dense<0xFF800000> : vector<16xf32>
    %167 = vector.multi_reduction <maximumf>, %166, %cst_44 [1] : vector<16x16xf32> to vector<16xf32>
    %168 = vector.shape_cast %167 : vector<16xf32> to vector<16x1xf32>
    %169 = vector.broadcast %168 : vector<16x1xf32> to vector<16x16xf32>
    %170 = arith.subf %166, %169 : vector<16x16xf32>
    %171 = math.exp %170 : vector<16x16xf32>
    %cst_45 = arith.constant dense<0.000000e+00> : vector<16xf32>
    %172 = vector.multi_reduction <add>, %171, %cst_45 [1] : vector<16x16xf32> to vector<16xf32>
    %173 = vector.shape_cast %172 : vector<16xf32> to vector<16x1xf32>
    %174 = vector.broadcast %173 : vector<16x1xf32> to vector<16x16xf32>
    %175 = arith.divf %171, %174 : vector<16x16xf32>
    %cst_46 = arith.constant dense<0.000000e+00> : vector<16x16xf32>
    %176 = tpu.matmul %175, %162, %cst_46 {dimension_numbers = #tpu.dot_dimension_numbers<[1], [0], [0], [1], [0, 0, 1, 1], [], []>} : vector<16x16xf32>, vector<16x16xf32>, vector<16x16xf32> -> vector<16x16xf32>
    %177 = vector.extract_strided_slice %98 {offsets = [0, 64], sizes = [16, 16], strides = [1, 1]} : vector<16x128xf32> to vector<16x16xf32>
    %178 = vector.extract_strided_slice %103 {offsets = [0, 64], sizes = [16, 16], strides = [1, 1]} : vector<16x128xf32> to vector<16x16xf32>
    %179 = vector.extract_strided_slice %108 {offsets = [0, 64], sizes = [16, 16], strides = [1, 1]} : vector<16x128xf32> to vector<16x16xf32>
    %180 = tpu.transpose %178, [1, 0] : vector<16x16xf32> -> vector<16x16xf32>
    %cst_47 = arith.constant dense<0.000000e+00> : vector<16x16xf32>
    %181 = tpu.matmul %177, %180, %cst_47 {dimension_numbers = #tpu.dot_dimension_numbers<[1], [0], [0], [1], [0, 0, 1, 1], [], []>} : vector<16x16xf32>, vector<16x16xf32>, vector<16x16xf32> -> vector<16x16xf32>
    %cst_48 = arith.constant 2.500000e-01 : f32
    %182 = vector.broadcast %cst_48 : f32 to vector<16x16xf32>
    %183 = arith.mulf %181, %182 : vector<16x16xf32>
    %cst_49 = arith.constant dense<0xFF800000> : vector<16xf32>
    %184 = vector.multi_reduction <maximumf>, %183, %cst_49 [1] : vector<16x16xf32> to vector<16xf32>
    %185 = vector.shape_cast %184 : vector<16xf32> to vector<16x1xf32>
    %186 = vector.broadcast %185 : vector<16x1xf32> to vector<16x16xf32>
    %187 = arith.subf %183, %186 : vector<16x16xf32>
    %188 = math.exp %187 : vector<16x16xf32>
    %cst_50 = arith.constant dense<0.000000e+00> : vector<16xf32>
    %189 = vector.multi_reduction <add>, %188, %cst_50 [1] : vector<16x16xf32> to vector<16xf32>
    %190 = vector.shape_cast %189 : vector<16xf32> to vector<16x1xf32>
    %191 = vector.broadcast %190 : vector<16x1xf32> to vector<16x16xf32>
    %192 = arith.divf %188, %191 : vector<16x16xf32>
    %cst_51 = arith.constant dense<0.000000e+00> : vector<16x16xf32>
    %193 = tpu.matmul %192, %179, %cst_51 {dimension_numbers = #tpu.dot_dimension_numbers<[1], [0], [0], [1], [0, 0, 1, 1], [], []>} : vector<16x16xf32>, vector<16x16xf32>, vector<16x16xf32> -> vector<16x16xf32>
    %194 = vector.extract_strided_slice %98 {offsets = [0, 80], sizes = [16, 16], strides = [1, 1]} : vector<16x128xf32> to vector<16x16xf32>
    %195 = vector.extract_strided_slice %103 {offsets = [0, 80], sizes = [16, 16], strides = [1, 1]} : vector<16x128xf32> to vector<16x16xf32>
    %196 = vector.extract_strided_slice %108 {offsets = [0, 80], sizes = [16, 16], strides = [1, 1]} : vector<16x128xf32> to vector<16x16xf32>
    %197 = tpu.transpose %195, [1, 0] : vector<16x16xf32> -> vector<16x16xf32>
    %cst_52 = arith.constant dense<0.000000e+00> : vector<16x16xf32>
    %198 = tpu.matmul %194, %197, %cst_52 {dimension_numbers = #tpu.dot_dimension_numbers<[1], [0], [0], [1], [0, 0, 1, 1], [], []>} : vector<16x16xf32>, vector<16x16xf32>, vector<16x16xf32> -> vector<16x16xf32>
    %cst_53 = arith.constant 2.500000e-01 : f32
    %199 = vector.broadcast %cst_53 : f32 to vector<16x16xf32>
    %200 = arith.mulf %198, %199 : vector<16x16xf32>
    %cst_54 = arith.constant dense<0xFF800000> : vector<16xf32>
    %201 = vector.multi_reduction <maximumf>, %200, %cst_54 [1] : vector<16x16xf32> to vector<16xf32>
    %202 = vector.shape_cast %201 : vector<16xf32> to vector<16x1xf32>
    %203 = vector.broadcast %202 : vector<16x1xf32> to vector<16x16xf32>
    %204 = arith.subf %200, %203 : vector<16x16xf32>
    %205 = math.exp %204 : vector<16x16xf32>
    %cst_55 = arith.constant dense<0.000000e+00> : vector<16xf32>
    %206 = vector.multi_reduction <add>, %205, %cst_55 [1] : vector<16x16xf32> to vector<16xf32>
    %207 = vector.shape_cast %206 : vector<16xf32> to vector<16x1xf32>
    %208 = vector.broadcast %207 : vector<16x1xf32> to vector<16x16xf32>
    %209 = arith.divf %205, %208 : vector<16x16xf32>
    %cst_56 = arith.constant dense<0.000000e+00> : vector<16x16xf32>
    %210 = tpu.matmul %209, %196, %cst_56 {dimension_numbers = #tpu.dot_dimension_numbers<[1], [0], [0], [1], [0, 0, 1, 1], [], []>} : vector<16x16xf32>, vector<16x16xf32>, vector<16x16xf32> -> vector<16x16xf32>
    %211 = vector.extract_strided_slice %98 {offsets = [0, 96], sizes = [16, 16], strides = [1, 1]} : vector<16x128xf32> to vector<16x16xf32>
    %212 = vector.extract_strided_slice %103 {offsets = [0, 96], sizes = [16, 16], strides = [1, 1]} : vector<16x128xf32> to vector<16x16xf32>
    %213 = vector.extract_strided_slice %108 {offsets = [0, 96], sizes = [16, 16], strides = [1, 1]} : vector<16x128xf32> to vector<16x16xf32>
    %214 = tpu.transpose %212, [1, 0] : vector<16x16xf32> -> vector<16x16xf32>
    %cst_57 = arith.constant dense<0.000000e+00> : vector<16x16xf32>
    %215 = tpu.matmul %211, %214, %cst_57 {dimension_numbers = #tpu.dot_dimension_numbers<[1], [0], [0], [1], [0, 0, 1, 1], [], []>} : vector<16x16xf32>, vector<16x16xf32>, vector<16x16xf32> -> vector<16x16xf32>
    %cst_58 = arith.constant 2.500000e-01 : f32
    %216 = vector.broadcast %cst_58 : f32 to vector<16x16xf32>
    %217 = arith.mulf %215, %216 : vector<16x16xf32>
    %cst_59 = arith.constant dense<0xFF800000> : vector<16xf32>
    %218 = vector.multi_reduction <maximumf>, %217, %cst_59 [1] : vector<16x16xf32> to vector<16xf32>
    %219 = vector.shape_cast %218 : vector<16xf32> to vector<16x1xf32>
    %220 = vector.broadcast %219 : vector<16x1xf32> to vector<16x16xf32>
    %221 = arith.subf %217, %220 : vector<16x16xf32>
    %222 = math.exp %221 : vector<16x16xf32>
    %cst_60 = arith.constant dense<0.000000e+00> : vector<16xf32>
    %223 = vector.multi_reduction <add>, %222, %cst_60 [1] : vector<16x16xf32> to vector<16xf32>
    %224 = vector.shape_cast %223 : vector<16xf32> to vector<16x1xf32>
    %225 = vector.broadcast %224 : vector<16x1xf32> to vector<16x16xf32>
    %226 = arith.divf %222, %225 : vector<16x16xf32>
    %cst_61 = arith.constant dense<0.000000e+00> : vector<16x16xf32>
    %227 = tpu.matmul %226, %213, %cst_61 {dimension_numbers = #tpu.dot_dimension_numbers<[1], [0], [0], [1], [0, 0, 1, 1], [], []>} : vector<16x16xf32>, vector<16x16xf32>, vector<16x16xf32> -> vector<16x16xf32>
    %228 = vector.extract_strided_slice %98 {offsets = [0, 112], sizes = [16, 16], strides = [1, 1]} : vector<16x128xf32> to vector<16x16xf32>
    %229 = vector.extract_strided_slice %103 {offsets = [0, 112], sizes = [16, 16], strides = [1, 1]} : vector<16x128xf32> to vector<16x16xf32>
    %230 = vector.extract_strided_slice %108 {offsets = [0, 112], sizes = [16, 16], strides = [1, 1]} : vector<16x128xf32> to vector<16x16xf32>
    %231 = tpu.transpose %229, [1, 0] : vector<16x16xf32> -> vector<16x16xf32>
    %cst_62 = arith.constant dense<0.000000e+00> : vector<16x16xf32>
    %232 = tpu.matmul %228, %231, %cst_62 {dimension_numbers = #tpu.dot_dimension_numbers<[1], [0], [0], [1], [0, 0, 1, 1], [], []>} : vector<16x16xf32>, vector<16x16xf32>, vector<16x16xf32> -> vector<16x16xf32>
    %cst_63 = arith.constant 2.500000e-01 : f32
    %233 = vector.broadcast %cst_63 : f32 to vector<16x16xf32>
    %234 = arith.mulf %232, %233 : vector<16x16xf32>
    %cst_64 = arith.constant dense<0xFF800000> : vector<16xf32>
    %235 = vector.multi_reduction <maximumf>, %234, %cst_64 [1] : vector<16x16xf32> to vector<16xf32>
    %236 = vector.shape_cast %235 : vector<16xf32> to vector<16x1xf32>
    %237 = vector.broadcast %236 : vector<16x1xf32> to vector<16x16xf32>
    %238 = arith.subf %234, %237 : vector<16x16xf32>
    %239 = math.exp %238 : vector<16x16xf32>
    %cst_65 = arith.constant dense<0.000000e+00> : vector<16xf32>
    %240 = vector.multi_reduction <add>, %239, %cst_65 [1] : vector<16x16xf32> to vector<16xf32>
    %241 = vector.shape_cast %240 : vector<16xf32> to vector<16x1xf32>
    %242 = vector.broadcast %241 : vector<16x1xf32> to vector<16x16xf32>
    %243 = arith.divf %239, %242 : vector<16x16xf32>
    %cst_66 = arith.constant dense<0.000000e+00> : vector<16x16xf32>
    %244 = tpu.matmul %243, %230, %cst_66 {dimension_numbers = #tpu.dot_dimension_numbers<[1], [0], [0], [1], [0, 0, 1, 1], [], []>} : vector<16x16xf32>, vector<16x16xf32>, vector<16x16xf32> -> vector<16x16xf32>
    %245 = tpu.concatenate %125, %142, %159, %176, %193, %210, %227, %244 in 1 : vector<16x16xf32>, vector<16x16xf32>, vector<16x16xf32>, vector<16x16xf32>, vector<16x16xf32>, vector<16x16xf32>, vector<16x16xf32>, vector<16x16xf32> -> vector<16x128xf32>
    %c0_67 = arith.constant 0 : index
    %c0_68 = arith.constant 0 : index
    %246 = vector.load %arg11[%c0_67, %c0_68] : memref<128x128xf32, #tpu.memory_space<vmem>>, vector<128x128xf32>
    %cst_69 = arith.constant dense<0.000000e+00> : vector<16x128xf32>
    %247 = tpu.matmul %245, %246, %cst_69 {dimension_numbers = #tpu.dot_dimension_numbers<[1], [0], [0], [1], [0, 0, 1, 1], [], []>} : vector<16x128xf32>, vector<128x128xf32>, vector<16x128xf32> -> vector<16x128xf32>
    %c0_70 = arith.constant 0 : index
    %c0_71 = arith.constant 0 : index
    %248 = vector.load %arg12[%c0_70, %c0_71] : memref<1x128xf32, #tpu.memory_space<vmem>>, vector<1x128xf32>
    %249 = vector.broadcast %248 : vector<1x128xf32> to vector<16x128xf32>
    %250 = arith.addf %247, %249 : vector<16x128xf32>
    %251 = arith.addf %1, %250 : vector<16x128xf32>
    %c0_72 = arith.constant 0 : index
    %c0_73 = arith.constant 0 : index
    %252 = vector.load %arg13[%c0_72, %c0_73] : memref<1x128xf32, #tpu.memory_space<vmem>>, vector<1x128xf32>
    %c0_74 = arith.constant 0 : index
    %c0_75 = arith.constant 0 : index
    %253 = vector.load %arg14[%c0_74, %c0_75] : memref<1x128xf32, #tpu.memory_space<vmem>>, vector<1x128xf32>
    %cst_76 = arith.constant dense<0.000000e+00> : vector<16xf32>
    %254 = vector.multi_reduction <add>, %251, %cst_76 [1] : vector<16x128xf32> to vector<16xf32>
    %255 = vector.shape_cast %254 : vector<16xf32> to vector<16x1xf32>
    %cst_77 = arith.constant 1.280000e+02 : f32
    %256 = vector.broadcast %cst_77 : f32 to vector<16x1xf32>
    %257 = arith.divf %255, %256 : vector<16x1xf32>
    %258 = vector.broadcast %257 : vector<16x1xf32> to vector<16x128xf32>
    %259 = arith.subf %251, %258 : vector<16x128xf32>
    %260 = arith.mulf %259, %259 : vector<16x128xf32>
    %cst_78 = arith.constant dense<0.000000e+00> : vector<16xf32>
    %261 = vector.multi_reduction <add>, %260, %cst_78 [1] : vector<16x128xf32> to vector<16xf32>
    %262 = vector.shape_cast %261 : vector<16xf32> to vector<16x1xf32>
    %cst_79 = arith.constant 1.280000e+02 : f32
    %263 = vector.broadcast %cst_79 : f32 to vector<16x1xf32>
    %264 = arith.divf %262, %263 : vector<16x1xf32>
    %265 = vector.broadcast %257 : vector<16x1xf32> to vector<16x128xf32>
    %266 = arith.subf %251, %265 : vector<16x128xf32>
    %cst_80 = arith.constant 9.99999974E-6 : f32
    %267 = vector.broadcast %cst_80 : f32 to vector<16x1xf32>
    %268 = arith.addf %264, %267 : vector<16x1xf32>
    %269 = math.rsqrt %268 : vector<16x1xf32>
    %270 = vector.broadcast %269 : vector<16x1xf32> to vector<16x128xf32>
    %271 = arith.mulf %266, %270 : vector<16x128xf32>
    %272 = vector.broadcast %252 : vector<1x128xf32> to vector<16x128xf32>
    %273 = arith.mulf %271, %272 : vector<16x128xf32>
    %274 = vector.broadcast %253 : vector<1x128xf32> to vector<16x128xf32>
    %275 = arith.addf %273, %274 : vector<16x128xf32>
    %c0_81 = arith.constant 0 : index
    %c0_82 = arith.constant 0 : index
    %276 = vector.load %arg15[%c0_81, %c0_82] : memref<128x1024xf32, #tpu.memory_space<vmem>>, vector<128x1024xf32>
    %cst_83 = arith.constant dense<0.000000e+00> : vector<16x1024xf32>
    %277 = tpu.matmul %275, %276, %cst_83 {dimension_numbers = #tpu.dot_dimension_numbers<[1], [0], [0], [1], [0, 0, 1, 1], [], []>} : vector<16x128xf32>, vector<128x1024xf32>, vector<16x1024xf32> -> vector<16x1024xf32>
    %c0_84 = arith.constant 0 : index
    %c0_85 = arith.constant 0 : index
    %278 = vector.load %arg16[%c0_84, %c0_85] : memref<1x1024xf32, #tpu.memory_space<vmem>>, vector<1x1024xf32>
    %279 = vector.broadcast %278 : vector<1x1024xf32> to vector<16x1024xf32>
    %280 = arith.addf %277, %279 : vector<16x1024xf32>
    %cst_86 = arith.constant 5.000000e-01 : f32
    %281 = vector.broadcast %cst_86 : f32 to vector<16x1024xf32>
    %282 = arith.mulf %281, %280 : vector<16x1024xf32>
    %cst_87 = arith.constant 0.707106769 : f32
    %283 = vector.broadcast %cst_87 : f32 to vector<16x1024xf32>
    %284 = arith.mulf %280, %283 : vector<16x1024xf32>
    %285 = math.absf %284 : vector<16x1024xf32>
    %cst_88 = arith.constant 0.327591091 : f32
    %286 = vector.broadcast %cst_88 : f32 to vector<16x1024xf32>
    %287 = arith.mulf %286, %285 : vector<16x1024xf32>
    %cst_89 = arith.constant 1.000000e+00 : f32
    %288 = vector.broadcast %cst_89 : f32 to vector<16x1024xf32>
    %289 = arith.addf %288, %287 : vector<16x1024xf32>
    %cst_90 = arith.constant 1.000000e+00 : f32
    %290 = vector.broadcast %cst_90 : f32 to vector<16x1024xf32>
    %291 = arith.divf %290, %289 : vector<16x1024xf32>
    %cst_91 = arith.constant 1.06140542 : f32
    %292 = vector.broadcast %cst_91 : f32 to vector<16x1024xf32>
    %293 = arith.mulf %292, %291 : vector<16x1024xf32>
    %cst_92 = arith.constant -1.45315206 : f32
    %294 = vector.broadcast %cst_92 : f32 to vector<16x1024xf32>
    %295 = arith.addf %293, %294 : vector<16x1024xf32>
    %296 = arith.mulf %295, %291 : vector<16x1024xf32>
    %cst_93 = arith.constant 1.42141378 : f32
    %297 = vector.broadcast %cst_93 : f32 to vector<16x1024xf32>
    %298 = arith.addf %296, %297 : vector<16x1024xf32>
    %299 = arith.mulf %298, %291 : vector<16x1024xf32>
    %cst_94 = arith.constant -0.284496725 : f32
    %300 = vector.broadcast %cst_94 : f32 to vector<16x1024xf32>
    %301 = arith.addf %299, %300 : vector<16x1024xf32>
    %302 = arith.mulf %301, %291 : vector<16x1024xf32>
    %cst_95 = arith.constant 0.254829586 : f32
    %303 = vector.broadcast %cst_95 : f32 to vector<16x1024xf32>
    %304 = arith.addf %302, %303 : vector<16x1024xf32>
    %305 = arith.mulf %304, %291 : vector<16x1024xf32>
    %306 = arith.mulf %285, %285 : vector<16x1024xf32>
    %cst_96 = arith.constant 0.000000e+00 : f32
    %307 = vector.broadcast %cst_96 : f32 to vector<16x1024xf32>
    %308 = arith.subf %307, %306 : vector<16x1024xf32>
    %309 = math.exp %308 : vector<16x1024xf32>
    %310 = arith.mulf %305, %309 : vector<16x1024xf32>
    %cst_97 = arith.constant 1.000000e+00 : f32
    %311 = vector.broadcast %cst_97 : f32 to vector<16x1024xf32>
    %312 = arith.subf %311, %310 : vector<16x1024xf32>
    %cst_98 = arith.constant 0.000000e+00 : f32
    %313 = vector.broadcast %cst_98 : f32 to vector<16x1024xf32>
    %314 = arith.cmpf oge, %284, %313 : vector<16x1024xf32>
    %cst_99 = arith.constant 0.000000e+00 : f32
    %315 = vector.broadcast %cst_99 : f32 to vector<16x1024xf32>
    %316 = arith.subf %315, %312 : vector<16x1024xf32>
    %317 = arith.select %314, %312, %316 : vector<16x1024xi1>, vector<16x1024xf32>
    %cst_100 = arith.constant 1.000000e+00 : f32
    %318 = vector.broadcast %cst_100 : f32 to vector<16x1024xf32>
    %319 = arith.addf %318, %317 : vector<16x1024xf32>
    %320 = arith.mulf %282, %319 : vector<16x1024xf32>
    %c0_101 = arith.constant 0 : index
    %c0_102 = arith.constant 0 : index
    %321 = vector.load %arg17[%c0_101, %c0_102] : memref<1024x128xf32, #tpu.memory_space<vmem>>, vector<1024x128xf32>
    %cst_103 = arith.constant dense<0.000000e+00> : vector<16x128xf32>
    %322 = tpu.matmul %320, %321, %cst_103 {dimension_numbers = #tpu.dot_dimension_numbers<[1], [0], [0], [1], [0, 0, 1, 1], [], []>} : vector<16x1024xf32>, vector<1024x128xf32>, vector<16x128xf32> -> vector<16x128xf32>
    %c0_104 = arith.constant 0 : index
    %c0_105 = arith.constant 0 : index
    %323 = vector.load %arg18[%c0_104, %c0_105] : memref<1x128xf32, #tpu.memory_space<vmem>>, vector<1x128xf32>
    %324 = vector.broadcast %323 : vector<1x128xf32> to vector<16x128xf32>
    %325 = arith.addf %322, %324 : vector<16x128xf32>
    %326 = arith.addf %251, %325 : vector<16x128xf32>
    %c0_106 = arith.constant 0 : index
    %c0_107 = arith.constant 0 : index
    %c0_108 = arith.constant 0 : index
    %327 = vector.load %arg19[%c0_106, %c0_107, %c0_108] : memref<1x16x128xf32, #tpu.memory_space<vmem>>, vector<1x16x128xf32>
    %328 = vector.shape_cast %327 : vector<1x16x128xf32> to vector<16x128xf32>
    %329 = vector.shape_cast %326 : vector<16x128xf32> to vector<1x16x128xf32>
    tpu.vector_store %arg19[%c0_106, %c0_107, %c0_108], %329 {strides = array<i32>} : memref<1x16x128xf32, #tpu.memory_space<vmem>>, vector<1x16x128xf32>,
    return
  }
  func.func @transform_0(%arg0: i32) -> (i32, i32, i32) {
    %c0_i32 = arith.constant 0 : i32
    %c0_i32_0 = arith.constant 0 : i32
    %c0_i32_1 = arith.constant 0 : i32
    return %arg0, %c0_i32, %c0_i32_0 : i32, i32, i32
  }
  func.func @transform_1(%arg0: i32) -> (i32, i32) {
    %c0_i32 = arith.constant 0 : i32
    %c0_i32_0 = arith.constant 0 : i32
    %c0_i32_1 = arith.constant 0 : i32
    return %c0_i32, %c0_i32_0 : i32, i32
  }
  func.func @transform_2(%arg0: i32) -> (i32, i32) {
    %c0_i32 = arith.constant 0 : i32
    %c0_i32_0 = arith.constant 0 : i32
    %c0_i32_1 = arith.constant 0 : i32
    return %c0_i32, %c0_i32_0 : i32, i32
  }
  func.func @transform_3(%arg0: i32) -> (i32, i32) {
    %c0_i32 = arith.constant 0 : i32
    %c0_i32_0 = arith.constant 0 : i32
    %c0_i32_1 = arith.constant 0 : i32
    return %c0_i32, %c0_i32_0 : i32, i32
  }
  func.func @transform_4(%arg0: i32) -> (i32, i32) {
    %c0_i32 = arith.constant 0 : i32
    %c0_i32_0 = arith.constant 0 : i32
    %c0_i32_1 = arith.constant 0 : i32
    return %c0_i32, %c0_i32_0 : i32, i32
  }
  func.func @transform_5(%arg0: i32) -> (i32, i32) {
    %c0_i32 = arith.constant 0 : i32
    %c0_i32_0 = arith.constant 0 : i32
    %c0_i32_1 = arith.constant 0 : i32
    return %c0_i32, %c0_i32_0 : i32, i32
  }
  func.func @transform_6(%arg0: i32) -> (i32, i32) {
    %c0_i32 = arith.constant 0 : i32
    %c0_i32_0 = arith.constant 0 : i32
    %c0_i32_1 = arith.constant 0 : i32
    return %c0_i32, %c0_i32_0 : i32, i32
  }
  func.func @transform_7(%arg0: i32) -> (i32, i32) {
    %c0_i32 = arith.constant 0 : i32
    %c0_i32_0 = arith.constant 0 : i32
    %c0_i32_1 = arith.constant 0 : i32
    return %c0_i32, %c0_i32_0 : i32, i32
  }
  func.func @transform_8(%arg0: i32) -> (i32, i32) {
    %c0_i32 = arith.constant 0 : i32
    %c0_i32_0 = arith.constant 0 : i32
    %c0_i32_1 = arith.constant 0 : i32
    return %c0_i32, %c0_i32_0 : i32, i32
  }
  func.func @transform_9(%arg0: i32) -> (i32, i32) {
    %c0_i32 = arith.constant 0 : i32
    %c0_i32_0 = arith.constant 0 : i32
    %c0_i32_1 = arith.constant 0 : i32
    return %c0_i32, %c0_i32_0 : i32, i32
  }
  func.func @transform_10(%arg0: i32) -> (i32, i32) {
    %c0_i32 = arith.constant 0 : i32
    %c0_i32_0 = arith.constant 0 : i32
    %c0_i32_1 = arith.constant 0 : i32
    return %c0_i32, %c0_i32_0 : i32, i32
  }
  func.func @transform_11(%arg0: i32) -> (i32, i32) {
    %c0_i32 = arith.constant 0 : i32
    %c0_i32_0 = arith.constant 0 : i32
    %c0_i32_1 = arith.constant 0 : i32
    return %c0_i32, %c0_i32_0 : i32, i32
  }
  func.func @transform_12(%arg0: i32) -> (i32, i32) {
    %c0_i32 = arith.constant 0 : i32
    %c0_i32_0 = arith.constant 0 : i32
    %c0_i32_1 = arith.constant 0 : i32
    return %c0_i32, %c0_i32_0 : i32, i32
  }
  func.func @transform_13(%arg0: i32) -> (i32, i32) {
    %c0_i32 = arith.constant 0 : i32
    %c0_i32_0 = arith.constant 0 : i32
    %c0_i32_1 = arith.constant 0 : i32
    return %c0_i32, %c0_i32_0 : i32, i32
  }
  func.func @transform_14(%arg0: i32) -> (i32, i32) {
    %c0_i32 = arith.constant 0 : i32
    %c0_i32_0 = arith.constant 0 : i32
    %c0_i32_1 = arith.constant 0 : i32
    return %c0_i32, %c0_i32_0 : i32, i32
  }
  func.func @transform_15(%arg0: i32) -> (i32, i32) {
    %c0_i32 = arith.constant 0 : i32
    %c0_i32_0 = arith.constant 0 : i32
    %c0_i32_1 = arith.constant 0 : i32
    return %c0_i32, %c0_i32_0 : i32, i32
  }
  func.func @transform_16(%arg0: i32) -> (i32, i32) {
    %c0_i32 = arith.constant 0 : i32
    %c0_i32_0 = arith.constant 0 : i32
    %c0_i32_1 = arith.constant 0 : i32
    return %c0_i32, %c0_i32_0 : i32, i32
  }
  func.func @transform_17(%arg0: i32) -> (i32, i32) {
    %c0_i32 = arith.constant 0 : i32
    %c0_i32_0 = arith.constant 0 : i32
    %c0_i32_1 = arith.constant 0 : i32
    return %c0_i32, %c0_i32_0 : i32, i32
  }
  func.func @transform_18(%arg0: i32) -> (i32, i32, i32) {
    %c0_i32 = arith.constant 0 : i32
    %c0_i32_0 = arith.constant 0 : i32
    %c0_i32_1 = arith.constant 0 : i32
    return %arg0, %c0_i32, %c0_i32_0 : i32, i32, i32
  }
}

module attributes {stable_mosaic.version = 11 : i64} {
  func.func @pool_fc_kernel(%arg0: i32, %arg1: memref<1x2x16x128xf32, #tpu.memory_space<vmem>>, %arg2: memref<1x128x384xf32, #tpu.memory_space<vmem>>, %arg3: memref<1x384xf32, #tpu.memory_space<vmem>>, %arg4: memref<2x384xf32, #tpu.memory_space<vmem>>) attributes {dimension_semantics = [#tpu.dimension_semantics<arbitrary>], iteration_bounds = array<i64: 3>, scalar_prefetch = 0 : i64, scratch_operands = 0 : i64, tpu.core_type = #tpu.core_type<tc>, window_params = [{transform_indices = @transform_0, window_bounds = array<i64: 1, 2, 16, 128>}, {transform_indices = @transform_1, window_bounds = array<i64: 1, 128, 384>}, {pipeline_mode = #tpu.pipeline_mode<synchronous>, transform_indices = @transform_2, window_bounds = array<i64: 1, 384>}, {pipeline_mode = #tpu.pipeline_mode<synchronous>, transform_indices = @transform_3, window_bounds = array<i64: 2, 384>}]} {
    %c0_i32 = arith.constant 0 : i32
    %0 = arith.cmpi eq, %arg0, %c0_i32 : i32
    %1 = arith.extui %0 : i1 to i32
    %c0_i32_0 = arith.constant 0 : i32
    %2 = arith.cmpi ne, %1, %c0_i32_0 : i32
    scf.if %2 {
      %c0_13 = arith.constant 0 : index
      %c0_14 = arith.constant 0 : index
      %14 = vector.load %arg3[%c0_13, %c0_14] : memref<1x384xf32, #tpu.memory_space<vmem>>, vector<1x384xf32>
      %15 = vector.shape_cast %14 : vector<1x384xf32> to vector<1x384xf32>
      %16 = vector.broadcast %15 : vector<1x384xf32> to vector<2x384xf32>
      %c0_15 = arith.constant 0 : index
      %c0_16 = arith.constant 0 : index
      %17 = vector.load %arg4[%c0_15, %c0_16] : memref<2x384xf32, #tpu.memory_space<vmem>>, vector<2x384xf32>
      tpu.vector_store %arg4[%c0_15, %c0_16], %16 {strides = array<i32>} : memref<2x384xf32, #tpu.memory_space<vmem>>, vector<2x384xf32>,
    } else {
    }
    %c0 = arith.constant 0 : index
    %c0_1 = arith.constant 0 : index
    %c0_2 = arith.constant 0 : index
    %c0_3 = arith.constant 0 : index
    %3 = vector.load %arg1[%c0, %c0_1, %c0_2, %c0_3] : memref<1x2x16x128xf32, #tpu.memory_space<vmem>>, vector<1x2x16x128xf32>
    %4 = vector.shape_cast %3 : vector<1x2x16x128xf32> to vector<2x16x128xf32>
    %cst = arith.constant dense<0.000000e+00> : vector<2x128xf32>
    %5 = vector.multi_reduction <add>, %4, %cst [1] : vector<2x16x128xf32> to vector<2x128xf32>
    %cst_4 = arith.constant 1.600000e+01 : f32
    %6 = vector.broadcast %cst_4 : f32 to vector<2x128xf32>
    %7 = arith.divf %5, %6 : vector<2x128xf32>
    %c0_5 = arith.constant 0 : index
    %c0_6 = arith.constant 0 : index
    %8 = vector.load %arg4[%c0_5, %c0_6] : memref<2x384xf32, #tpu.memory_space<vmem>>, vector<2x384xf32>
    %c0_7 = arith.constant 0 : index
    %c0_8 = arith.constant 0 : index
    %c0_9 = arith.constant 0 : index
    %9 = vector.load %arg2[%c0_7, %c0_8, %c0_9] : memref<1x128x384xf32, #tpu.memory_space<vmem>>, vector<1x128x384xf32>
    %10 = vector.shape_cast %9 : vector<1x128x384xf32> to vector<128x384xf32>
    %cst_10 = arith.constant dense<0.000000e+00> : vector<2x384xf32>
    %11 = tpu.matmul %7, %10, %cst_10 {dimension_numbers = #tpu.dot_dimension_numbers<[1], [0], [0], [1], [0, 0, 1, 1], [], []>} : vector<2x128xf32>, vector<128x384xf32>, vector<2x384xf32> -> vector<2x384xf32>
    %12 = arith.addf %8, %11 : vector<2x384xf32>
    %c0_11 = arith.constant 0 : index
    %c0_12 = arith.constant 0 : index
    %13 = vector.load %arg4[%c0_11, %c0_12] : memref<2x384xf32, #tpu.memory_space<vmem>>, vector<2x384xf32>
    tpu.vector_store %arg4[%c0_11, %c0_12], %12 {strides = array<i32>} : memref<2x384xf32, #tpu.memory_space<vmem>>, vector<2x384xf32>,
    return
  }
  func.func @transform_0(%arg0: i32) -> (i32, i32, i32, i32) {
    %c0_i32 = arith.constant 0 : i32
    %c0_i32_0 = arith.constant 0 : i32
    %c0_i32_1 = arith.constant 0 : i32
    %c0_i32_2 = arith.constant 0 : i32
    return %arg0, %c0_i32, %c0_i32_0, %c0_i32_1 : i32, i32, i32, i32
  }
  func.func @transform_1(%arg0: i32) -> (i32, i32, i32) {
    %c0_i32 = arith.constant 0 : i32
    %c0_i32_0 = arith.constant 0 : i32
    %c0_i32_1 = arith.constant 0 : i32
    return %arg0, %c0_i32, %c0_i32_0 : i32, i32, i32
  }
  func.func @transform_2(%arg0: i32) -> (i32, i32) {
    %c0_i32 = arith.constant 0 : i32
    %c0_i32_0 = arith.constant 0 : i32
    %c0_i32_1 = arith.constant 0 : i32
    return %c0_i32, %c0_i32_0 : i32, i32
  }
  func.func @transform_3(%arg0: i32) -> (i32, i32) {
    %c0_i32 = arith.constant 0 : i32
    %c0_i32_0 = arith.constant 0 : i32
    %c0_i32_1 = arith.constant 0 : i32
    return %c0_i32, %c0_i32_0 : i32, i32
  }
}

</mosaic_0001>

<bundles_post_ra>
// kernel: vit_encoder_forward.8
= control target key start
LH: loop header
LB: loop body
LE: loop exit
PB: predicated region body
PF: predicated region fallthrough
CT: control target
= control target key end

     0   :  { %s546_s12 = smov 0   ;;  %s609_s0 = inlined_call_operand.vmem [shape: f32[3,2,16,256], index: 0, kind: input, shape index: {}]   ;;  %s610_s1 = inlined_call_operand.vmem [shape: f32[3,256,128], index: 1, kind: input, shape index: {}]   ;;  %s611_s2 = inlined_call_operand.vmem [shape: f32[3,1,128], index: 2, kind: input, shape index: {}]   ;;  %s612_s3 = inlined_call_operand.vmem [shape: f32[3,2,16,128], index: 3, kind: output, shape index: {}]  }
   0x1 LB: > { %s417_s13 = sadd.s32 4294967295, %s524_s12   ;;  %p421_p0 = scmp.ge.s32.totalorder %s524_s12, 1  ;;  %s524_s12 = sphi %s546_s12, %s13_s12  }
   0x2   : > { %p155_p1 = scmp.lt.s32.totalorder %s524_s12, 4 }
   0x4   : > { %p156_p2 = pnand %p421_p0, %p155_p1 }
   0x5   : > { %p187_p3 = scmp.lt.s32.totalorder (!%p156_p2), %s417_s13, 2 }
   0x6   : > { %159 = sbr.rel (%p156_p2) target bundleno = 252 (0xfc), region = 32 }
   0xb   : > { %s614_s13 = smov (!%p187_p3, %s417_s13), 2 }
   0xc   : > { %s432_s14 = sshll.u32 %s614_s13, 8  ;;  %s431_s18 = sshll.u32 %s614_s13, 6 }
   0xd   : > { %s560_s17 = scalar_lea.vmem %s610_s1, %s432_s14  ;;  %s191_s21 = scalar_lea.vmem %s609_s0, %s431_s18 }
   0xe   : > { %v244_v0 = vld [vmem:[%s560_s17 + $0xf8] sm:$0xff]  ;;  %v243_v2 = vld [vmem:[%s560_s17 + $0xf0] sm:$0xff]  ;;  %v242_v4 = vld [vmem:[%s560_s17 + $0xe8] sm:$0xff]  ;;  %s199_s24 = scalar_lea.vmem %s611_s2, %s614_s13  ;;  %s433_s25 = sshll.u32 %s614_s13, 5 }
   0xf   : > { %v228_v1 = vld [vmem:[%s560_s17 + $0x78] sm:$0xff]  ;;  %434 = vmatprep.subr.mxu0 %v244_v0  ;;  %478 = vmatprep.subr.mxu1 %v244_v0  ;;  %v227_v3 = vld [vmem:[%s560_s17 + $0x70] sm:$0xff]  ;;  %v226_v5 = vld [vmem:[%s560_s17 + $0x68] sm:$0xff]  ;;  %s204_s28 = scalar_lea.vmem %s612_s3, %s433_s25 }
  0x10   : > { %435 = vmatpush3.msra.mxu0 %v228_v1  ;;  %494 = vmatpush3.msra.mxu1 %v228_v1  ;;  %v241_v6 = vld [vmem:[%s560_s17 + $0xe0] sm:$0xff]  ;;  %v240_v8 = vld [vmem:[%s560_s17 + $0xd8] sm:$0xff]  ;;  %v239_v10 = vld [vmem:[%s560_s17 + $0xd0] sm:$0xff] }
  0x11   : > { %436 = vmatprep.subr.mxu0 %v243_v2  ;;  %479 = vmatprep.subr.mxu1 %v243_v2  ;;  %v225_v7 = vld [vmem:[%s560_s17 + $0x60] sm:$0xff]  ;;  %v224_v9 = vld [vmem:[%s560_s17 + $0x58] sm:$0xff]  ;;  %v223_v11 = vld [vmem:[%s560_s17 + $0x50] sm:$0xff] }
  0x12   : > { %437 = vmatpush3.msra.mxu0 %v227_v3  ;;  %495 = vmatpush3.msra.mxu1 %v227_v3  ;;  %v238_v12 = vld [vmem:[%s560_s17 + $0xc8] sm:$0xff]  ;;  %v237_v14 = vld [vmem:[%s560_s17 + $0xc0] sm:$0xff]  ;;  %v236_v16 = vld [vmem:[%s560_s17 + $0xb8] sm:$0xff] }
  0x13   : > { %438 = vmatprep.subr.mxu0 %v242_v4  ;;  %480 = vmatprep.subr.mxu1 %v242_v4  ;;  %v222_v13 = vld [vmem:[%s560_s17 + $0x48] sm:$0xff]  ;;  %v221_v15 = vld [vmem:[%s560_s17 + $0x40] sm:$0xff]  ;;  %v220_v17 = vld [vmem:[%s560_s17 + $0x38] sm:$0xff] }
  0x14   : > { %439 = vmatpush3.msra.mxu0 %v226_v5  ;;  %496 = vmatpush3.msra.mxu1 %v226_v5  ;;  %v235_v18 = vld [vmem:[%s560_s17 + $0xb0] sm:$0xff]  ;;  %v234_v20 = vld [vmem:[%s560_s17 + $0xa8] sm:$0xff]  ;;  %v233_v22 = vld [vmem:[%s560_s17 + $0xa0] sm:$0xff] }
  0x15   : > { %440 = vmatprep.subr.mxu0 %v241_v6  ;;  %481 = vmatprep.subr.mxu1 %v241_v6  ;;  %v219_v19 = vld [vmem:[%s560_s17 + $0x30] sm:$0xff]  ;;  %v218_v21 = vld [vmem:[%s560_s17 + $0x28] sm:$0xff]  ;;  %v217_v23 = vld [vmem:[%s560_s17 + $0x20] sm:$0xff] }
  0x16   : > { %441 = vmatpush3.msra.mxu0 %v225_v7  ;;  %497 = vmatpush3.msra.mxu1 %v225_v7  ;;  %v232_v24 = vld [vmem:[%s560_s17 + $0x98] sm:$0xff]  ;;  %v231_v26 = vld [vmem:[%s560_s17 + $0x90] sm:$0xff]  ;;  %v230_v28 = vld [vmem:[%s560_s17 + $0x88] sm:$0xff] }
  0x17   : > { %442 = vmatprep.subr.mxu0 %v240_v8  ;;  %482 = vmatprep.subr.mxu1 %v240_v8  ;;  %v216_v25 = vld [vmem:[%s560_s17 + $0x18] sm:$0xff]  ;;  %v215_v27 = vld [vmem:[%s560_s17 + $0x10] sm:$0xff]  ;;  %v214_v29 = vld [vmem:[%s560_s17 + $0x8] sm:$0xff] }
  0x18   : > { %443 = vmatpush3.msra.mxu0 %v224_v9  ;;  %498 = vmatpush3.msra.mxu1 %v224_v9  ;;  %v229_v30 = vld [vmem:[%s560_s17 + $0x80] sm:$0xff]  ;;  %v206_v32 = vld [vmem:[%s191_s21 + $0x8] sm:$0xff]  ;;  %v208_v36 = vld [vmem:[%s191_s21 + $0x18] sm:$0xff] }
  0x19   : > { %444 = vmatprep.subr.mxu0 %v239_v10  ;;  %483 = vmatprep.subr.mxu1 %v239_v10  ;;  %v213_v31 = vld [vmem:[%s560_s17] sm:$0xff]  ;;  %v210_v33 = vld [vmem:[%s191_s21 + $0x28] sm:$0xff]  ;;  %v212_v37 = vld [vmem:[%s191_s21 + $0x38] sm:$0xff] }
  0x1a   : > { %445 = vmatpush3.msra.mxu0 %v223_v11  ;;  %499 = vmatpush3.msra.mxu1 %v223_v11  ;;  %v205_v34 = vld [vmem:[%s191_s21] sm:$0xff]  ;;  %v207_v38 = vld [vmem:[%s191_s21 + $0x10] sm:$0xff] }
  0x1b   : > { %446 = vmatprep.subr.mxu0 %v238_v12  ;;  %484 = vmatprep.subr.mxu1 %v238_v12  ;;  %v209_v35 = vld [vmem:[%s191_s21 + $0x20] sm:$0xff]  ;;  %v211_v39 = vld [vmem:[%s191_s21 + $0x30] sm:$0xff] }
  0x1c   : > { %447 = vmatpush3.msra.mxu0 %v222_v13  ;;  %500 = vmatpush3.msra.mxu1 %v222_v13  ;;  %v428_v42 = vld [vmem:[%s199_s24] ss:$0 sm:$0xff] }
  0x1d   : > { %448 = vmatprep.subr.mxu0 %v237_v14  ;;  %485 = vmatprep.subr.mxu1 %v237_v14 }
  0x1e   : > { %449 = vmatpush3.msra.mxu0 %v221_v15  ;;  %501 = vmatpush3.msra.mxu1 %v221_v15 }
  0x1f   : > { %450 = vmatprep.subr.mxu0 %v236_v16  ;;  %486 = vmatprep.subr.mxu1 %v236_v16 }
  0x20   : > { %451 = vmatpush3.msra.mxu0 %v220_v17  ;;  %502 = vmatpush3.msra.mxu1 %v220_v17 }
  0x21   : > { %452 = vmatprep.subr.mxu0 %v235_v18  ;;  %487 = vmatprep.subr.mxu1 %v235_v18 }
  0x22   : > { %453 = vmatpush3.msra.mxu0 %v219_v19  ;;  %503 = vmatpush3.msra.mxu1 %v219_v19 }
  0x23   : > { %454 = vmatprep.subr.mxu0 %v234_v20  ;;  %488 = vmatprep.subr.mxu1 %v234_v20 }
  0x24   : > { %455 = vmatpush3.msra.mxu0 %v218_v21  ;;  %504 = vmatpush3.msra.mxu1 %v218_v21 }
  0x25   : > { %456 = vmatprep.subr.mxu0 %v233_v22  ;;  %489 = vmatprep.subr.mxu1 %v233_v22 }
  0x26   : > { %457 = vmatpush3.msra.mxu0 %v217_v23  ;;  %505 = vmatpush3.msra.mxu1 %v217_v23 }
  0x27   : > { %458 = vmatprep.subr.mxu0 %v232_v24  ;;  %490 = vmatprep.subr.mxu1 %v232_v24 }
  0x28   : > { %459 = vmatpush3.msra.mxu0 %v216_v25  ;;  %506 = vmatpush3.msra.mxu1 %v216_v25 }
  0x29   : > { %460 = vmatprep.subr.mxu0 %v231_v26  ;;  %491 = vmatprep.subr.mxu1 %v231_v26 }
  0x2a   : > { %461 = vmatpush3.msra.mxu0 %v215_v27  ;;  %507 = vmatpush3.msra.mxu1 %v215_v27 }
  0x2b   : > { %462 = vmatprep.subr.mxu0 %v230_v28  ;;  %492 = vmatprep.subr.mxu1 %v230_v28 }
  0x2c   : > { %463 = vmatpush3.msra.mxu0 %v214_v29  ;;  %508 = vmatpush3.msra.mxu1 %v214_v29 }
  0x2d   : > { %464 = vmatprep.subr.mxu0 %v229_v30  ;;  %493 = vmatprep.subr.mxu1 %v229_v30 }
  0x2e   : > { %465 = vmatpush3.msra.mxu0 %v213_v31  ;;  %509 = vmatpush3.msra.mxu1 %v213_v31 }
  0x2f   : > { %316 = vmatprep.mubr.f32.mxu0 %v206_v32  ;;  %326 = vmatprep.mubr.f32.mxu1 %v210_v33 }
  0x30   : > { %317 = vmatmul.mubr.f32.vlgmr.msra.gmra.mxu0 %v205_v34  ;;  %327 = vmatmul.mubr.f32.vlgmr.msra.gmra.mxu1 %v209_v35 }
  0x31   : > { %321 = vmatprep.mubr.f32.mxu0 %v208_v36  ;;  %331 = vmatprep.mubr.f32.mxu1 %v212_v37 }
  0x34   : > { %322 = vmatmul.mubr.f32.gmra.mxu0 %v207_v38  ;;  %332 = vmatmul.mubr.f32.gmra.mxu1 %v211_v39 }
  0xf0   : > { %v466_v40 = vpop.f32.mrf.mxu0  ;;  %v472_v41 = vpop.f32.mrf.mxu1 }
  0xf2   : > { %v467_v43 = vpop.f32.mrf.mxu0  ;;  %v473_v44 = vpop.f32.mrf.mxu1 }
  0xf3   : > { %v468_v45 = vadd.f32 %v467_v43, %v466_v40  ;;  %v474_v46 = vadd.f32 %v473_v44, %v472_v41 }
  0xf4   : > { %v469_v47 = vpop.f32.mrf.mxu0  ;;  %v475_v48 = vpop.f32.mrf.mxu1 }
  0xf5   : > { %v319_v49 = vadd.f32 %v468_v45, %v428_v42  ;;  %v329_v50 = vadd.f32 %v474_v46, %v428_v42 }
  0xf6   : > { %v470_v51 = vpop.f32.mrf.mxu0  ;;  %v476_v52 = vpop.f32.mrf.mxu1 }
  0xf7   : > { %337 = vst [vmem:[%s204_s28] sm:$0xff] %v319_v49  ;;  %339 = vst [vmem:[%s204_s28 + $0x10] sm:$0xff] %v329_v50  ;;  %v471_v53 = vadd.f32 %v470_v51, %v469_v47  ;;  %v477_v54 = vadd.f32 %v476_v52, %v475_v48 }
  0xf9   : > { %v324_v55 = vadd.f32 %v471_v53, %v428_v42  ;;  %v334_v56 = vadd.f32 %v477_v54, %v428_v42 }
  0xfb   : > { %338 = vst [vmem:[%s204_s28 + $0x8] sm:$0xff] %v324_v55  ;;  %340 = vst [vmem:[%s204_s28 + $0x18] sm:$0xff] %v334_v56 }
  0xfc PF: > { %s13_s12 = sadd.s32 1, %s524_s12  }
  0xfd   : > { %p10_p4 = scmp.ge.s32.totalorder %s13_s12, 5  }
  0xff   :  { %12 = sbr.rel (!%p10_p4) target bundleno = 1 (0x1), region = 68 }

// kernel: vit_encoder_forward.15
= control target key start
LH: loop header
LB: loop body
LE: loop exit
PB: predicated region body
PF: predicated region fallthrough
CT: control target
= control target key end

     0   :  { %8 = vsyncpa [#allocation3], 0  ;;  %s655_s12 = smov 0   ;;  %s766_s0 = inlined_call_operand.vmem [shape: f32[3,2,16,128], index: 0, kind: input, shape index: {}]   ;;  %s767_s1 = inlined_call_operand.vmem [shape: f32[3,128,384], index: 1, kind: input, shape index: {}]   ;;  %s768_s2 = inlined_call_operand.vmem [shape: f32[1,384], index: 2, kind: input, shape index: {}]   ;;  %s769_s3 = inlined_call_operand.hbm [shape: f32[2,384], index: 3, kind: output, shape index: {}]  }
   0x1 LB: > { %s661_s13 = sadd.s32 4294967295, %s628_s12   ;;  %p512_p0 = scmp.ge.s32.totalorder %s628_s12, 1  ;;  %s628_s12 = sphi %s655_s12, %s14_s12  }
   0x2   : > { %p143_p1 = scmp.lt.s32.totalorder %s628_s12, 4 }
   0x4   : > { %p144_p2 = pnand %p512_p0, %p143_p1 }
   0x5   : > { %p167_p3 = scmp.lt.s32.totalorder (!%p144_p2), %s661_s13, 2  ;;  %p516_p4 = scmp.ne.s32.totalorder (!%p144_p2), %s661_s13, 0 }
   0x6   : > { %147 = sbr.rel (%p144_p2) target bundleno = 274 (0x112), region = 32 }
   0xb   : > { %s168_s14 = scalar_select %p167_p3, %s661_s13, 2 }
   0xc   : > { %180 = sbr.rel (%p516_p4) target bundleno = 32 (0x20), region = 36 }
   0xd   : > { %s521_s15 = sshll.u32 %s168_s14, 5  ;;  %s574_s16 = smul.u32 384, %s168_s14 }
   0xe   : > { %s670_s19 = scalar_lea.vmem %s766_s0, %s521_s15 }
   0xf   : > { %s675_s22 = scalar_lea.vmem %s767_s1, %s574_s16 }
  0x11   : > { %v183_v0 = vlaneseq  ;;  %v630_v1 = vmov 1983009808   ;;  %v181_v4 = vld [vmem:[%s768_s2] sm:$0x7] }
  0x12   : > { %v197_v2 = vunpack.c.l.s4 %v630_v1 }
  0x13   : > { %v184_v3 = vshrl.u32 %v183_v0, 7 }
  0x14   : > { %v198_v5 = vunpack.c.0.s8 %v197_v2 }
  0x15   : > { %v185_v6 = vsub.s32 0, %v184_v3  ;;  %v189_v7 = vsub.s32 1, %v184_v3  ;;  %v193_v8 = vsub.s32 2, %v184_v3 }
  0x16   : > { %v201_v9 = vsub.s32 %v198_v5, %v184_v3 }
  0x17   : > { %v186_v10 = vrot.slane %v181_v4, %v185_v6  ;;  %v190_v11 = vrot.slane %v181_v4, %v189_v7  ;;  %v194_v12 = vrot.slane %v181_v4, %v193_v8 }
  0x19   : > { %v195_v13 = vcombine.low %v186_v10, %v190_v11  ;;  %v209_v14 = vrot.slane %v194_v12, %v201_v9 }
  0x1b   : > { %v202_v15 = vrot.slane %v195_v13, %v201_v9 }
  0x1d   : > { %v210_v16 = vcombine.low %v202_v15, %v209_v14 }
  0x1f   : > { %212 = vst [vmem:[#allocation2] sm:$0x3f] %v210_v16 }
  0x20 PF: > { %v281_v17 = vld [vmem:[%s675_s22 + $0x170] sm:$0xff]  ;;  %v280_v18 = vld [vmem:[%s675_s22 + $0x168] sm:$0xff]  ;;  %v278_v19 = vld [vmem:[%s675_s22 + $0x158] sm:$0xff]  ;;  %v631_v20 = vmov 0.0   ;;  %vm285_vm0 = vcmask 1041409   ;;  %vm632_vm1 = vmmov 0  }
  0x21   : > { %288 = vmatprep.subr.mxu0 %v281_v17  ;;  %539 = vmatprep.subr.mxu1 %v631_v20  ;;  %v277_v21 = vld [vmem:[%s675_s22 + $0x150] sm:$0xff]  ;;  %v282_v22 = vld [vmem:[%s675_s22 + $0x178] sm:$0xff]  ;;  %v275_v23 = vld [vmem:[%s675_s22 + $0x140] sm:$0xff]  ;;  %s634_s25 = smov [#allocation2]   ;;  %p579_p5 = scmp.eq.s32.totalorder %s661_s13, 2 }
  0x22   : > { %289 = vmatpush1.msra.mxu0 %v280_v18  ;;  %540 = vmatpush3.msra.mxu1 %v282_v22  ;;  %v279_v24 = vld [vmem:[%s675_s22 + $0x160] sm:$0xff]  ;;  %v274_v25 = vld [vmem:[%s675_s22 + $0x138] sm:$0xff]  ;;  %v276_v26 = vld [vmem:[%s675_s22 + $0x148] sm:$0xff]  ;;  %s458_s26 = sshll.u32 %s634_s25, 4  ;;  %s459_s26 = int_to_ptr.vmem [resolvable:$true] %s458_s26 }
  0x23   : > { %290 = vmatprep.subr.mxu0 %v278_v19  ;;  %541 = vmatprep.subr.mxu1 %v631_v20  ;;  %v272_v27 = vld [vmem:[%s675_s22 + $0x128] sm:$0xff]  ;;  %v271_v28 = vld [vmem:[%s675_s22 + $0x120] sm:$0xff]  ;;  %v273_v29 = vld [vmem:[%s675_s22 + $0x130] sm:$0xff]  ;;  %s594_s27 = scalar_lea.vmem %s459_s26, 96  ;;  %p601_p9 = scmp.lt.s32.totalorder %s459_s26, %s459_s26 }
  0x24   : > { %291 = vmatpush1.msra.mxu0 %v277_v21  ;;  %542 = vmatpush3.msra.mxu1 %v279_v24  ;;  %v269_v30 = vld [vmem:[%s675_s22 + $0x110] sm:$0xff]  ;;  %v268_v31 = vld [vmem:[%s675_s22 + $0x108] sm:$0xff]  ;;  %v270_v32 = vld [vmem:[%s675_s22 + $0x118] sm:$0xff]  ;;  %v633_v24 = vmov 1983009808   ;;  %p595_p6 = scmp.ne.s32.totalorder %s459_s26, %s594_s27  ;;  %p602_p10 = scmp.lt.s32.totalorder %s594_s27, %s594_s27 }
  0x25   : > { %292 = vmatprep.subr.mxu0 %v275_v23  ;;  %543 = vmatprep.subr.mxu1 %v631_v20  ;;  %v266_v33 = vld [vmem:[%s675_s22 + $0xf8] sm:$0xff]  ;;  %v265_v34 = vld [vmem:[%s675_s22 + $0xf0] sm:$0xff]  ;;  %v267_v35 = vld [vmem:[%s675_s22 + $0x100] sm:$0xff] }
  0x26   : > { %293 = vmatpush1.msra.mxu0 %v274_v25  ;;  %544 = vmatpush3.msra.mxu1 %v276_v26  ;;  %v263_v36 = vld [vmem:[%s675_s22 + $0xe0] sm:$0xff]  ;;  %v262_v37 = vld [vmem:[%s675_s22 + $0xd8] sm:$0xff]  ;;  %v264_v38 = vld [vmem:[%s675_s22 + $0xe8] sm:$0xff]  ;;  %v434_v25 = vunpack.c.l.s4 %v633_v24  ;;  %v436_v26 = vlaneseq  ;;  %p596_p7 = pnand %p595_p6, %p579_p5  ;;  %p603_p11 = por %p602_p10, %p601_p9 }
  0x27   : > { %294 = vmatprep.subr.mxu0 %v272_v27  ;;  %545 = vmatprep.subr.mxu1 %v631_v20  ;;  %v260_v39 = vld [vmem:[%s675_s22 + $0xc8] sm:$0xff]  ;;  %v259_v40 = vld [vmem:[%s675_s22 + $0xc0] sm:$0xff]  ;;  %v261_v41 = vld [vmem:[%s675_s22 + $0xd0] sm:$0xff] }
  0x28   : > { %295 = vmatpush1.msra.mxu0 %v271_v28  ;;  %546 = vmatpush3.msra.mxu1 %v273_v29  ;;  %v257_v42 = vld [vmem:[%s675_s22 + $0xb0] sm:$0xff]  ;;  %v256_v43 = vld [vmem:[%s675_s22 + $0xa8] sm:$0xff]  ;;  %v254_v44 = vld [vmem:[%s675_s22 + $0x98] sm:$0xff]  ;;  %v435_v27 = vunpack.c.0.s8 %v434_v25  ;;  %v437_v28 = vshrl.u32 %v436_v26, 7  ;;  %p597_p8 = pneg %p596_p7 }
  0x29   : > { %296 = vmatprep.subr.mxu0 %v269_v30  ;;  %547 = vmatprep.subr.mxu1 %v631_v20  ;;  %v258_v45 = vld [vmem:[%s675_s22 + $0xb8] sm:$0xff]  ;;  %v213_v46 = vld [vmem:[%s670_s19] sm:$0xff]  ;;  %v214_v47 = vld [vmem:[%s670_s19 + $0x8] sm:$0xff] }
  0x2a   : > { %297 = vmatpush1.msra.mxu0 %v268_v31  ;;  %548 = vmatpush3.msra.mxu1 %v270_v32  ;;  %v215_v48 = vld [vmem:[%s670_s19 + $0x10] sm:$0xff]  ;;  %v216_v49 = vld [vmem:[%s670_s19 + $0x18] sm:$0xff]  ;;  %v255_v51 = vld [vmem:[%s675_s22 + $0xa0] sm:$0xff]  ;;  %v217_v52 = vadd.f32 %v214_v47, %v213_v46  ;;  %v438_v29 = vsub.s32 %v435_v27, %v437_v28  ;;  %p604_p12 = pnand %p603_p11, %p597_p8 }
  0x2b   : > { %298 = vmatprep.subr.mxu0 %v266_v33  ;;  %549 = vmatprep.subr.mxu1 %v631_v20  ;;  %v253_v50 = vld [vmem:[%s675_s22 + $0x90] sm:$0xff]  ;;  %v224_v53 = vadd.f32 %v216_v49, %v215_v48  ;;  %v251_v54 = vld [vmem:[%s675_s22 + $0x80] sm:$0xff]  ;;  %v250_v55 = vld [vmem:[%s675_s22 + $0x78] sm:$0xff] }
  0x2c   : > { %299 = vmatpush1.msra.mxu0 %v265_v34  ;;  %550 = vmatpush3.msra.mxu1 %v267_v35  ;;  %v252_v56 = vld [vmem:[%s675_s22 + $0x88] sm:$0xff]  ;;  %v218_v57 = vrot.slane %v217_v52, 4  ;;  %v247_v60 = vld [vmem:[%s675_s22 + $0x60] sm:$0xff]  ;;  %v249_v61 = vld [vmem:[%s675_s22 + $0x70] sm:$0xff] }
  0x2d   : > { %300 = vmatprep.subr.mxu0 %v263_v36  ;;  %551 = vmatprep.subr.mxu1 %v631_v20  ;;  %v225_v58 = vrot.slane %v224_v53, 4  ;;  %v248_v59 = vld [vmem:[%s675_s22 + $0x68] sm:$0xff]  ;;  %v245_v0 = vld [vmem:[%s675_s22 + $0x50] sm:$0xff]  ;;  %v246_v2 = vld [vmem:[%s675_s22 + $0x58] sm:$0xff] }
  0x2e   : > { %301 = vmatpush1.msra.mxu0 %v262_v37  ;;  %552 = vmatpush3.msra.mxu1 %v264_v38  ;;  %v219_v62 = vadd.f32 %v218_v57, %v217_v52  ;;  %v244_v1 = vld [vmem:[%s675_s22 + $0x48] sm:$0xff]  ;;  %v242_v5 = vld [vmem:[%s675_s22 + $0x38] sm:$0xff]  ;;  %v241_v6 = vld [vmem:[%s675_s22 + $0x30] sm:$0xff] }
  0x2f   : > { %302 = vmatprep.subr.mxu0 %v260_v39  ;;  %553 = vmatprep.subr.mxu1 %v631_v20  ;;  %v226_v63 = vadd.f32 %v225_v58, %v224_v53  ;;  %v243_v7 = vld [vmem:[%s675_s22 + $0x40] sm:$0xff]  ;;  %v238_v11 = vld [vmem:[%s675_s22 + $0x18] sm:$0xff]  ;;  %v236_v14 = vld [vmem:[%s675_s22 + $0x8] sm:$0xff] }
  0x30   : > { %303 = vmatpush1.msra.mxu0 %v259_v40  ;;  %554 = vmatpush3.msra.mxu1 %v261_v41  ;;  %v220_v3 = vrot.slane %v219_v62, 2  ;;  %v239_v10 = vld [vmem:[%s675_s22 + $0x20] sm:$0xff]  ;;  %v240_v15 = vld [vmem:[%s675_s22 + $0x28] sm:$0xff]  ;;  %v237_v19 = vld [vmem:[%s675_s22 + $0x10] sm:$0xff] }
  0x31   : > { %304 = vmatprep.subr.mxu0 %v257_v42  ;;  %555 = vmatprep.subr.mxu1 %v631_v20  ;;  %v227_v4 = vrot.slane %v226_v63, 2  ;;  %v235_v16 = vld [vmem:[%s675_s22] sm:$0xff] }
  0x32   : > { %305 = vmatpush1.msra.mxu0 %v256_v43  ;;  %556 = vmatpush3.msra.mxu1 %v258_v45  ;;  %v221_v8 = vadd.f32 %v220_v3, %v219_v62  ;;  %v234_v37 = vld [vmem:[#allocation2] sm:$0x3f] }
  0x33   : > { %306 = vmatprep.subr.mxu0 %v254_v44  ;;  %557 = vmatprep.subr.mxu1 %v631_v20  ;;  %v228_v9 = vadd.f32 %v227_v4, %v226_v63 }
  0x34   : > { %307 = vmatpush1.msra.mxu0 %v253_v50  ;;  %558 = vmatpush3.msra.mxu1 %v255_v51  ;;  %v222_v12 = vrot.slane %v221_v8, 1 }
  0x35   : > { %308 = vmatprep.subr.mxu0 %v251_v54  ;;  %559 = vmatprep.subr.mxu1 %v631_v20  ;;  %v229_v13 = vrot.slane %v228_v9, 1 }
  0x36   : > { %309 = vmatpush1.msra.mxu0 %v250_v55  ;;  %560 = vmatpush3.msra.mxu1 %v252_v56  ;;  %v223_v17 = vadd.f32 %v222_v12, %v221_v8 }
  0x37   : > { %310 = vmatprep.subr.mxu0 %v248_v59  ;;  %561 = vmatprep.subr.mxu1 %v631_v20  ;;  %v230_v18 = vadd.f32 %v229_v13, %v228_v9 }
  0x38   : > { %311 = vmatpush1.msra.mxu0 %v247_v60  ;;  %562 = vmatpush3.msra.mxu1 %v249_v61  ;;  %v232_v21 = vmul.f32 0.0625, %v223_v17 }
  0x39   : > { %312 = vmatprep.subr.mxu0 %v245_v0  ;;  %563 = vmatprep.subr.mxu1 %v631_v20  ;;  %v233_v22 = vmul.f32 0.0625, %v230_v18 }
  0x3a   : > { %313 = vmatpush1.msra.mxu0 %v244_v1  ;;  %564 = vmatpush3.msra.mxu1 %v246_v2 }
  0x3b   : > { %314 = vmatprep.subr.mxu0 %v242_v5  ;;  %565 = vmatprep.subr.mxu1 %v631_v20  ;;  %v286_v23 = vsel %vm285_vm0, %v233_v22, %v232_v21 }
  0x3c   : > { %315 = vmatpush1.msra.mxu0 %v241_v6  ;;  %566 = vmatpush3.msra.mxu1 %v243_v7 }
  0x3d   : > { %316 = vmatprep.subr.mxu0 %v239_v10  ;;  %567 = vmatprep.subr.mxu1 %v631_v20 }
  0x3e   : > { %317 = vmatpush1.msra.mxu0 %v238_v11  ;;  %352 = vmatprep.mubr.f32.mxu0 %v631_v20 }
  0x3f   : > { %318 = vmatprep.subr.mxu0 %v236_v14  ;;  %568 = vmatpush3.msra.mxu1 %v240_v15 }
  0x40   : > { %319 = vmatpush1.msra.mxu0 %v235_v16  ;;  %569 = vmatprep.subr.mxu1 %v631_v20 }
  0x41   : > { %570 = vmatpush3.msra.mxu1 %v237_v19  ;;  %571 = vmatprep.mubr.msk.f32.mxu1 %vm632_vm1, %v631_v20 }
  0x42   : > { %353 = vmatmul.mubr.f32.vlgmr.msra.gmra.mxu0 %v286_v23  ;;  %572 = vmatmul.mubr.f32.vlgmr.msra.gmra.mxu1 %v286_v23 }
 0x102   : > { %v354_v30 = vpop.f32.mrf.mxu0  ;;  %v425_v31 = vpop.f32.mrf.mxu1 }
 0x103   : > { %v446_v35 = vrot.slane %v425_v31, %v438_v29 }
 0x104   : > { %v356_v32 = vpop.f32.mrf.mxu0  ;;  %v573_v33 = vpop.f32.mrf.mxu1 }
 0x105   : > { %v432_v34 = vcombine.low %v354_v30, %v356_v32 }
 0x107   : > { %v439_v36 = vrot.slane %v432_v34, %v438_v29 }
 0x109   : > { %v447_v20 = vcombine.low %v439_v36, %v446_v35 }
 0x10b   : > { %v449_v38 = vadd.f32 %v447_v20, %v234_v37 }
 0x10d   : > { %450 = vst [vmem:[#allocation2] sm:$0x3f] %v449_v38 }
 0x10e   : > { %607 = shalt.err (!%p604_p12)
}
 0x10f   : > { %576 = dma.vmem_to_hbm [thread:$0]  (%p579_p5), %s459_s26, 96, %s769_s3, [#allocation3]  }
 0x110   : > { %623 = dma.done.wait (%p579_p5), [#allocation3], 96  }
 0x111   : > { %625 = vsyncadd (%p579_p5), [#allocation3], 4294967200 }
 0x112 PF: > { %s14_s12 = sadd.s32 1, %s628_s12  }
 0x113   : > { %p11_p13 = scmp.ge.s32.totalorder %s14_s12, 5  }
 0x115   :  { %13 = sbr.rel (!%p11_p13) target bundleno = 1 (0x1), region = 66 }
 0x11a   :  { %471 = vsyncpa [#allocation3], 1 }
 0x11b   :  { %473 = vsyncpa [#allocation3 + $0x1], 1 }

// kernel: vit_encoder_forward.13
= control target key start
LH: loop header
LB: loop body
LE: loop exit
PB: predicated region body
PF: predicated region fallthrough
CT: control target
= control target key end

     0   :  { %s5496_s27 = smov 0   ;;  %s7571_s0 = inlined_call_operand.vmem [shape: f32[2,16,128], index: 0, kind: input, shape index: {}]   ;;  %s7572_s1 = inlined_call_operand.vmem [shape: f32[16,16], index: 1, kind: input, shape index: {}]   ;;  %s7573_s2 = inlined_call_operand.vmem [shape: f32[1,128], index: 2, kind: input, shape index: {}]   ;;  %s7574_s3 = inlined_call_operand.vmem [shape: f32[1,128], index: 3, kind: input, shape index: {}]   ;;  %s7575_s4 = inlined_call_operand.vmem [shape: f32[128,128], index: 4, kind: input, shape index: {}]   ;;  %s7576_s5 = inlined_call_operand.vmem [shape: f32[128,128], index: 5, kind: input, shape index: {}]   ;;  %s7577_s6 = inlined_call_operand.vmem [shape: f32[128,128], index: 6, kind: input, shape index: {}]   ;;  %s7578_s7 = inlined_call_operand.vmem [shape: f32[1,128], index: 7, kind: input, shape index: {}]   ;;  %s7579_s8 = inlined_call_operand.vmem [shape: f32[1,128], index: 8, kind: input, shape index: {}]   ;;  %s7580_s9 = inlined_call_operand.vmem [shape: f32[1,128], index: 9, kind: input, shape index: {}]   ;;  %s7581_s10 = inlined_call_operand.vmem [shape: f32[128,128], index: 10, kind: input, shape index: {}]   ;;  %s7582_s11 = inlined_call_operand.vmem [shape: f32[1,128], index: 11, kind: input, shape index: {}]   ;;  %s7583_s12 = inlined_call_operand.vmem [shape: f32[1,128], index: 12, kind: input, shape index: {}]   ;;  %s7584_s13 = inlined_call_operand.vmem [shape: f32[1,128], index: 13, kind: input, shape index: {}]   ;;  %s7585_s14 = inlined_call_operand.vmem [shape: f32[128,1024], index: 14, kind: input, shape index: {}]   ;;  %s7586_s15 = inlined_call_operand.vmem [shape: f32[1,1024], index: 15, kind: input, shape index: {}]   ;;  %s7587_s16 = inlined_call_operand.vmem [shape: f32[1024,128], index: 16, kind: input, shape index: {}]   ;;  %s7588_s17 = inlined_call_operand.vmem [shape: f32[1,128], index: 17, kind: input, shape index: {}]   ;;  %s7589_s18 = inlined_call_operand.vmem [shape: f32[2,16,128], index: 18, kind: output, shape index: {}]  }
   0x1   :  { %7611 = sst [smem:[#allocation11_spill]] %s7571_s0 }
   0x2   :  { %7612 = sst [smem:[#allocation12_spill]] %s7572_s1 }
   0x3   :  { %7613 = sst [smem:[#allocation13_spill]] %s7573_s2 }
   0x4 LB: > { %s4530_s28 = sadd.s32 4294967295, %s5383_s27   ;;  %p4534_p0 = scmp.ge.s32.totalorder %s5383_s27, 1  ;;  %s5383_s27 = sphi %s5496_s27, %s28_s27  }
   0x5   : > { %p512_p1 = scmp.lt.s32.totalorder %s5383_s27, 3 }
   0x7   : > { %p513_p2 = pnand %p4534_p0, %p512_p1 }
   0x9   : > { %516 = sbr.rel (%p513_p2) target bundleno = 4774 (0x12a6), region = 92 }
   0xe   : > { %p566_p3 = scmp.lt.s32.totalorder %s4530_s28, 1  ;;  %s7614_s0 = sld [smem:[#allocation12_spill]]  ;;  %v4540_v36 = vld [vmem:[%s7574_s3] ss:$0 sm:$0xff]  ;;  %vm969_vm0 = vcmask 64512   ;;  %vm972_vm1 = vcmask 130048  }
   0xf   : > { %s7592_s19 = smov 16   ;;  %s7615_s23 = sld [smem:[#allocation11_spill]]  ;;  %vm975_vm2 = vcmask 195584   ;;  %vm978_vm3 = vcmask 261120   ;;  %vm981_vm4 = vcmask 326656   ;;  %vm984_vm5 = vcmask 392192  }
  0x10   : > { %s7643_s28 = smov (!%p566_p3, %s4530_s28), 1  ;;  %s7594_s25 = smov 32   ;;  %vm987_vm6 = vcmask 457728   ;;  %vm990_vm7 = vcmask 523264   ;;  %vm993_vm8 = vcmask 588800   ;;  %vm996_vm9 = vcmask 654336  }
  0x11   : > { %s7591_s21 = sshll.u32 %s7643_s28, 4  ;;  %s7596_s26 = smov 48   ;;  %vm999_vm10 = vcmask 719872   ;;  %vm1002_vm11 = vcmask 785408   ;;  %vm1005_vm12 = vcmask 850944   ;;  %vm1008_vm13 = vcmask 916480  }
  0x12   : > { %s7598_s29 = smov 64   ;;  %s7600_s30 = smov 80   ;;  %vm1011_vm14 = vcmask 982016  }
  0x13   : > { %s5390_s1 = smov 96   ;;  %s5391_s20 = smov 112  }
  0x14   : > { %v5507_v0 = vld [vmem:[%s7614_s0 + $0x8] sm:$0xff]  ;;  %v5516_v1 = vld [vmem:[%s7614_s0] sm:$0xff]  ;;  %s5392_s22 = smov 8   ;;  %s5393_s2 = smov 24  }
  0x15   : > { %681 = vrot.lane.b32.xlu1 %v5507_v0, %s7592_s19  ;;  %s5524_s24 = scalar_lea.vmem %s7615_s23, %s7591_s21  ;;  %s5394_s23 = smov 40  }
  0x16   : > { %v576_v2 = vld [vmem:[%s5524_s24] sm:$0xff]  ;;  %v577_v3 = vld [vmem:[%s5524_s24 + $0x8] sm:$0xff]  ;;  %s5395_s21 = smov 56  }
  0x17   : > { %580 = vadd.xlane.f32.xlu0 %v576_v2 }
  0x19   : > { %715 = vrot.lane.b32.xlu1 %v5516_v1, %s7594_s25 }
  0x1b   : > { %582 = vadd.xlane.f32.xlu0 %v577_v3 }
  0x1d   : > { %717 = vrot.lane.b32.xlu1 %v5507_v0, %s7594_s25  ;;  %s5397_s25 = smov 88  }
  0x21   : > { %753 = vrot.lane.b32.xlu1 %v5507_v0, %s7596_s26 }
  0x31   : > { %679 = vrot.lane.b32.xlu0 %v5516_v1, %s7592_s19  ;;  %s5396_s19 = smov 72  }
  0x35   : > { %751 = vrot.lane.b32.xlu0 %v5516_v1, %s7596_s26 }
  0x39   : > { %787 = vrot.lane.b32.xlu0 %v5516_v1, %s7598_s29 }
  0x3d   : > { %823 = vrot.lane.b32.xlu0 %v5516_v1, %s7600_s30 }
  0x41   : > { %859 = vrot.lane.b32.xlu0 %v5516_v1, %s5390_s1 }
  0x45   : > { %887 = vrot.lane.b32.xlu0 %v5516_v1, %s5391_s20 }
  0x49   : > { %631 = vrot.lane.b32.xlu0 %v5516_v1, %s5392_s22 }
  0x4d   : > { %661 = vrot.lane.b32.xlu0 %v5516_v1, %s5393_s2 }
  0x51   : > { %663 = vrot.lane.b32.xlu0 %v5507_v0, %s5393_s2  ;;  %s5398_s2 = smov 104  }
  0x55   : > { %697 = vrot.lane.b32.xlu0 %v5516_v1, %s5394_s23 }
  0x59   : > { %699 = vrot.lane.b32.xlu0 %v5507_v0, %s5394_s23  ;;  %s7616_s23 = sld [smem:[#allocation13_spill]] }
  0x5d   : > { %733 = vrot.lane.b32.xlu0 %v5516_v1, %s5395_s21 }
  0x5f   : > { %v4539_v34 = vld [vmem:[%s7616_s23] ss:$0 sm:$0xff]  ;;  %s7620_s23 = smov 32  }
  0x61   : > { %735 = vrot.lane.b32.xlu0 %v5507_v0, %s5395_s21 }
  0x65   : > { %769 = vrot.lane.b32.xlu0 %v5516_v1, %s5396_s19 }
  0x69   : > { %771 = vrot.lane.b32.xlu0 %v5507_v0, %s5396_s19  ;;  %s5399_s19 = smov 120  }
  0x6d   : > { %805 = vrot.lane.b32.xlu0 %v5516_v1, %s5397_s25 }
  0x71   : > { %807 = vrot.lane.b32.xlu0 %v5507_v0, %s5397_s25  ;;  %s7619_s25 = smov 48  }
  0x75   : > { %841 = vrot.lane.b32.xlu0 %v5516_v1, %s5398_s2 }
  0x79   : > { %843 = vrot.lane.b32.xlu0 %v5507_v0, %s5398_s2  ;;  %s7621_s2 = smov 16  }
  0x87   : > { %v682_v16 = vpop.permute.xlu1 %681 }
  0x8b   : > { %v716_v18 = vpop.permute.xlu1 %715 }
  0x8f   : > { %v718_v20 = vpop.permute.xlu1 %717 }
  0x93   : > { %v754_v22 = vpop.permute.xlu1 %753 }
  0xa0   : > { %v581_v4 = vpop.xlane.xlu0 %580 }
  0xa1   : > { %v585_v5 = vmul.f32 0.0078125, %v581_v4 }
  0xa3   : > { %v587_v6 = vsub.f32 %v576_v2, %v585_v5 }
  0xa4   : > { %v583_v7 = vpop.xlane.xlu0 %582 }
  0xa5   : > { %v586_v8 = vmul.f32 0.0078125, %v583_v7  ;;  %v589_v9 = vmul.f32 %v587_v6, %v587_v6 }
  0xa7   : > { %591 = vadd.xlane.f32.xlu1 %v589_v9  ;;  %v588_v10 = vsub.f32 %v577_v3, %v586_v8 }
  0xa8   : > { %v680_v12 = vpop.permute.xlu0 %679 }
  0xa9   : > { %v590_v11 = vmul.f32 %v588_v10, %v588_v10 }
  0xab   : > { %593 = vadd.xlane.f32.xlu1 %v590_v11 }
  0xac   : > { %v5574_v13 = vpop.permute.xlu0 %751 }
  0xb0   : > { %v5576_v14 = vpop.permute.xlu0 %787 }
  0xb4   : > { %v5578_v15 = vpop.permute.xlu0 %823 }
  0xb8   : > { %v860_v17 = vpop.permute.xlu0 %859 }
  0xbc   : > { %789 = vrot.lane.b32.xlu1 %v5507_v0, %s7598_s29  ;;  %v888_v19 = vpop.permute.xlu0 %887 }
  0xc0   : > { %825 = vrot.lane.b32.xlu1 %v5507_v0, %s7600_s30  ;;  %v632_v21 = vpop.permute.xlu0 %631 }
  0xc4   : > { %861 = vrot.lane.b32.xlu1 %v5507_v0, %s5390_s1  ;;  %v662_v23 = vpop.permute.xlu0 %661 }
  0xc8   : > { %889 = vrot.lane.b32.xlu1 %v5507_v0, %s5391_s20  ;;  %v5580_v26 = vpop.permute.xlu0 %663 }
  0xcc   : > { %633 = vrot.lane.b32.xlu1 %v5507_v0, %s5392_s22  ;;  %v5582_v31 = vpop.permute.xlu0 %697 }
  0xd0   : > { %623 = vrot.lane.b32.xlu1 %v5516_v1, %s5399_s19  ;;  %v700_v32 = vpop.permute.xlu0 %699 }
  0xd4   : > { %625 = vrot.lane.b32.xlu1 %v5507_v0, %s5399_s19  ;;  %v734_v37 = vpop.permute.xlu0 %733 }
  0xd8   : > { %v5592_v44 = vpop.permute.xlu0 %735 }
  0xdc   : > { %v770_v50 = vpop.permute.xlu0 %769 }
  0xe0   : > { %v772_v54 = vpop.permute.xlu0 %771 }
  0xe4   : > { %v806_v58 = vpop.permute.xlu0 %805 }
  0xe8   : > { %v808_v63 = vpop.permute.xlu0 %807 }
  0xec   : > { %v842_v4 = vpop.permute.xlu0 %841 }
  0xf0   : > { %v844_v9 = vpop.permute.xlu0 %843 }
 0x130   : > { %v592_v24 = vpop.xlane.xlu1 %591 }
 0x131   : > { %v595_v25 = vmul.f32 0.0078125, %v592_v24 }
 0x133   : > { %v597_v27 = vadd.f32 1e-05, %v595_v25 }
 0x134   : > { %v594_v28 = vpop.xlane.xlu1 %593 }
 0x135   : > { %5239 = vrsqrt.f32 %v597_v27  ;;  %v596_v29 = vmul.f32 0.0078125, %v594_v28 }
 0x137   : > { %v598_v30 = vadd.f32 1e-05, %v596_v29 }
 0x138   : > { %v790_v40 = vpop.permute.xlu1 %789 }
 0x139   : > { %5241 = vrsqrt.f32 %v598_v30  ;;  %v1029_v30 = vld [vmem:[%s7575_s4 + $0x78] sm:$0xff] }
 0x13a   : > { %4888 = vmatprep.subr.mxu0 %v1029_v30 }
 0x13b   : > { %4889 = vmatpush3.msra.mxu0 %v1029_v30 }
 0x13c   : > { %v826_v47 = vpop.permute.xlu1 %825 }
 0x140   : > { %v862_v61 = vpop.permute.xlu1 %861 }
 0x142   : > { %v5240_v33 = vpop.eup %5239 }
 0x143   : > { %v601_v35 = vmul.f32 %v5240_v33, %v587_v6 }
 0x144   : > { %v890_v2 = vpop.permute.xlu1 %889 }
 0x145   : > { %v609_v38 = vmul.f32 %v4539_v34, %v601_v35 }
 0x146   : > { %v5242_v39 = vpop.eup %5241 }
 0x147   : > { %v5590_v41 = vadd.f32 %v4540_v36, %v609_v38  ;;  %v602_v42 = vmul.f32 %v5242_v39, %v588_v10  ;;  %v1126_v38 = vld [vmem:[%s7576_s5 + $0x70] sm:$0xff] }
 0x148   : > { %v634_v7 = vpop.permute.xlu1 %633 }
 0x149   : > { %v610_v43 = vmul.f32 %v4539_v34, %v602_v42  ;;  %v5596_v45 = vmul.f32 %v5516_v1, %v5590_v41  ;;  %v5614_v51 = vmul.f32 %v860_v17, %v5590_v41  ;;  %v5617_v52 = vmul.f32 %v680_v12, %v5590_v41 }
 0x14a   : > { %v5624_v53 = vmul.f32 %v888_v19, %v5590_v41  ;;  %v5634_v56 = vmul.f32 %v632_v21, %v5590_v41  ;;  %v5637_v57 = vmul.f32 %v716_v18, %v5590_v41  ;;  %v5644_v59 = vmul.f32 %v662_v23, %v5590_v41 }
 0x14b   : > { %v5598_v46 = vadd.f32 %v4540_v36, %v610_v43  ;;  %653 = vrot.lane.b32.xlu1 %v5596_v45, %s5399_s19  ;;  %v5663_v1 = vmul.f32 %v734_v37, %v5590_v41  ;;  %v5679_v6 = vmul.f32 %v5576_v14, %v5590_v41  ;;  %v5684_v8 = vmul.f32 %v806_v58, %v5590_v41  ;;  %v1127_v36 = vld [vmem:[%s7576_s5 + $0x78] sm:$0xff]  ;;  %v1028_v37 = vld [vmem:[%s7575_s4 + $0x70] sm:$0xff]  ;;  %v1125_v43 = vld [vmem:[%s7576_s5 + $0x68] sm:$0xff] }
 0x14c   : > { %v624_v12 = vpop.permute.xlu1 %623  ;;  %v5734_v19 = vmul.f32 %v5582_v31, %v5590_v41  ;;  %v5745_v21 = vmul.f32 %v770_v50, %v5590_v41  ;;  %v5755_v23 = vmul.f32 %v842_v4, %v5590_v41  ;;  %4923 = vmatprep.subr.mxu1 %v1127_v36  ;;  %4890 = vmatprep.subr.mxu0 %v1028_v37  ;;  %v1120_v4 = vld [vmem:[%s7576_s5 + $0x40] sm:$0xff] }
 0x14d   : > { %v5603_v48 = vmul.f32 %v826_v47, %v5598_v46  ;;  %v5607_v49 = vmul.f32 %v5507_v0, %v5598_v46  ;;  %v5627_v55 = vmul.f32 %v682_v16, %v5598_v46  ;;  %v5647_v60 = vmul.f32 %v718_v20, %v5598_v46  ;;  %4924 = vmatpush3.msra.mxu1 %v1127_v36  ;;  %v1025_v47 = vld [vmem:[%s7575_s4 + $0x58] sm:$0xff] }
 0x14e   : > { %v5654_v62 = vmul.f32 %v700_v32, %v5598_v46  ;;  %v5658_v0 = vmul.f32 %v5574_v13, %v5590_v41  ;;  %v5668_v3 = vmul.f32 %v754_v22, %v5598_v46  ;;  %v5673_v5 = vmul.f32 %v772_v54, %v5598_v46  ;;  %4891 = vmatpush3.msra.mxu0 %v1028_v37  ;;  %v1123_v54 = vld [vmem:[%s7576_s5 + $0x58] sm:$0xff] }
 0x14f   : > { %835 = vrot.lane.b32.xlu0 %v5603_v48, %s5399_s19  ;;  %655 = vrot.lane.b32.xlu1 %v5607_v49, %s5399_s19  ;;  %v5689_v10 = vmul.f32 %v790_v40, %v5598_v46  ;;  %v5694_v11 = vmul.f32 %v844_v9, %v5598_v46  ;;  %v5700_v13 = vmul.f32 %v5578_v15, %v5590_v41  ;;  %v1027_v40 = vld [vmem:[%s7575_s4 + $0x68] sm:$0xff] }
 0x150   : > { %v5705_v14 = vmul.f32 %v624_v12, %v5590_v41  ;;  %v5710_v16 = vmul.f32 %v862_v61, %v5598_v46  ;;  %v5717_v15 = vmul.f32 %v890_v2, %v5598_v46  ;;  %v5722_v17 = vmul.f32 %v634_v7, %v5598_v46  ;;  %v626_v24 = vpop.permute.xlu1 %625  ;;  %4925 = vmatprep.subr.mxu1 %v1126_v38  ;;  %v1022_v2 = vld [vmem:[%s7575_s4 + $0x40] sm:$0xff]  ;;  %v1021_v7 = vld [vmem:[%s7575_s4 + $0x38] sm:$0xff] }
 0x151   : > { %v5728_v18 = vmul.f32 %v5580_v26, %v5598_v46  ;;  %v5740_v20 = vmul.f32 %v5592_v44, %v5598_v46  ;;  %v5750_v22 = vmul.f32 %v808_v63, %v5598_v46  ;;  %v5760_v25 = vmul.f32 %v626_v24, %v5598_v46  ;;  %v1026_v44 = vld [vmem:[%s7575_s4 + $0x60] sm:$0xff]  ;;  %4892 = vmatprep.subr.mxu0 %v1027_v40  ;;  %v1121_v63 = vld [vmem:[%s7576_s5 + $0x48] sm:$0xff] }
 0x152   : > { %4926 = vmatpush3.msra.mxu1 %v1126_v38  ;;  %4893 = vmatpush3.msra.mxu0 %v1027_v40  ;;  %v1115_v38 = vld [vmem:[%s7576_s5 + $0x18] sm:$0xff] }
 0x153   : > { %869 = vrot.lane.b32.xlu0 %v5614_v51, %s5399_s19  ;;  %689 = vrot.lane.b32.xlu1 %v5617_v52, %s5399_s19 }
 0x154   : > { %4927 = vmatprep.subr.mxu1 %v1125_v43  ;;  %4894 = vmatprep.subr.mxu0 %v1026_v44 }
 0x155   : > { %4928 = vmatpush3.msra.mxu1 %v1125_v43  ;;  %4895 = vmatpush3.msra.mxu0 %v1026_v44 }
 0x156   : > { %4896 = vmatprep.subr.mxu0 %v1025_v47 }
 0x157   : > { %897 = vrot.lane.b32.xlu0 %v5624_v53, %s5399_s19  ;;  %691 = vrot.lane.b32.xlu1 %v5627_v55, %s5399_s19 }
 0x158   : > { %4897 = vmatpush3.msra.mxu0 %v1025_v47  ;;  %v1113_v47 = vld [vmem:[%s7576_s5 + $0x8] sm:$0xff] }
 0x15b   : > { %641 = vrot.lane.b32.xlu0 %v5634_v56, %s5399_s19  ;;  %725 = vrot.lane.b32.xlu1 %v5637_v57, %s5399_s19 }
 0x15f   : > { %671 = vrot.lane.b32.xlu0 %v5644_v59, %s5399_s19  ;;  %727 = vrot.lane.b32.xlu1 %v5647_v60, %s5399_s19 }
 0x163   : > { %709 = vrot.lane.b32.xlu0 %v5654_v62, %s5399_s19  ;;  %761 = vrot.lane.b32.xlu1 %v5658_v0, %s5399_s19 }
 0x167   : > { %743 = vrot.lane.b32.xlu0 %v5663_v1, %s5399_s19  ;;  %763 = vrot.lane.b32.xlu1 %v5668_v3, %s5399_s19 }
 0x16b   : > { %781 = vrot.lane.b32.xlu0 %v5673_v5, %s5399_s19  ;;  %797 = vrot.lane.b32.xlu1 %v5679_v6, %s5399_s19 }
 0x16f   : > { %815 = vrot.lane.b32.xlu0 %v5684_v8, %s5399_s19  ;;  %799 = vrot.lane.b32.xlu1 %v5689_v10, %s5399_s19 }
 0x173   : > { %853 = vrot.lane.b32.xlu0 %v5694_v11, %s5399_s19  ;;  %833 = vrot.lane.b32.xlu1 %v5700_v13, %s5399_s19 }
 0x177   : > { %879 = vrot.lane.b32.xlu0 %v5705_v14, %s5399_s19  ;;  %871 = vrot.lane.b32.xlu1 %v5710_v16, %s5399_s19 }
 0x17b   : > { %899 = vrot.lane.b32.xlu1 %v5717_v15, %s5399_s19 }
 0x17f   : > { %643 = vrot.lane.b32.xlu1 %v5722_v17, %s5399_s19 }
 0x183   : > { %673 = vrot.lane.b32.xlu1 %v5728_v18, %s5399_s19 }
 0x187   : > { %707 = vrot.lane.b32.xlu1 %v5734_v19, %s5399_s19 }
 0x18b   : > { %745 = vrot.lane.b32.xlu1 %v5740_v20, %s5399_s19 }
 0x18f   : > { %779 = vrot.lane.b32.xlu1 %v5745_v21, %s5399_s19 }
 0x193   : > { %817 = vrot.lane.b32.xlu1 %v5750_v22, %s5399_s19 }
 0x197   : > { %851 = vrot.lane.b32.xlu1 %v5755_v23, %s5399_s19 }
 0x19b   : > { %881 = vrot.lane.b32.xlu1 %v5760_v25, %s5399_s19  ;;  %s7618_s19 = smov 64  }
 0x1bd   : > { %v654_v26 = vpop.permute.xlu1 %653 }
 0x1be   : > { %v659_v28 = vadd.f32 %v654_v26, %v5596_v45  ;;  %v1124_v45 = vld [vmem:[%s7576_s5 + $0x60] sm:$0xff]  ;;  %v1119_v26 = vld [vmem:[%s7576_s5 + $0x38] sm:$0xff] }
 0x1bf   : > { %4929 = vmatprep.subr.mxu1 %v1124_v45 }
 0x1c0   : > { %4930 = vmatpush3.msra.mxu1 %v1124_v45 }
 0x1c1   : > { %v656_v27 = vpop.permute.xlu1 %655  ;;  %4931 = vmatprep.subr.mxu1 %v1123_v54  ;;  %v836_v30 = vpop.permute.xlu0 %835 }
 0x1c2   : > { %v660_v29 = vadd.f32 %v656_v27, %v5607_v49  ;;  %4932 = vmatpush3.msra.mxu1 %v1123_v54  ;;  %v1020_v27 = vld [vmem:[%s7575_s4 + $0x30] sm:$0xff]  ;;  %v840_v44 = vadd.f32 %v836_v30, %v5603_v48  ;;  %v1112_v48 = vld [vmem:[%s7576_s5] sm:$0xff] }
 0x1c4   : > { %v5164_v31 = vpack.i.bf16 %v660_v29, %v659_v28  ;;  %v1019_v29 = vld [vmem:[%s7575_s4 + $0x28] sm:$0xff] }
 0x1c5   : > { %v690_v32 = vpop.permute.xlu1 %689 }
 0x1c6   : > { %5165 = vrot.lane.b32.xlu0 %v5164_v31, %s5392_s22  ;;  %v695_v34 = vadd.f32 %v690_v32, %v5617_v52  ;;  %v1117_v31 = vld [vmem:[%s7576_s5 + $0x28] sm:$0xff]  ;;  %v1018_v32 = vld [vmem:[%s7575_s4 + $0x20] sm:$0xff] }
 0x1c9   : > { %v692_v33 = vpop.permute.xlu1 %691 }
 0x1ca   : > { %v696_v35 = vadd.f32 %v692_v33, %v5627_v55  ;;  %v1024_v55 = vld [vmem:[%s7575_s4 + $0x50] sm:$0xff]  ;;  %v1116_v33 = vld [vmem:[%s7576_s5 + $0x20] sm:$0xff] }
 0x1cb   : > { %4898 = vmatprep.subr.mxu0 %v1024_v55 }
 0x1cc   : > { %v5169_v39 = vpack.i.bf16 %v696_v35, %v695_v34  ;;  %4899 = vmatpush3.msra.mxu0 %v1024_v55  ;;  %v1017_v35 = vld [vmem:[%s7575_s4 + $0x18] sm:$0xff] }
 0x1cd   : > { %v726_v42 = vpop.permute.xlu1 %725  ;;  %v5883_v55 = vld [vmem:[%s7577_s6 + $0x78] sm:$0xff] }
 0x1ce   : > { %5170 = vrot.lane.b32.xlu1 %v5169_v39, %s5392_s22  ;;  %v731_v50 = vadd.f32 %v726_v42, %v5637_v57  ;;  %v1122_v57 = vld [vmem:[%s7576_s5 + $0x50] sm:$0xff]  ;;  %v870_v42 = vpop.permute.xlu0 %869 }
 0x1cf   : > { %4933 = vmatprep.subr.mxu1 %v1122_v57  ;;  %v1016_v39 = vld [vmem:[%s7575_s4 + $0x10] sm:$0xff] }
 0x1d0   : > { %4934 = vmatpush3.msra.mxu1 %v1122_v57 }
 0x1d1   : > { %v728_v49 = vpop.permute.xlu1 %727  ;;  %4935 = vmatprep.subr.mxu1 %v1121_v63 }
 0x1d2   : > { %v732_v52 = vadd.f32 %v728_v49, %v5647_v60  ;;  %v1023_v60 = vld [vmem:[%s7575_s4 + $0x48] sm:$0xff]  ;;  %4936 = vmatpush3.msra.mxu1 %v1121_v63 }
 0x1d3   : > { %4900 = vmatprep.subr.mxu0 %v1023_v60  ;;  %4937 = vmatprep.subr.mxu1 %v1120_v4 }
 0x1d4   : > { %v5174_v58 = vpack.i.bf16 %v732_v52, %v731_v50  ;;  %4901 = vmatpush3.msra.mxu0 %v1023_v60  ;;  %4938 = vmatpush3.msra.mxu1 %v1120_v4  ;;  %v1014_v50 = vld [vmem:[%s7575_s4] sm:$0xff] }
 0x1d5   : > { %v762_v61 = vpop.permute.xlu1 %761  ;;  %4902 = vmatprep.subr.mxu0 %v1022_v2  ;;  %4939 = vmatprep.subr.mxu1 %v1119_v26 }
 0x1d6   : > { %5175 = vrot.lane.b32.xlu0 %v5174_v58, %s5392_s22  ;;  %v767_v12 = vadd.f32 %v762_v61, %v5658_v0  ;;  %4903 = vmatpush3.msra.mxu0 %v1022_v2  ;;  %v1118_v0 = vld [vmem:[%s7576_s5 + $0x30] sm:$0xff]  ;;  %v898_v58 = vpop.permute.xlu0 %897 }
 0x1d7   : > { %4904 = vmatprep.subr.mxu0 %v1021_v7  ;;  %4940 = vmatpush3.msra.mxu1 %v1119_v26 }
 0x1d8   : > { %4905 = vmatpush3.msra.mxu0 %v1021_v7  ;;  %4941 = vmatprep.subr.mxu1 %v1118_v0 }
 0x1d9   : > { %v764_v9 = vpop.permute.xlu1 %763  ;;  %4906 = vmatprep.subr.mxu0 %v1020_v27  ;;  %4942 = vmatpush3.msra.mxu1 %v1118_v0 }
 0x1da   : > { %v768_v24 = vadd.f32 %v764_v9, %v5668_v3  ;;  %4907 = vmatpush3.msra.mxu0 %v1020_v27  ;;  %4943 = vmatprep.subr.mxu1 %v1117_v31  ;;  %v642_v63 = vpop.permute.xlu0 %641 }
 0x1db   : > { %4908 = vmatprep.subr.mxu0 %v1019_v29  ;;  %4944 = vmatpush3.msra.mxu1 %v1117_v31 }
 0x1dc   : > { %v5179_v28 = vpack.i.bf16 %v768_v24, %v767_v12  ;;  %4909 = vmatpush3.msra.mxu0 %v1019_v29  ;;  %4945 = vmatprep.subr.mxu1 %v1116_v33 }
 0x1dd   : > { %v798_v3 = vpop.permute.xlu1 %797  ;;  %4910 = vmatprep.subr.mxu0 %v1018_v32  ;;  %4946 = vmatpush3.msra.mxu1 %v1116_v33 }
 0x1de   : > { %5180 = vrot.lane.b32.xlu1 %v5179_v28, %s5392_s22  ;;  %v803_v36 = vadd.f32 %v798_v3, %v5679_v6  ;;  %4911 = vmatpush3.msra.mxu0 %v1018_v32  ;;  %v1114_v6 = vld [vmem:[%s7576_s5 + $0x10] sm:$0xff]  ;;  %v672_v4 = vpop.permute.xlu0 %671 }
 0x1df   : > { %4912 = vmatprep.subr.mxu0 %v1017_v35  ;;  %4947 = vmatprep.subr.mxu1 %v1115_v38 }
 0x1e0   : > { %4913 = vmatpush3.msra.mxu0 %v1017_v35  ;;  %4948 = vmatpush3.msra.mxu1 %v1115_v38  ;;  %v647_v35 = vsub.f32 %v5705_v14, %v642_v63 }
 0x1e1   : > { %v800_v34 = vpop.permute.xlu1 %799  ;;  %4914 = vmatprep.subr.mxu0 %v1016_v39  ;;  %4949 = vmatprep.subr.mxu1 %v1114_v6 }
 0x1e2   : > { %v804_v37 = vadd.f32 %v800_v34, %v5689_v10  ;;  %v1015_v10 = vld [vmem:[%s7575_s4 + $0x8] sm:$0xff]  ;;  %4915 = vmatpush3.msra.mxu0 %v1016_v39  ;;  %4950 = vmatpush3.msra.mxu1 %v1114_v6  ;;  %v710_v9 = vpop.permute.xlu0 %709 }
 0x1e3   : > { %4916 = vmatprep.subr.mxu0 %v1015_v10  ;;  %4951 = vmatprep.subr.mxu1 %v1113_v47 }
 0x1e4   : > { %v5184_v40 = vpack.i.bf16 %v804_v37, %v803_v36  ;;  %4917 = vmatpush3.msra.mxu0 %v1015_v10  ;;  %4952 = vmatpush3.msra.mxu1 %v1113_v47 }
 0x1e5   : > { %v834_v43 = vpop.permute.xlu1 %833  ;;  %4918 = vmatprep.subr.mxu0 %v1014_v50  ;;  %4953 = vmatprep.subr.mxu1 %v1112_v48 }
 0x1e6   : > { %v839_v45 = vadd.f32 %v834_v43, %v5700_v13  ;;  %5185 = vrot.lane.b32.xlu0 %v5184_v40, %s5392_s22  ;;  %v875_v13 = vadd.f32 %v870_v42, %v5614_v51  ;;  %4919 = vmatpush3.msra.mxu0 %v1014_v50  ;;  %v903_v51 = vadd.f32 %v898_v58, %v5624_v53  ;;  %v744_v24 = vpop.permute.xlu0 %743 }
 0x1e7   : > { %4954 = vmatpush3.msra.mxu1 %v1112_v48  ;;  %4958 = vmatprep.subr.mxu0 %v5883_v55  ;;  %v677_v42 = vsub.f32 %v5634_v56, %v672_v4 }
 0x1e8   : > { %v5189_v49 = vpack.i.bf16 %v840_v44, %v839_v45 }
 0x1e9   : > { %v872_v52 = vpop.permute.xlu1 %871 }
 0x1ea   : > { %v876_v54 = vadd.f32 %v872_v52, %v5710_v16  ;;  %5190 = vrot.lane.b32.xlu1 %v5189_v49, %s5392_s22  ;;  %v782_v27 = vpop.permute.xlu0 %781  ;;  %v714_v49 = vsub.f32 %v5728_v18, %v710_v9 }
 0x1ec   : > { %v5194_v57 = vpack.i.bf16 %v876_v54, %v875_v13 }
 0x1ed   : > { %v900_v60 = vpop.permute.xlu1 %899 }
 0x1ee   : > { %v904_v16 = vadd.f32 %v900_v60, %v5717_v15  ;;  %5195 = vrot.lane.b32.xlu0 %v5194_v57, %s5392_s22  ;;  %v5890_v0 = vpop.permute.xlu0 %815  ;;  %v749_v57 = vsub.f32 %v5734_v19, %v744_v24 }
 0x1ef   : > { %v821_v24 = vsub.f32 %v5745_v21, %v5890_v0 }
 0x1f0   : > { %v5199_v61 = vpack.i.bf16 %v904_v16, %v903_v51 }
 0x1f1   : > { %v644_v2 = vpop.permute.xlu1 %643 }
 0x1f2   : > { %5200 = vrot.lane.b32.xlu1 %v5199_v61, %s5392_s22  ;;  %v5894_v15 = vpop.permute.xlu0 %853  ;;  %v648_v36 = vsub.f32 %v5760_v25, %v644_v2  ;;  %v786_v61 = vsub.f32 %v5740_v20, %v782_v27  ;;  %s7617_s22 = smov 80  }
 0x1f5   : > { %v674_v7 = vpop.permute.xlu1 %673 }
 0x1f6   : > { %v5898_v29 = vpop.permute.xlu0 %879  ;;  %v678_v43 = vsub.f32 %v5722_v17, %v674_v7 }
 0x1f9   : > { %v708_v12 = vpop.permute.xlu1 %707 }
 0x1fa   : > { %v713_v50 = vsub.f32 %v5644_v59, %v708_v12 }
 0x1fd   : > { %v746_v26 = vpop.permute.xlu1 %745 }
 0x1fe   : > { %v750_v60 = vsub.f32 %v5654_v62, %v746_v26 }
 0x201   : > { %v780_v28 = vpop.permute.xlu1 %779 }
 0x202   : > { %v785_v63 = vsub.f32 %v5663_v1, %v780_v28 }
 0x205   : > { %v5892_v53 = vpop.permute.xlu1 %817 }
 0x206   : > { %v822_v26 = vsub.f32 %v5673_v5, %v5892_v53 }
 0x209   : > { %v5896_v3 = vpop.permute.xlu1 %851 }
 0x20a   : > { %v857_v21 = vsub.f32 %v5684_v8, %v5896_v3 }
 0x20d   : > { %v5900_v30 = vpop.permute.xlu1 %881 }
 0x238   : > { %v5166_v31 = vpop.permute.xlu0 %5165 }
 0x239   : > { %v5168_v32 = vunpack.i.h.bf16 %v5166_v31  ;;  %v5167_v33 = vunpack.i.l.bf16 %v5166_v31 }
 0x23b   : > { %v971_v37 = vsel %vm969_vm0, %v648_v36, %v5168_v32  ;;  %v970_v38 = vsel %vm969_vm0, %v647_v35, %v5167_v33 }
 0x23c   : > { %v973_v10 = vsel %vm972_vm1, %v970_v38, %v677_v42  ;;  %v974_v44 = vsel %vm972_vm1, %v971_v37, %v678_v43 }
 0x240   : > { %v5171_v34 = vpop.permute.xlu1 %5170 }
 0x241   : > { %v5173_v39 = vunpack.i.h.bf16 %v5171_v34  ;;  %v5172_v40 = vunpack.i.l.bf16 %v5171_v34  ;;  %v858_v34 = vsub.f32 %v5750_v22, %v5894_v15  ;;  %v886_v22 = vsub.f32 %v5694_v11, %v5900_v30  ;;  %v1223_v11 = vld [vmem:[%s7577_s6 + $0x68] sm:$0xff]  ;;  %v1218_v30 = vld [vmem:[%s7577_s6 + $0x40] sm:$0xff] }
 0x243   : > { %v976_v45 = vsel %vm975_vm2, %v973_v10, %v5172_v40  ;;  %v977_v14 = vsel %vm975_vm2, %v974_v44, %v5173_v39  ;;  %v885_v39 = vsub.f32 %v5755_v23, %v5898_v29  ;;  %v1224_v10 = vld [vmem:[%s7577_s6 + $0x70] sm:$0xff]  ;;  %v1222_v23 = vld [vmem:[%s7577_s6 + $0x60] sm:$0xff]  ;;  %v1221_v29 = vld [vmem:[%s7577_s6 + $0x58] sm:$0xff] }
 0x244   : > { %v979_v56 = vsel %vm978_vm3, %v976_v45, %v713_v50  ;;  %v980_v17 = vsel %vm978_vm3, %v977_v14, %v714_v49  ;;  %v1217_v44 = vld [vmem:[%s7577_s6 + $0x38] sm:$0xff]  ;;  %v1216_v45 = vld [vmem:[%s7577_s6 + $0x30] sm:$0xff]  ;;  %v1215_v14 = vld [vmem:[%s7577_s6 + $0x28] sm:$0xff] }
 0x245   : > { %v1212_v49 = vld [vmem:[%s7577_s6 + $0x10] sm:$0xff]  ;;  %v1211_v50 = vld [vmem:[%s7577_s6 + $0x8] sm:$0xff] }
 0x248   : > { %v5176_v6 = vpop.permute.xlu0 %5175 }
 0x249   : > { %v5178_v47 = vunpack.i.h.bf16 %v5176_v6  ;;  %v5177_v25 = vunpack.i.l.bf16 %v5176_v6 }
 0x24b   : > { %v982_v48 = vsel %vm981_vm4, %v979_v56, %v5177_v25  ;;  %v983_v13 = vsel %vm981_vm4, %v980_v17, %v5178_v47  ;;  %v1214_v47 = vld [vmem:[%s7577_s6 + $0x20] sm:$0xff]  ;;  %v1213_v25 = vld [vmem:[%s7577_s6 + $0x18] sm:$0xff] }
 0x24c   : > { %v985_v18 = vsel %vm984_vm5, %v982_v48, %v749_v57  ;;  %v986_v59 = vsel %vm984_vm5, %v983_v13, %v750_v60  ;;  %v4542_v56 = vld [vmem:[%s7579_s8] ss:$0 sm:$0xff] }
 0x250   : > { %v5181_v52 = vpop.permute.xlu1 %5180 }
 0x251   : > { %v5183_v54 = vunpack.i.h.bf16 %v5181_v52  ;;  %v5182_v58 = vunpack.i.l.bf16 %v5181_v52  ;;  %v1210_v52 = vld [vmem:[%s7577_s6] sm:$0xff] }
 0x253   : > { %v988_v51 = vsel %vm987_vm6, %v985_v18, %v5182_v58  ;;  %v989_v16 = vsel %vm987_vm6, %v986_v59, %v5183_v54  ;;  %v4541_v54 = vld [vmem:[%s7578_s7] ss:$0 sm:$0xff] }
 0x254   : > { %v991_v19 = vsel %vm990_vm7, %v988_v51, %v785_v63  ;;  %v992_v62 = vsel %vm990_vm7, %v989_v16, %v786_v61  ;;  %v4543_v59 = vld [vmem:[%s7580_s9] ss:$0 sm:$0xff] }
 0x258   : > { %v5186_v2 = vpop.permute.xlu0 %5185 }
 0x259   : > { %v5188_v4 = vunpack.i.h.bf16 %v5186_v2  ;;  %v5187_v7 = vunpack.i.l.bf16 %v5186_v2 }
 0x25b   : > { %v994_v9 = vsel %vm993_vm8, %v991_v19, %v5187_v7  ;;  %v995_v12 = vsel %vm993_vm8, %v992_v62, %v5188_v4 }
 0x25c   : > { %v5191_v20 = vpop.permute.xlu1 %5190  ;;  %v997_v28 = vsel %vm996_vm9, %v994_v9, %v821_v24  ;;  %v998_v31 = vsel %vm996_vm9, %v995_v12, %v822_v26 }
 0x25d   : > { %v5193_v1 = vunpack.i.h.bf16 %v5191_v20  ;;  %v5192_v27 = vunpack.i.l.bf16 %v5191_v20 }
 0x25f   : > { %v1000_v32 = vsel %vm999_vm10, %v997_v28, %v5192_v27  ;;  %v1001_v33 = vsel %vm999_vm10, %v998_v31, %v5193_v1 }
 0x260   : > { %v5196_v0 = vpop.permute.xlu0 %5195  ;;  %v1003_v35 = vsel %vm1002_vm11, %v1000_v32, %v857_v21  ;;  %v1004_v36 = vsel %vm1002_vm11, %v1001_v33, %v858_v34 }
 0x261   : > { %v5198_v5 = vunpack.i.h.bf16 %v5196_v0  ;;  %v5197_v53 = vunpack.i.l.bf16 %v5196_v0 }
 0x263   : > { %v1006_v37 = vsel %vm1005_vm12, %v1003_v35, %v5197_v53  ;;  %v1007_v38 = vsel %vm1005_vm12, %v1004_v36, %v5198_v5 }
 0x264   : > { %v5201_v15 = vpop.permute.xlu1 %5200  ;;  %v1009_v40 = vsel %vm1008_vm13, %v1006_v37, %v885_v39  ;;  %v1010_v42 = vsel %vm1008_vm13, %v1007_v38, %v886_v22 }
 0x265   : > { %v5203_v8 = vunpack.i.h.bf16 %v5201_v15  ;;  %v5202_v3 = vunpack.i.l.bf16 %v5201_v15 }
 0x267   : > { %v1012_v43 = vsel %vm1011_vm14, %v1009_v40, %v5202_v3  ;;  %v1013_v6 = vsel %vm1011_vm14, %v1010_v42, %v5203_v8 }
 0x268   : > { %4920 = vmatprep.mubr.f32.mxu0 %v1012_v43  ;;  %4955 = vmatprep.mubr.f32.mxu1 %v1012_v43 }
 0x269   : > { %4921 = vmatmul.mubr.f32.vlgmr.msra.gmra.mxu0 %v1013_v6  ;;  %4956 = vmatmul.mubr.f32.vlgmr.msra.gmra.mxu1 %v1013_v6 }
 0x26a   : > { %4959 = vmatpush3.msra.mxu0 %v5883_v55  ;;  %4990 = vmatprep.mubr.f32.mxu0 %v5590_v41  ;;  %v1220_v41 = vld [vmem:[%s7577_s6 + $0x50] sm:$0xff]  ;;  %v1219_v55 = vld [vmem:[%s7577_s6 + $0x48] sm:$0xff] }
 0x26b   : > { %4960 = vmatprep.subr.mxu0 %v1224_v10 }
 0x26c   : > { %4961 = vmatpush3.msra.mxu0 %v1224_v10 }
 0x26d   : > { %4962 = vmatprep.subr.mxu0 %v1223_v11 }
 0x26e   : > { %4963 = vmatpush3.msra.mxu0 %v1223_v11 }
 0x26f   : > { %4964 = vmatprep.subr.mxu0 %v1222_v23 }
 0x270   : > { %4965 = vmatpush3.msra.mxu0 %v1222_v23 }
 0x271   : > { %4966 = vmatprep.subr.mxu0 %v1221_v29 }
 0x272   : > { %4967 = vmatpush3.msra.mxu0 %v1221_v29 }
 0x273   : > { %4968 = vmatprep.subr.mxu0 %v1220_v41 }
 0x274   : > { %4969 = vmatpush3.msra.mxu0 %v1220_v41 }
 0x275   : > { %4970 = vmatprep.subr.mxu0 %v1219_v55 }
 0x276   : > { %4971 = vmatpush3.msra.mxu0 %v1219_v55 }
 0x277   : > { %4972 = vmatprep.subr.mxu0 %v1218_v30 }
 0x278   : > { %4973 = vmatpush3.msra.mxu0 %v1218_v30 }
 0x279   : > { %4974 = vmatprep.subr.mxu0 %v1217_v44 }
 0x27a   : > { %4975 = vmatpush3.msra.mxu0 %v1217_v44 }
 0x27b   : > { %4976 = vmatprep.subr.mxu0 %v1216_v45 }
 0x27c   : > { %4977 = vmatpush3.msra.mxu0 %v1216_v45 }
 0x27d   : > { %4978 = vmatprep.subr.mxu0 %v1215_v14 }
 0x27e   : > { %4979 = vmatpush3.msra.mxu0 %v1215_v14 }
 0x27f   : > { %4980 = vmatprep.subr.mxu0 %v1214_v47 }
 0x280   : > { %4981 = vmatpush3.msra.mxu0 %v1214_v47 }
 0x281   : > { %4982 = vmatprep.subr.mxu0 %v1213_v25 }
 0x282   : > { %4983 = vmatpush3.msra.mxu0 %v1213_v25 }
 0x283   : > { %4984 = vmatprep.subr.mxu0 %v1212_v49 }
 0x284   : > { %4985 = vmatpush3.msra.mxu0 %v1212_v49 }
 0x285   : > { %4986 = vmatprep.subr.mxu0 %v1211_v50 }
 0x286   : > { %4987 = vmatpush3.msra.mxu0 %v1211_v50 }
 0x287   : > { %4988 = vmatprep.subr.mxu0 %v1210_v52 }
 0x288   : > { %4989 = vmatpush3.msra.mxu0 %v1210_v52 }
 0x289   : > { %4991 = vmatmul.mubr.f32.vlgmr.msra.gmra.mxu0 %v5598_v46 }
 0x329   : > { %v4922_v17 = vpop.f32.mrf.mxu0  ;;  %v4957_v48 = vpop.f32.mrf.mxu1 }
 0x32a   : > { %v5989_v13 = vadd.f32 %v4957_v48, %v4542_v56  ;;  %v6008_v46 = vadd.f32 %v4922_v17, %v4541_v54 }
 0x32b   : > { %v1103_v58 = vpop.f32.mrf.mxu0  ;;  %v1201_v57 = vpop.f32.mrf.mxu1 }
 0x32c   : > { %v5994_v60 = vadd.f32 %v4541_v54, %v1103_v58  ;;  %v5996_v18 = vadd.f32 %v4542_v56, %v1201_v57  ;;  %4993 = vmatprep.subr.msk.mxu1 %vm972_vm1, %v5989_v13 }
 0x32d   : > { %4994 = vmatpush3.xpose.msk.msra.mxu1 %vm972_vm1, %v5989_v13 }
 0x32e   : > { %4995 = vmatprep.subr.msk.mxu1 %vm972_vm1, %v5996_v18  ;;  %4997 = vmatprep.mubr.msk.f32.mxu1 %vm972_vm1, %v5994_v60 }
 0x331   : > { %4996 = vmatpush3.xpose.msk.msra.mxu1 %vm972_vm1, %v5996_v18 }
 0x334   : > { %4998 = vmatmul.mubr.msk.f32.vlgmr.msra.gmra.mxu1 %vm972_vm1, %v6008_v46 }
 0x349   : > { %v4992_v51 = vpop.f32.mrf.mxu0 }
 0x34a   : > { %v6015_v16 = vadd.f32 %v4992_v51, %v4543_v59 }
 0x34b   : > { %v1299_v61 = vpop.f32.mrf.mxu0 }
 0x34c   : > { %v6017_v63 = vadd.f32 %v4543_v59, %v1299_v61  ;;  %5000 = vmatprep.subr.mxu1 %v6015_v16 }
 0x34d   : > { %5001 = vmatpush3.msra.mxu1 %v6015_v16 }
 0x34e   : > { %5002 = vmatprep.subr.mxu1 %v6017_v63 }
 0x34f   : > { %5003 = vmatpush3.msra.mxu1 %v6017_v63 }
 0x3f4   : > { %v4999_v2 = vpop.f32.mrf.mxu1 }
 0x3f5   : > { %v1396_v4 = vmul.f32 0.25, %v4999_v2 }
 0x3f6   : > { %v1386_v7 = vpop.f32.mrf.mxu1 }
 0x3f7   : > { %v1395_v19 = vmul.f32 0.25, %v1386_v7  ;;  %v1400_v62 = vsel %vm972_vm1, %v1396_v4, -inf }
 0x3f8   : > { %1401 = vmax.xlane.f32.xlu1 %v1400_v62 }
 0x3f9   : > { %v1397_v9 = vsel %vm972_vm1, %v1395_v19, -inf }
 0x3fa   : > { %1398 = vmax.xlane.f32.xlu0 %v1397_v9 }
 0x409   : > { %1504 = vrot.lane.b32.xlu1 %v5996_v18, %s5391_s20 }
 0x40d   : > { %1500 = vrot.lane.b32.xlu1 %v5994_v60, %s5391_s20 }
 0x411   : > { %1502 = vrot.lane.b32.xlu1 %v6008_v46, %s5391_s20 }
 0x481   : > { %v1402_v12 = vpop.xlane.xlu1 %1401 }
 0x482   : > { %v1404_v24 = vsub.f32 %v1396_v4, %v1402_v12 }
 0x483   : > { %v1399_v26 = vpop.xlane.xlu0 %1398 }
 0x484   : > { %v1407_v20 = vmul.f32 1.442695, %v1404_v24  ;;  %v1403_v1 = vsub.f32 %v1395_v19, %v1399_v26 }
 0x485   : > { %v1505_v5 = vpop.permute.xlu1 %1504 }
 0x486   : > { %5243 = vpow2.f32 %v1407_v20  ;;  %v1405_v27 = vmul.f32 1.442695, %v1403_v1 }
 0x488   : > { %5245 = vpow2.f32 %v1405_v27 }
 0x489   : > { %v1501_v38 = vpop.permute.xlu1 %1500 }
 0x48d   : > { %v1503_v39 = vpop.permute.xlu1 %1502 }
 0x493   : > { %v5244_v28 = vpop.eup %5243 }
 0x494   : > { %v1412_v31 = vsel %vm972_vm1, %v5244_v28, 0.0 }
 0x495   : > { %v5246_v32 = vpop.eup %5245  ;;  %1413 = vadd.xlane.f32.xlu0 %v1412_v31 }
 0x496   : > { %v1409_v33 = vsel %vm972_vm1, %v5246_v32, 0.0 }
 0x499   : > { %1410 = vadd.xlane.f32.xlu0 %v1409_v33 }
 0x4af   : > { %1506 = vrot.lane.b32.xlu0 %v5989_v13, %s5391_s20 }
 0x51e   : > { %v1414_v34 = vpop.xlane.xlu0 %1413 }
 0x51f   : > { %5247 = vrcp.f32 %v1414_v34 }
 0x522   : > { %v1411_v21 = vpop.xlane.xlu0 %1410 }
 0x523   : > { %5249 = vrcp.f32 %v1411_v21 }
 0x526   : > { %v1507_v0 = vpop.permute.xlu0 %1506 }
 0x527   : > { %5007 = vmatprep.subr.msk.mxu1 %vm972_vm1, %v1507_v0 }
 0x52c   : > { %v5248_v53 = vpop.eup %5247 }
 0x52d   : > { %v1418_v37 = vmul.f32 %v5248_v53, %v5244_v28 }
 0x530   : > { %v5250_v35 = vpop.eup %5249 }
 0x531   : > { %v1416_v36 = vmul.f32 %v5250_v35, %v5246_v32 }
 0x533   : > { %5004 = vmatprep.mubr.msk.f32.mxu1 %vm972_vm1, %v1416_v36 }
 0x534   : > { %5005 = vmatmul.mubr.msk.f32.vlgmr.msra.gmra.mxu1 %vm972_vm1, %v1418_v37 }
 0x535   : > { %5008 = vmatpush3.xpose.msk.msra.mxu1 %vm972_vm1, %v1507_v0  ;;  %5011 = vmatprep.mubr.msk.f32.mxu1 %vm972_vm1, %v1501_v38 }
 0x536   : > { %5009 = vmatprep.subr.msk.mxu1 %vm972_vm1, %v1505_v5 }
 0x539   : > { %5010 = vmatpush3.xpose.msk.msra.mxu1 %vm972_vm1, %v1505_v5 }
 0x53c   : > { %5012 = vmatmul.mubr.msk.f32.vlgmr.msra.gmra.mxu1 %vm972_vm1, %v1503_v39 }
 0x5f4   : > { %v6043_v22 = vpop.f32.mrf.mxu1 }
 0x5f6   : > { %v6045_v15 = vpop.f32.mrf.mxu1 }
 0x5fc   : > { %v5013_v8 = vpop.f32.mrf.mxu1 }
 0x5fd   : > { %v1592_v3 = vmul.f32 0.25, %v5013_v8 }
 0x5fe   : > { %v1582_v40 = vpop.f32.mrf.mxu1 }
 0x5ff   : > { %v1591_v42 = vmul.f32 0.25, %v1582_v40  ;;  %v1596_v43 = vsel %vm972_vm1, %v1592_v3, -inf }
 0x600   : > { %1597 = vmax.xlane.f32.xlu1 %v1596_v43 }
 0x601   : > { %v1593_v6 = vsel %vm972_vm1, %v1591_v42, -inf }
 0x602   : > { %1594 = vmax.xlane.f32.xlu0 %v1593_v6 }
 0x611   : > { %1617 = vrot.lane.b32.xlu1 %v6017_v63, %s5391_s20 }
 0x615   : > { %1710 = vrot.lane.b32.xlu1 %v5989_v13, %s5390_s1 }
 0x619   : > { %1708 = vrot.lane.b32.xlu1 %v5996_v18, %s5390_s1 }
 0x61d   : > { %1912 = vrot.lane.b32.xlu1 %v5989_v13, %s7617_s22 }
 0x621   : > { %1910 = vrot.lane.b32.xlu1 %v5996_v18, %s7617_s22 }
 0x625   : > { %2114 = vrot.lane.b32.xlu1 %v5989_v13, %s7618_s19 }
 0x629   : > { %2112 = vrot.lane.b32.xlu1 %v5996_v18, %s7618_s19 }
 0x62d   : > { %2110 = vrot.lane.b32.xlu1 %v6008_v46, %s7618_s19 }
 0x689   : > { %v1598_v10 = vpop.xlane.xlu1 %1597 }
 0x68a   : > { %v1600_v11 = vsub.f32 %v1592_v3, %v1598_v10 }
 0x68b   : > { %v1595_v23 = vpop.xlane.xlu0 %1594 }
 0x68c   : > { %v1603_v29 = vmul.f32 1.442695, %v1600_v11  ;;  %v1599_v41 = vsub.f32 %v1591_v42, %v1595_v23 }
 0x68d   : > { %v1618_v25 = vpop.permute.xlu1 %1617 }
 0x68e   : > { %5251 = vpow2.f32 %v1603_v29  ;;  %v1601_v55 = vmul.f32 1.442695, %v1599_v41 }
 0x690   : > { %5253 = vpow2.f32 %v1601_v55 }
 0x691   : > { %v1711_v52 = vpop.permute.xlu1 %1710 }
 0x695   : > { %v1709_v17 = vpop.permute.xlu1 %1708 }
 0x699   : > { %v1913_v51 = vpop.permute.xlu1 %1912 }
 0x69b   : > { %v5252_v30 = vpop.eup %5251 }
 0x69c   : > { %v1608_v44 = vsel %vm972_vm1, %v5252_v30, 0.0 }
 0x69d   : > { %v5254_v45 = vpop.eup %5253  ;;  %1609 = vadd.xlane.f32.xlu0 %v1608_v44  ;;  %v1911_v2 = vpop.permute.xlu1 %1910 }
 0x69e   : > { %v1605_v14 = vsel %vm972_vm1, %v5254_v45, 0.0 }
 0x6a1   : > { %1606 = vadd.xlane.f32.xlu0 %v1605_v14  ;;  %v2115_v7 = vpop.permute.xlu1 %2114 }
 0x6a5   : > { %v2113_v62 = vpop.permute.xlu1 %2112 }
 0x6a9   : > { %v2111_v9 = vpop.permute.xlu1 %2110 }
 0x6b7   : > { %1619 = vrot.lane.b32.xlu0 %v6015_v16, %s5391_s20 }
 0x6bb   : > { %1704 = vrot.lane.b32.xlu0 %v5994_v60, %s5390_s1 }
 0x6bf   : > { %1706 = vrot.lane.b32.xlu0 %v6008_v46, %s5390_s1 }
 0x6c3   : > { %1906 = vrot.lane.b32.xlu0 %v5994_v60, %s7617_s22 }
 0x6c7   : > { %1908 = vrot.lane.b32.xlu0 %v6008_v46, %s7617_s22 }
 0x6cb   : > { %2108 = vrot.lane.b32.xlu0 %v5994_v60, %s7618_s19 }
 0x726   : > { %v1610_v47 = vpop.xlane.xlu0 %1609 }
 0x727   : > { %5255 = vrcp.f32 %v1610_v47 }
 0x72a   : > { %v1607_v49 = vpop.xlane.xlu0 %1606 }
 0x72b   : > { %5257 = vrcp.f32 %v1607_v49 }
 0x72e   : > { %v1620_v50 = vpop.permute.xlu0 %1619 }
 0x72f   : > { %5014 = vmatprep.subr.mxu1 %v1620_v50 }
 0x730   : > { %5015 = vmatpush3.msra.mxu1 %v1620_v50 }
 0x731   : > { %5016 = vmatprep.subr.mxu1 %v1618_v25 }
 0x732   : > { %5017 = vmatpush3.msra.mxu1 %v1618_v25  ;;  %v1705_v56 = vpop.permute.xlu0 %1704 }
 0x733   : > { %5021 = vmatprep.subr.msk.mxu1 %vm972_vm1, %v1711_v52 }
 0x734   : > { %v5256_v48 = vpop.eup %5255 }
 0x735   : > { %v1614_v59 = vmul.f32 %v5256_v48, %v5252_v30 }
 0x736   : > { %v1707_v57 = vpop.permute.xlu0 %1706 }
 0x738   : > { %v5258_v54 = vpop.eup %5257 }
 0x739   : > { %v1612_v58 = vmul.f32 %v5258_v54, %v5254_v45 }
 0x73a   : > { %v1907_v61 = vpop.permute.xlu0 %1906 }
 0x73b   : > { %5018 = vmatprep.mubr.msk.f32.mxu1 %vm972_vm1, %v1612_v58 }
 0x73c   : > { %5019 = vmatmul.mubr.msk.f32.vlgmr.msra.gmra.mxu1 %vm972_vm1, %v1614_v59 }
 0x73d   : > { %5022 = vmatpush3.xpose.msk.msra.mxu1 %vm972_vm1, %v1711_v52  ;;  %5025 = vmatprep.mubr.msk.f32.mxu1 %vm972_vm1, %v1705_v56 }
 0x73e   : > { %5023 = vmatprep.subr.msk.mxu1 %vm972_vm1, %v1709_v17  ;;  %v1909_v4 = vpop.permute.xlu0 %1908 }
 0x741   : > { %5024 = vmatpush3.xpose.msk.msra.mxu1 %vm972_vm1, %v1709_v17 }
 0x742   : > { %5035 = vmatprep.subr.msk.mxu1 %vm972_vm1, %v1913_v51  ;;  %v2109_v19 = vpop.permute.xlu0 %2108 }
 0x744   : > { %5026 = vmatmul.mubr.msk.f32.vlgmr.msra.gmra.mxu1 %vm972_vm1, %v1707_v57 }
 0x745   : > { %5036 = vmatpush3.xpose.msk.msra.mxu1 %vm972_vm1, %v1913_v51  ;;  %5039 = vmatprep.mubr.msk.f32.mxu1 %vm972_vm1, %v1907_v61 }
 0x746   : > { %5037 = vmatprep.subr.msk.mxu1 %vm972_vm1, %v1911_v2 }
 0x749   : > { %5038 = vmatpush3.xpose.msk.msra.mxu1 %vm972_vm1, %v1911_v2 }
 0x74a   : > { %5049 = vmatprep.subr.msk.mxu1 %vm972_vm1, %v2115_v7 }
 0x74c   : > { %5040 = vmatmul.mubr.msk.f32.vlgmr.msra.gmra.mxu1 %vm972_vm1, %v1909_v4 }
 0x74d   : > { %5050 = vmatpush3.xpose.msk.msra.mxu1 %vm972_vm1, %v2115_v7  ;;  %5053 = vmatprep.mubr.msk.f32.mxu1 %vm972_vm1, %v2109_v19 }
 0x74e   : > { %5051 = vmatprep.subr.msk.mxu1 %vm972_vm1, %v2113_v62 }
 0x751   : > { %5052 = vmatpush3.xpose.msk.msra.mxu1 %vm972_vm1, %v2113_v62 }
 0x754   : > { %5054 = vmatmul.mubr.msk.f32.vlgmr.msra.gmra.mxu1 %vm972_vm1, %v2111_v9 }
 0x7fc   : > { %v6099_v12 = vpop.f32.mrf.mxu1 }
 0x7fe   : > { %v6101_v24 = vpop.f32.mrf.mxu1 }
 0x7ff   : > { %v5204_v26 = vpack.i.bf16 %v6099_v12, %v6101_v24 }
 0x804   : > { %v6105_v20 = vpop.f32.mrf.mxu1 }
 0x805   : > { %v6168_v2 = vmul.f32 0.25, %v6105_v20 }
 0x806   : > { %v6107_v1 = vpop.f32.mrf.mxu1 }
 0x807   : > { %v1800_v7 = vsel %vm972_vm1, %v6168_v2, -inf }
 0x80c   : > { %v6109_v27 = vpop.f32.mrf.mxu1 }
 0x80e   : > { %v6111_v28 = vpop.f32.mrf.mxu1 }
 0x814   : > { %v5055_v31 = vpop.f32.mrf.mxu1 }
 0x815   : > { %v2200_v32 = vmul.f32 0.25, %v5055_v31 }
 0x816   : > { %v2190_v33 = vpop.f32.mrf.mxu1 }
 0x817   : > { %v2199_v34 = vmul.f32 0.25, %v2190_v33  ;;  %v2204_v21 = vsel %vm972_vm1, %v2200_v32, -inf }
 0x818   : > { %2205 = vmax.xlane.f32.xlu1 %v2204_v21  ;;  %v1795_v21 = vmul.f32 0.25, %v6107_v1 }
 0x819   : > { %v2201_v0 = vsel %vm972_vm1, %v2199_v34, -inf }
 0x81a   : > { %2202 = vmax.xlane.f32.xlu0 %v2201_v0  ;;  %v1997_v0 = vmul.f32 0.25, %v6111_v28 }
 0x829   : > { %2223 = vrot.lane.b32.xlu1 %v6017_v63, %s7618_s19 }
 0x82d   : > { %2316 = vrot.lane.b32.xlu1 %v5989_v13, %s7619_s25 }
 0x831   : > { %2314 = vrot.lane.b32.xlu1 %v5996_v18, %s7619_s25 }
 0x835   : > { %2518 = vrot.lane.b32.xlu1 %v5989_v13, %s7620_s23 }
 0x839   : > { %2516 = vrot.lane.b32.xlu1 %v5996_v18, %s7620_s23 }
 0x83d   : > { %2514 = vrot.lane.b32.xlu1 %v6008_v46, %s7620_s23 }
 0x8a1   : > { %v2206_v5 = vpop.xlane.xlu1 %2205 }
 0x8a2   : > { %v2208_v53 = vsub.f32 %v2200_v32, %v2206_v5  ;;  %v1797_v5 = vsel %vm972_vm1, %v1795_v21, -inf }
 0x8a3   : > { %v2203_v35 = vpop.xlane.xlu0 %2202 }
 0x8a4   : > { %v2211_v36 = vmul.f32 1.442695, %v2208_v53  ;;  %v2207_v37 = vsub.f32 %v2199_v34, %v2203_v35  ;;  %v1998_v53 = vmul.f32 0.25, %v6109_v27  ;;  %v1999_v35 = vsel %vm972_vm1, %v1997_v0, -inf }
 0x8a5   : > { %v2224_v6 = vpop.permute.xlu1 %2223 }
 0x8a6   : > { %5259 = vpow2.f32 %v2211_v36  ;;  %v2209_v38 = vmul.f32 1.442695, %v2207_v37  ;;  %v2002_v37 = vsel %vm972_vm1, %v1998_v53, -inf }
 0x8a8   : > { %5261 = vpow2.f32 %v2209_v38 }
 0x8a9   : > { %v2317_v11 = vpop.permute.xlu1 %2316 }
 0x8ad   : > { %v2315_v55 = vpop.permute.xlu1 %2314 }
 0x8b1   : > { %v2519_v14 = vpop.permute.xlu1 %2518 }
 0x8b3   : > { %v5260_v39 = vpop.eup %5259 }
 0x8b4   : > { %v2216_v8 = vsel %vm972_vm1, %v5260_v39, 0.0 }
 0x8b5   : > { %v5262_v3 = vpop.eup %5261  ;;  %2217 = vadd.xlane.f32.xlu0 %v2216_v8  ;;  %v2517_v25 = vpop.permute.xlu1 %2516 }
 0x8b6   : > { %v2213_v40 = vsel %vm972_vm1, %v5262_v3, 0.0 }
 0x8b9   : > { %2214 = vadd.xlane.f32.xlu0 %v2213_v40  ;;  %v2515_v49 = vpop.permute.xlu1 %2514 }
 0x8cf   : > { %2225 = vrot.lane.b32.xlu0 %v6015_v16, %s7618_s19 }
 0x8d3   : > { %2310 = vrot.lane.b32.xlu0 %v5994_v60, %s7619_s25 }
 0x8d7   : > { %2312 = vrot.lane.b32.xlu0 %v6008_v46, %s7619_s25 }
 0x8db   : > { %2512 = vrot.lane.b32.xlu0 %v5994_v60, %s7620_s23 }
 0x93e   : > { %v2218_v42 = vpop.xlane.xlu0 %2217 }
 0x93f   : > { %5263 = vrcp.f32 %v2218_v42 }
 0x942   : > { %v2215_v43 = vpop.xlane.xlu0 %2214 }
 0x943   : > { %5265 = vrcp.f32 %v2215_v43 }
 0x946   : > { %v2226_v10 = vpop.permute.xlu0 %2225 }
 0x947   : > { %5056 = vmatprep.subr.mxu1 %v2226_v10 }
 0x948   : > { %5057 = vmatpush3.msra.mxu1 %v2226_v10 }
 0x949   : > { %5058 = vmatprep.subr.mxu1 %v2224_v6 }
 0x94a   : > { %5059 = vmatpush3.msra.mxu1 %v2224_v6  ;;  %v2311_v41 = vpop.permute.xlu0 %2310 }
 0x94b   : > { %5063 = vmatprep.subr.msk.mxu1 %vm972_vm1, %v2317_v11 }
 0x94c   : > { %v5264_v23 = vpop.eup %5263 }
 0x94d   : > { %v2222_v44 = vmul.f32 %v5264_v23, %v5260_v39 }
 0x94e   : > { %v2313_v45 = vpop.permute.xlu0 %2312 }
 0x950   : > { %v5266_v29 = vpop.eup %5265 }
 0x951   : > { %v2220_v30 = vmul.f32 %v5266_v29, %v5262_v3 }
 0x952   : > { %v2513_v47 = vpop.permute.xlu0 %2512 }
 0x953   : > { %5060 = vmatprep.mubr.msk.f32.mxu1 %vm972_vm1, %v2220_v30 }
 0x954   : > { %5061 = vmatmul.mubr.msk.f32.vlgmr.msra.gmra.mxu1 %vm972_vm1, %v2222_v44 }
 0x955   : > { %5064 = vmatpush3.xpose.msk.msra.mxu1 %vm972_vm1, %v2317_v11  ;;  %5067 = vmatprep.mubr.msk.f32.mxu1 %vm972_vm1, %v2311_v41 }
 0x956   : > { %5065 = vmatprep.subr.msk.mxu1 %vm972_vm1, %v2315_v55 }
 0x959   : > { %5066 = vmatpush3.xpose.msk.msra.mxu1 %vm972_vm1, %v2315_v55 }
 0x95a   : > { %5077 = vmatprep.subr.msk.mxu1 %vm972_vm1, %v2519_v14 }
 0x95c   : > { %5068 = vmatmul.mubr.msk.f32.vlgmr.msra.gmra.mxu1 %vm972_vm1, %v2313_v45 }
 0x95d   : > { %5078 = vmatpush3.xpose.msk.msra.mxu1 %vm972_vm1, %v2519_v14  ;;  %5081 = vmatprep.mubr.msk.f32.mxu1 %vm972_vm1, %v2513_v47 }
 0x95e   : > { %5079 = vmatprep.subr.msk.mxu1 %vm972_vm1, %v2517_v25 }
 0x961   : > { %5080 = vmatpush3.xpose.msk.msra.mxu1 %vm972_vm1, %v2517_v25 }
 0x964   : > { %5082 = vmatmul.mubr.msk.f32.vlgmr.msra.gmra.mxu1 %vm972_vm1, %v2515_v49 }
 0xa14   : > { %v6151_v50 = vpop.f32.mrf.mxu1 }
 0xa16   : > { %v6153_v52 = vpop.f32.mrf.mxu1 }
 0xa17   : > { %v5219_v56 = vpack.i.bf16 %v6151_v50, %v6153_v52  ;;  %v3000_v50 = vld [vmem:[%s7581_s10 + $0x70] sm:$0xff]  ;;  %v2999_v52 = vld [vmem:[%s7581_s10 + $0x68] sm:$0xff] }
 0xa1c   : > { %v5069_v17 = vpop.f32.mrf.mxu1 }
 0xa1d   : > { %v6170_v4 = vmul.f32 0.25, %v5069_v17 }
 0xa1e   : > { %v2392_v48 = vpop.f32.mrf.mxu1 }
 0xa1f   : > { %v2406_v19 = vsel %vm972_vm1, %v6170_v4, -inf  ;;  %v2401_v36 = vmul.f32 0.25, %v2392_v48 }
 0xa21   : > { %v2403_v38 = vsel %vm972_vm1, %v2401_v36, -inf }
 0xa24   : > { %v5083_v54 = vpop.f32.mrf.mxu1 }
 0xa25   : > { %v2604_v58 = vmul.f32 0.25, %v5083_v54 }
 0xa26   : > { %v2594_v57 = vpop.f32.mrf.mxu1 }
 0xa27   : > { %v2603_v59 = vmul.f32 0.25, %v2594_v57  ;;  %v2608_v51 = vsel %vm972_vm1, %v2604_v58, -inf }
 0xa28   : > { %2609 = vmax.xlane.f32.xlu1 %v2608_v51 }
 0xa29   : > { %v2605_v61 = vsel %vm972_vm1, %v2603_v59, -inf }
 0xa2a   : > { %2606 = vmax.xlane.f32.xlu0 %v2605_v61 }
 0xa39   : > { %2627 = vrot.lane.b32.xlu1 %v6017_v63, %s7620_s23 }
 0xa3d   : > { %2720 = vrot.lane.b32.xlu1 %v5989_v13, %s7621_s2 }
 0xa41   : > { %2718 = vrot.lane.b32.xlu1 %v5996_v18, %s7621_s2 }
 0xa45   : > { %2716 = vrot.lane.b32.xlu1 %v6008_v46, %s7621_s2 }
 0xa69   : > { %1801 = vmax.xlane.f32.xlu1 %v1800_v7 }
 0xa6d   : > { %2407 = vmax.xlane.f32.xlu1 %v2406_v19 }
 0xab1   : > { %v2610_v13 = vpop.xlane.xlu1 %2609 }
 0xab2   : > { %v2612_v62 = vsub.f32 %v2604_v58, %v2610_v13 }
 0xab3   : > { %v2607_v9 = vpop.xlane.xlu0 %2606 }
 0xab4   : > { %v2615_v18 = vmul.f32 1.442695, %v2612_v62  ;;  %v2611_v31 = vsub.f32 %v2603_v59, %v2607_v9 }
 0xab5   : > { %v2628_v28 = vpop.permute.xlu1 %2627 }
 0xab6   : > { %5267 = vpow2.f32 %v2615_v18  ;;  %v2613_v46 = vmul.f32 1.442695, %v2611_v31 }
 0xab8   : > { %5269 = vpow2.f32 %v2613_v46 }
 0xab9   : > { %v2721_v27 = vpop.permute.xlu1 %2720 }
 0xabd   : > { %v2719_v6 = vpop.permute.xlu1 %2718 }
 0xac1   : > { %v2717_v10 = vpop.permute.xlu1 %2716 }
 0xac3   : > { %v5268_v20 = vpop.eup %5267 }
 0xac4   : > { %v2620_v32 = vsel %vm972_vm1, %v5268_v20, 0.0 }
 0xac5   : > { %v5270_v33 = vpop.eup %5269  ;;  %2621 = vadd.xlane.f32.xlu0 %v2620_v32 }
 0xac6   : > { %v2617_v34 = vsel %vm972_vm1, %v5270_v33, 0.0 }
 0xac9   : > { %2618 = vadd.xlane.f32.xlu0 %v2617_v34 }
 0xadf   : > { %2629 = vrot.lane.b32.xlu0 %v6015_v16, %s7620_s23 }
 0xae3   : > { %2714 = vrot.lane.b32.xlu0 %v5994_v60, %s7621_s2 }
 0xaf2   : > { %v1802_v29 = vpop.xlane.xlu1 %1801 }
 0xaf3   : > { %v1804_v41 = vsub.f32 %v6168_v2, %v1802_v29 }
 0xaf5   : > { %v1807_v44 = vmul.f32 1.442695, %v1804_v41 }
 0xaf6   : > { %v2408_v14 = vpop.xlane.xlu1 %2407 }
 0xaf7   : > { %v2410_v17 = vsub.f32 %v6170_v4, %v2408_v14 }
 0xaf9   : > { %v2413_v51 = vmul.f32 1.442695, %v2410_v17 }
 0xb02   : > { %1798 = vmax.xlane.f32.xlu0 %v1797_v5 }
 0xb06   : > { %2000 = vmax.xlane.f32.xlu0 %v1999_v35 }
 0xb0a   : > { %2003 = vmax.xlane.f32.xlu0 %v2002_v37 }
 0xb0e   : > { %2404 = vmax.xlane.f32.xlu0 %v2403_v38 }
 0xb4e   : > { %v2622_v60 = vpop.xlane.xlu0 %2621 }
 0xb4f   : > { %5271 = vrcp.f32 %v2622_v60 }
 0xb52   : > { %v2619_v1 = vpop.xlane.xlu0 %2618 }
 0xb53   : > { %5273 = vrcp.f32 %v2619_v1 }
 0xb54   : > { %5275 = vpow2.f32 %v1807_v44 }
 0xb56   : > { %v2630_v39 = vpop.permute.xlu0 %2629 }
 0xb57   : > { %5084 = vmatprep.subr.mxu1 %v2630_v39 }
 0xb58   : > { %5085 = vmatpush3.msra.mxu1 %v2630_v39 }
 0xb59   : > { %5086 = vmatprep.subr.mxu1 %v2628_v28 }
 0xb5a   : > { %5087 = vmatpush3.msra.mxu1 %v2628_v28  ;;  %v2715_v43 = vpop.permute.xlu0 %2714 }
 0xb5b   : > { %5091 = vmatprep.subr.msk.mxu1 %vm972_vm1, %v2721_v27 }
 0xb5c   : > { %v5272_v8 = vpop.eup %5271 }
 0xb5d   : > { %v2626_v42 = vmul.f32 %v5272_v8, %v5268_v20 }
 0xb60   : > { %v5274_v3 = vpop.eup %5273 }
 0xb61   : > { %v2624_v40 = vmul.f32 %v5274_v3, %v5270_v33  ;;  %v6206_v9 = vpop.eup %5275 }
 0xb62   : > { %v1812_v46 = vsel %vm972_vm1, %v6206_v9, 0.0 }
 0xb63   : > { %5088 = vmatprep.mubr.msk.f32.mxu1 %vm972_vm1, %v2624_v40 }
 0xb64   : > { %5089 = vmatmul.mubr.msk.f32.vlgmr.msra.gmra.mxu1 %vm972_vm1, %v2626_v42 }
 0xb65   : > { %5092 = vmatpush3.xpose.msk.msra.mxu1 %vm972_vm1, %v2721_v27  ;;  %5095 = vmatprep.mubr.msk.f32.mxu1 %vm972_vm1, %v2715_v43 }
 0xb66   : > { %5093 = vmatprep.subr.msk.mxu1 %vm972_vm1, %v2719_v6 }
 0xb69   : > { %5094 = vmatpush3.xpose.msk.msra.mxu1 %vm972_vm1, %v2719_v6 }
 0xb6c   : > { %5096 = vmatmul.mubr.msk.f32.vlgmr.msra.gmra.mxu1 %vm972_vm1, %v2717_v10 }
 0xb8b   : > { %v1799_v11 = vpop.xlane.xlu0 %1798 }
 0xb8c   : > { %v1803_v30 = vsub.f32 %v1795_v21, %v1799_v11 }
 0xb8e   : > { %v1805_v47 = vmul.f32 1.442695, %v1803_v30 }
 0xb8f   : > { %v2001_v23 = vpop.xlane.xlu0 %2000 }
 0xb90   : > { %v2005_v25 = vsub.f32 %v1997_v0, %v2001_v23  ;;  %5277 = vpow2.f32 %v1805_v47 }
 0xb92   : > { %v2007_v58 = vmul.f32 1.442695, %v2005_v25 }
 0xb93   : > { %v2004_v55 = vpop.xlane.xlu0 %2003 }
 0xb94   : > { %v2006_v45 = vsub.f32 %v1998_v53, %v2004_v55 }
 0xb96   : > { %v2009_v48 = vmul.f32 1.442695, %v2006_v45 }
 0xb97   : > { %v2405_v49 = vpop.xlane.xlu0 %2404 }
 0xb98   : > { %v2409_v57 = vsub.f32 %v2401_v36, %v2405_v49  ;;  %5279 = vpow2.f32 %v2009_v48 }
 0xb99   : > { %5281 = vpow2.f32 %v2007_v58 }
 0xb9a   : > { %v2411_v2 = vmul.f32 1.442695, %v2409_v57  ;;  %5283 = vpow2.f32 %v2413_v51 }
 0xb9c   : > { %5285 = vpow2.f32 %v2411_v2 }
 0xb9d   : > { %v5278_v31 = vpop.eup %5277 }
 0xb9e   : > { %v1809_v32 = vsel %vm972_vm1, %v5278_v31, 0.0 }
 0xba5   : > { %v6211_v20 = vpop.eup %5279 }
 0xba6   : > { %v5282_v33 = vpop.eup %5281  ;;  %v2014_v34 = vsel %vm972_vm1, %v6211_v20, 0.0 }
 0xba7   : > { %v6216_v21 = vpop.eup %5283  ;;  %v2011_v0 = vsel %vm972_vm1, %v5282_v33, 0.0 }
 0xba8   : > { %v2418_v53 = vsel %vm972_vm1, %v6216_v21, 0.0 }
 0xba9   : > { %v6219_v5 = vpop.eup %5285 }
 0xbaa   : > { %v2415_v35 = vsel %vm972_vm1, %v6219_v5, 0.0 }
 0xc24   : > { %v6199_v54 = vpop.f32.mrf.mxu1 }
 0xc26   : > { %v6201_v59 = vpop.f32.mrf.mxu1 }
 0xc27   : > { %v5229_v61 = vpack.i.bf16 %v6199_v54, %v6201_v59  ;;  %v2997_v54 = vld [vmem:[%s7581_s10 + $0x58] sm:$0xff]  ;;  %v2996_v59 = vld [vmem:[%s7581_s10 + $0x50] sm:$0xff] }
 0xc2c   : > { %v5097_v7 = vpop.f32.mrf.mxu1 }
 0xc2d   : > { %v2806_v19 = vmul.f32 0.25, %v5097_v7 }
 0xc2e   : > { %v2796_v4 = vpop.f32.mrf.mxu1 }
 0xc2f   : > { %v2805_v13 = vmul.f32 0.25, %v2796_v4  ;;  %v2810_v62 = vsel %vm972_vm1, %v2806_v19, -inf }
 0xc30   : > { %2811 = vmax.xlane.f32.xlu1 %v2810_v62 }
 0xc31   : > { %v2807_v18 = vsel %vm972_vm1, %v2805_v13, -inf }
 0xc32   : > { %2808 = vmax.xlane.f32.xlu0 %v2807_v18 }
 0xc34   : > { %1813 = vadd.xlane.f32.xlu1 %v1812_v46 }
 0xc36   : > { %1810 = vadd.xlane.f32.xlu0 %v1809_v32 }
 0xc38   : > { %2015 = vadd.xlane.f32.xlu1 %v2014_v34 }
 0xc3a   : > { %2012 = vadd.xlane.f32.xlu0 %v2011_v0  ;;  %v2994_v0 = vld [vmem:[%s7581_s10 + $0x40] sm:$0xff] }
 0xc3c   : > { %2419 = vadd.xlane.f32.xlu1 %v2418_v53  ;;  %v2992_v53 = vld [vmem:[%s7581_s10 + $0x30] sm:$0xff] }
 0xc3e   : > { %2416 = vadd.xlane.f32.xlu0 %v2415_v35  ;;  %v2991_v35 = vld [vmem:[%s7581_s10 + $0x28] sm:$0xff] }
 0xc4d   : > { %1819 = vrot.lane.b32.xlu1 %v6017_v63, %s5390_s1 }
 0xc51   : > { %2023 = vrot.lane.b32.xlu1 %v6015_v16, %s7617_s22 }
 0xc54   : > { %1821 = vrot.lane.b32.xlu0 %v6015_v16, %s5390_s1 }
 0xc55   : > { %2021 = vrot.lane.b32.xlu1 %v6017_v63, %s7617_s22 }
 0xc58   : > { %2427 = vrot.lane.b32.xlu0 %v6015_v16, %s7619_s25 }
 0xc59   : > { %2425 = vrot.lane.b32.xlu1 %v6017_v63, %s7619_s25 }
 0xcb9   : > { %v2812_v36 = vpop.xlane.xlu1 %2811 }
 0xcba   : > { %v2814_v37 = vsub.f32 %v2806_v19, %v2812_v36  ;;  %v2990_v36 = vld [vmem:[%s7581_s10 + $0x20] sm:$0xff] }
 0xcbb   : > { %v2809_v38 = vpop.xlane.xlu0 %2808 }
 0xcbc   : > { %v2817_v60 = vmul.f32 1.442695, %v2814_v37  ;;  %v2813_v1 = vsub.f32 %v2805_v13, %v2809_v38  ;;  %v2989_v37 = vld [vmem:[%s7581_s10 + $0x18] sm:$0xff]  ;;  %v2988_v38 = vld [vmem:[%s7581_s10 + $0x10] sm:$0xff] }
 0xcbd   : > { %v1814_v28 = vpop.xlane.xlu1 %1813 }
 0xcbe   : > { %5287 = vpow2.f32 %v2817_v60  ;;  %v2815_v39 = vmul.f32 1.442695, %v2813_v1  ;;  %v2987_v60 = vld [vmem:[%s7581_s10 + $0x8] sm:$0xff]  ;;  %v2986_v1 = vld [vmem:[%s7581_s10] sm:$0xff] }
 0xcbf   : > { %5289 = vrcp.f32 %v1814_v28  ;;  %v1811_v27 = vpop.xlane.xlu0 %1810 }
 0xcc0   : > { %5291 = vpow2.f32 %v2815_v39 }
 0xcc1   : > { %5293 = vrcp.f32 %v1811_v27  ;;  %v2016_v8 = vpop.xlane.xlu1 %2015 }
 0xcc2   : > { %5295 = vrcp.f32 %v2016_v8 }
 0xcc3   : > { %v2013_v3 = vpop.xlane.xlu0 %2012 }
 0xcc4   : > { %5297 = vrcp.f32 %v2013_v3 }
 0xcc5   : > { %v2420_v40 = vpop.xlane.xlu1 %2419 }
 0xcc6   : > { %5299 = vrcp.f32 %v2420_v40 }
 0xcc7   : > { %v2417_v42 = vpop.xlane.xlu0 %2416 }
 0xcc8   : > { %5301 = vrcp.f32 %v2417_v42 }
 0xcc9   : > { %v1820_v43 = vpop.permute.xlu1 %1819 }
 0xccb   : > { %v5288_v6 = vpop.eup %5287  ;;  %v1822_v10 = vpop.permute.xlu0 %1821 }
 0xccc   : > { %v5290_v11 = vpop.eup %5289  ;;  %5028 = vmatprep.subr.mxu0 %v1822_v10  ;;  %v2822_v23 = vsel %vm972_vm1, %v5288_v6, 0.0 }
 0xccd   : > { %v5292_v29 = vpop.eup %5291  ;;  %2823 = vadd.xlane.f32.xlu1 %v2822_v23  ;;  %v2024_v41 = vpop.permute.xlu1 %2023  ;;  %5029 = vmatpush3.msra.mxu0 %v1822_v10  ;;  %v1818_v14 = vmul.f32 %v5290_v11, %v6206_v9 }
 0xcce   : > { %v5294_v55 = vpop.eup %5293  ;;  %5030 = vmatprep.subr.mxu0 %v1820_v43  ;;  %v2819_v30 = vsel %vm972_vm1, %v5292_v29, 0.0 }
 0xccf   : > { %2820 = vadd.xlane.f32.xlu0 %v2819_v30  ;;  %5031 = vmatpush3.msra.mxu0 %v1820_v43  ;;  %v1816_v44 = vmul.f32 %v5294_v55, %v5278_v31  ;;  %v5296_v45 = vpop.eup %5295  ;;  %v2428_v57 = vpop.permute.xlu0 %2427 }
 0xcd0   : > { %5042 = vmatprep.subr.mxu0 %v2024_v41  ;;  %v2020_v48 = vmul.f32 %v5296_v45, %v6211_v20 }
 0xcd1   : > { %v5298_v47 = vpop.eup %5297  ;;  %5032 = vmatprep.mubr.msk.f32.mxu0 %vm972_vm1, %v1816_v44  ;;  %v2022_v25 = vpop.permute.xlu1 %2021 }
 0xcd2   : > { %5033 = vmatmul.mubr.msk.f32.vlgmr.msra.gmra.mxu0 %vm972_vm1, %v1818_v14  ;;  %v2018_v49 = vmul.f32 %v5298_v47, %v5282_v33 }
 0xcd3   : > { %5043 = vmatpush3.msra.mxu0 %v2024_v41  ;;  %v5300_v17 = vpop.eup %5299 }
 0xcd4   : > { %5044 = vmatprep.subr.mxu0 %v2022_v25  ;;  %5046 = vmatprep.mubr.msk.f32.mxu0 %vm972_vm1, %v2018_v49  ;;  %v2424_v7 = vmul.f32 %v5300_v17, %v6216_v21  ;;  %v3001_v21 = vld [vmem:[%s7581_s10 + $0x78] sm:$0xff] }
 0xcd5   : > { %v5302_v58 = vpop.eup %5301  ;;  %5045 = vmatpush3.msra.mxu0 %v2022_v25  ;;  %v2426_v51 = vpop.permute.xlu1 %2425 }
 0xcd6   : > { %5070 = vmatprep.subr.mxu0 %v2428_v57  ;;  %5047 = vmatmul.mubr.msk.f32.vlgmr.msra.gmra.mxu0 %vm972_vm1, %v2020_v48  ;;  %v2422_v2 = vmul.f32 %v5302_v58, %v6219_v5  ;;  %v2993_v5 = vld [vmem:[%s7581_s10 + $0x38] sm:$0xff] }
 0xcd7   : > { %5071 = vmatpush3.msra.mxu0 %v2428_v57 }
 0xcd8   : > { %5072 = vmatprep.subr.mxu0 %v2426_v51  ;;  %5074 = vmatprep.mubr.msk.f32.mxu0 %vm972_vm1, %v2422_v2 }
 0xcd9   : > { %5073 = vmatpush3.msra.mxu0 %v2426_v51 }
 0xcda   : > { %5075 = vmatmul.mubr.msk.f32.vlgmr.msra.gmra.mxu0 %vm972_vm1, %v2424_v7 }
 0xcde   : > { %2829 = vrot.lane.b32.xlu1 %v6017_v63, %s7621_s2 }
 0xce5   : > { %2831 = vrot.lane.b32.xlu0 %v6015_v16, %s7621_s2 }
 0xce9   : > { %5205 = vrot.lane.b32.xlu0 %v5204_v26, %s7621_s2 }
 0xd56   : > { %v2824_v19 = vpop.xlane.xlu1 %2823 }
 0xd57   : > { %5303 = vrcp.f32 %v2824_v19 }
 0xd58   : > { %v2821_v4 = vpop.xlane.xlu0 %2820 }
 0xd59   : > { %5305 = vrcp.f32 %v2821_v4 }
 0xd5a   : > { %v2830_v62 = vpop.permute.xlu1 %2829 }
 0xd5c   : > { %v2832_v13 = vpop.permute.xlu0 %2831 }
 0xd5d   : > { %5098 = vmatprep.subr.mxu0 %v2832_v13 }
 0xd5e   : > { %5099 = vmatpush3.msra.mxu0 %v2832_v13 }
 0xd5f   : > { %5100 = vmatprep.subr.mxu0 %v2830_v62 }
 0xd60   : > { %5101 = vmatpush3.msra.mxu0 %v2830_v62  ;;  %v5206_v8 = vpop.permute.xlu0 %5205 }
 0xd61   : > { %5105 = vmatprep.subr.mxu0 %v3001_v21  ;;  %v5208_v42 = vunpack.i.h.bf16 %v5206_v8  ;;  %v5207_v43 = vunpack.i.l.bf16 %v5206_v8 }
 0xd63   : > { %v2973_v55 = vsel %vm972_vm1, %v6043_v22, %v5208_v42  ;;  %v2972_v30 = vsel %vm972_vm1, %v6045_v15, %v5207_v43 }
 0xd64   : > { %v5304_v9 = vpop.eup %5303 }
 0xd65   : > { %v2828_v31 = vmul.f32 %v5304_v9, %v5288_v6 }
 0xd66   : > { %v5306_v63 = vpop.eup %5305 }
 0xd67   : > { %v2826_v18 = vmul.f32 %v5306_v63, %v5292_v29 }
 0xd69   : > { %5102 = vmatprep.mubr.msk.f32.mxu0 %vm972_vm1, %v2826_v18 }
 0xd6a   : > { %5103 = vmatmul.mubr.msk.f32.vlgmr.msra.gmra.mxu0 %vm972_vm1, %v2828_v31  ;;  %v4592_v31 = vld [vmem:[%s7582_s11] ss:$0 sm:$0xff] }
 0xd6b   : > { %5106 = vmatpush3.msra.mxu0 %v3001_v21  ;;  %v3249_v21 = vld [vmem:[%s7585_s14 + $0x3d8] sm:$0xff] }
 0xd6c   : > { %5107 = vmatprep.subr.mxu0 %v3000_v50 }
 0xd6d   : > { %5108 = vmatpush3.msra.mxu0 %v3000_v50  ;;  %v3246_v50 = vld [vmem:[%s7585_s14 + $0x3c0] sm:$0xff] }
 0xd6e   : > { %5109 = vmatprep.subr.mxu0 %v2999_v52 }
 0xd6f   : > { %5110 = vmatpush3.msra.mxu0 %v2999_v52  ;;  %v3248_v52 = vld [vmem:[%s7585_s14 + $0x3d0] sm:$0xff] }
 0xd92   : > { %v5034_v16 = vpop.f32.mrf.mxu0 }
 0xd94   : > { %v1897_v12 = vpop.f32.mrf.mxu0 }
 0xd95   : > { %v5209_v24 = vpack.i.bf16 %v5034_v16, %v1897_v12 }
 0xd96   : > { %v5048_v26 = vpop.f32.mrf.mxu0 }
 0xd97   : > { %5210 = vrot.lane.b32.xlu1 %v5209_v24, %s7620_s23 }
 0xd98   : > { %v2099_v46 = vpop.f32.mrf.mxu0 }
 0xd99   : > { %v5214_v20 = vpack.i.bf16 %v5048_v26, %v2099_v46  ;;  %v5375_v26 = vld [vmem:[%s5524_s24 + $0x8] sm:$0xff] }
 0xd9a   : > { %v5076_v32 = vpop.f32.mrf.mxu0 }
 0xd9b   : > { %5220 = vrot.lane.b32.xlu1 %v5219_v56, %s7618_s19  ;;  %5215 = vrot.lane.b32.xlu0 %v5214_v20, %s7619_s25  ;;  %v2998_v56 = vld [vmem:[%s7581_s10 + $0x60] sm:$0xff] }
 0xd9c   : > { %v2503_v33 = vpop.f32.mrf.mxu0  ;;  %5111 = vmatprep.subr.mxu0 %v2998_v56 }
 0xd9d   : > { %v5224_v34 = vpack.i.bf16 %v5076_v32, %v2503_v33  ;;  %5112 = vmatpush3.msra.mxu0 %v2998_v56  ;;  %v5376_v32 = vld [vmem:[%s5524_s24] sm:$0xff]  ;;  %v3239_v56 = vld [vmem:[%s7585_s14 + $0x388] sm:$0xff] }
 0xd9e   : > { %5113 = vmatprep.subr.mxu0 %v2997_v54 }
 0xd9f   : > { %5230 = vrot.lane.b32.xlu1 %v5229_v61, %s5390_s1  ;;  %5225 = vrot.lane.b32.xlu0 %v5224_v34, %s7617_s22  ;;  %v2995_v61 = vld [vmem:[%s7581_s10 + $0x48] sm:$0xff]  ;;  %s7639_s1 = sshll.u32 %s7643_s28, 4 }
 0xda0   : > { %5114 = vmatpush3.msra.mxu0 %v2997_v54  ;;  %v3247_v34 = vld [vmem:[%s7585_s14 + $0x3c8] sm:$0xff]  ;;  %v3241_v54 = vld [vmem:[%s7585_s14 + $0x398] sm:$0xff]  ;;  %s575_s2 = scalar_lea.vmem %s7589_s18, %s7639_s1 }
 0xda1   : > { %5115 = vmatprep.subr.mxu0 %v2996_v59  ;;  %3296 = vmatprep.subr.mxu1 %v3247_v34  ;;  %v3142_v34 = vld [vmem:[%s7585_s14 + $0x80] sm:$0xff] }
 0xda2   : > { %5116 = vmatpush3.msra.mxu0 %v2996_v59  ;;  %3297 = vmatpush1.msra.mxu1 %v3246_v50  ;;  %v3238_v59 = vld [vmem:[%s7585_s14 + $0x380] sm:$0xff]  ;;  %v3135_v50 = vld [vmem:[%s7585_s14 + $0x48] sm:$0xff] }
 0xda3   : > { %5117 = vmatprep.subr.mxu0 %v2995_v61  ;;  %3298 = vmatprep.subr.mxu1 %v3239_v56  ;;  %v3134_v56 = vld [vmem:[%s7585_s14 + $0x40] sm:$0xff] }
 0xda4   : > { %5118 = vmatpush3.msra.mxu0 %v2995_v61  ;;  %v3240_v61 = vld [vmem:[%s7585_s14 + $0x390] sm:$0xff]  ;;  %3299 = vmatpush1.msra.mxu1 %v3238_v59  ;;  %v3127_v59 = vld [vmem:[%s7585_s14 + $0x8] sm:$0xff] }
 0xda5   : > { %5119 = vmatprep.subr.mxu0 %v2994_v0 }
 0xda6   : > { %5120 = vmatpush3.msra.mxu0 %v2994_v0  ;;  %v3231_v0 = vld [vmem:[%s7585_s14 + $0x348] sm:$0xff] }
 0xda7   : > { %5121 = vmatprep.subr.mxu0 %v2993_v5  ;;  %3300 = vmatprep.subr.mxu1 %v3231_v0  ;;  %v3126_v0 = vld [vmem:[%s7585_s14] sm:$0xff] }
 0xda8   : > { %5122 = vmatpush3.msra.mxu0 %v2993_v5  ;;  %v3233_v5 = vld [vmem:[%s7585_s14 + $0x358] sm:$0xff] }
 0xda9   : > { %5123 = vmatprep.subr.mxu0 %v2992_v53 }
 0xdaa   : > { %5124 = vmatpush3.msra.mxu0 %v2992_v53  ;;  %v3230_v53 = vld [vmem:[%s7585_s14 + $0x340] sm:$0xff] }
 0xdab   : > { %5125 = vmatprep.subr.mxu0 %v2991_v35  ;;  %3301 = vmatpush1.msra.mxu1 %v3230_v53  ;;  %v3251_v53 = vld [vmem:[%s7585_s14 + $0x3e8] sm:$0xff] }
 0xdac   : > { %5126 = vmatpush3.msra.mxu0 %v2991_v35  ;;  %v3232_v35 = vld [vmem:[%s7585_s14 + $0x350] sm:$0xff] }
 0xdad   : > { %5127 = vmatprep.subr.mxu0 %v2990_v36 }
 0xdae   : > { %5128 = vmatpush3.msra.mxu0 %v2990_v36  ;;  %v3223_v36 = vld [vmem:[%s7585_s14 + $0x308] sm:$0xff] }
 0xdaf   : > { %5129 = vmatprep.subr.mxu0 %v2989_v37  ;;  %3302 = vmatprep.subr.mxu1 %v3223_v36  ;;  %v5400_v36 = vmov 0.0  }
 0xdb0   : > { %5130 = vmatpush3.msra.mxu0 %v2989_v37  ;;  %v3225_v37 = vld [vmem:[%s7585_s14 + $0x318] sm:$0xff]  ;;  %3360 = vmatprep.mubr.f32.mxu1 %v5400_v36 }
 0xdb1   : > { %5131 = vmatprep.subr.mxu0 %v2988_v38 }
 0xdb2   : > { %5132 = vmatpush3.msra.mxu0 %v2988_v38  ;;  %v3222_v38 = vld [vmem:[%s7585_s14 + $0x300] sm:$0xff] }
 0xdb3   : > { %5133 = vmatprep.subr.mxu0 %v2987_v60  ;;  %3303 = vmatpush1.msra.mxu1 %v3222_v38 }
 0xdb4   : > { %5134 = vmatpush3.msra.mxu0 %v2987_v60  ;;  %v3224_v60 = vld [vmem:[%s7585_s14 + $0x310] sm:$0xff] }
 0xdb5   : > { %5135 = vmatprep.subr.mxu0 %v2986_v1 }
 0xdb6   : > { %5136 = vmatpush3.msra.mxu0 %v2986_v1  ;;  %v3215_v1 = vld [vmem:[%s7585_s14 + $0x2c8] sm:$0xff] }
 0xdb7   : > { %3373 = vmatprep.subr.mxu0 %v3249_v21  ;;  %3304 = vmatprep.subr.mxu1 %v3215_v1  ;;  %v3144_v21 = vld [vmem:[%s7585_s14 + $0x90] sm:$0xff] }
 0xe09   : > { %v5211_v3 = vpop.permute.xlu1 %5210 }
 0xe0a   : > { %v5213_v10 = vunpack.i.h.bf16 %v5211_v3  ;;  %v5212_v11 = vunpack.i.l.bf16 %v5211_v3 }
 0xe0c   : > { %v2974_v44 = vsel %vm978_vm3, %v2972_v30, %v5212_v11  ;;  %v2975_v45 = vsel %vm978_vm3, %v2973_v55, %v5213_v10  ;;  %v3214_v10 = vld [vmem:[%s7585_s14 + $0x2c0] sm:$0xff]  ;;  %v3216_v11 = vld [vmem:[%s7585_s14 + $0x2d0] sm:$0xff]  ;;  %v3199_v30 = vld [vmem:[%s7585_s14 + $0x248] sm:$0xff] }
 0xe0d   : > { %v5216_v40 = vpop.permute.xlu0 %5215  ;;  %v5221_v6 = vpop.permute.xlu1 %5220  ;;  %3305 = vmatpush1.msra.mxu1 %v3214_v10  ;;  %v3208_v55 = vld [vmem:[%s7585_s14 + $0x290] sm:$0xff] }
 0xe0e   : > { %v5218_v23 = vunpack.i.h.bf16 %v5216_v40  ;;  %v5217_v29 = vunpack.i.l.bf16 %v5216_v40  ;;  %v5223_v14 = vunpack.i.h.bf16 %v5221_v6  ;;  %v5222_v47 = vunpack.i.l.bf16 %v5221_v6 }
 0xe10   : > { %v2976_v25 = vsel %vm984_vm5, %v2974_v44, %v5217_v29  ;;  %v2977_v49 = vsel %vm984_vm5, %v2975_v45, %v5218_v23  ;;  %v3207_v23 = vld [vmem:[%s7585_s14 + $0x288] sm:$0xff]  ;;  %v3209_v29 = vld [vmem:[%s7585_s14 + $0x298] sm:$0xff]  ;;  %v3198_v45 = vld [vmem:[%s7585_s14 + $0x240] sm:$0xff] }
 0xe11   : > { %v5226_v41 = vpop.permute.xlu0 %5225  ;;  %v5231_v17 = vpop.permute.xlu1 %5230  ;;  %v2979_v22 = vsel %vm990_vm7, %v2977_v49, %v5223_v14  ;;  %v2978_v2 = vsel %vm990_vm7, %v2976_v25, %v5222_v47  ;;  %3306 = vmatprep.subr.mxu1 %v3207_v23  ;;  %v3201_v44 = vld [vmem:[%s7585_s14 + $0x258] sm:$0xff]  ;;  %v3200_v14 = vld [vmem:[%s7585_s14 + $0x250] sm:$0xff]  ;;  %v3191_v47 = vld [vmem:[%s7585_s14 + $0x208] sm:$0xff] }
 0xe12   : > { %v5228_v48 = vunpack.i.h.bf16 %v5226_v41  ;;  %v5227_v58 = vunpack.i.l.bf16 %v5226_v41  ;;  %v5233_v57 = vunpack.i.h.bf16 %v5231_v17  ;;  %v5232_v51 = vunpack.i.l.bf16 %v5231_v17  ;;  %v3206_v41 = vld [vmem:[%s7585_s14 + $0x280] sm:$0xff]  ;;  %v3193_v25 = vld [vmem:[%s7585_s14 + $0x218] sm:$0xff]  ;;  %v3192_v17 = vld [vmem:[%s7585_s14 + $0x210] sm:$0xff] }
 0xe13   : > { %3307 = vmatpush1.msra.mxu1 %v3206_v41  ;;  %v3190_v49 = vld [vmem:[%s7585_s14 + $0x200] sm:$0xff] }
 0xe14   : > { %v2981_v15 = vsel %vm996_vm9, %v2979_v22, %v5228_v48  ;;  %v2980_v7 = vsel %vm996_vm9, %v2978_v2, %v5227_v58  ;;  %3308 = vmatprep.subr.mxu1 %v3199_v30  ;;  %v3183_v48 = vld [vmem:[%s7585_s14 + $0x1c8] sm:$0xff]  ;;  %v3185_v58 = vld [vmem:[%s7585_s14 + $0x1d8] sm:$0xff]  ;;  %v3250_v23 = vld [vmem:[%s7585_s14 + $0x3e0] sm:$0xff] }
 0xe15   : > { %v2982_v62 = vsel %vm1002_vm11, %v2980_v7, %v5232_v51  ;;  %v2983_v9 = vsel %vm1002_vm11, %v2981_v15, %v5233_v57  ;;  %3309 = vmatpush1.msra.mxu1 %v3198_v45  ;;  %v3182_v57 = vld [vmem:[%s7585_s14 + $0x1c0] sm:$0xff]  ;;  %v3184_v51 = vld [vmem:[%s7585_s14 + $0x1d0] sm:$0xff]  ;;  %v3175_v22 = vld [vmem:[%s7585_s14 + $0x188] sm:$0xff] }
 0xe16   : > { %3310 = vmatprep.subr.mxu1 %v3191_v47  ;;  %v3177_v2 = vld [vmem:[%s7585_s14 + $0x198] sm:$0xff]  ;;  %v3174_v15 = vld [vmem:[%s7585_s14 + $0x180] sm:$0xff]  ;;  %v3176_v7 = vld [vmem:[%s7585_s14 + $0x190] sm:$0xff] }
 0xe17   : > { %3311 = vmatpush1.msra.mxu1 %v3190_v49  ;;  %v3242_v30 = vld [vmem:[%s7585_s14 + $0x3a0] sm:$0xff]  ;;  %v3235_v45 = vld [vmem:[%s7585_s14 + $0x368] sm:$0xff]  ;;  %v3236_v49 = vld [vmem:[%s7585_s14 + $0x370] sm:$0xff] }
 0xe18   : > { %3312 = vmatprep.subr.mxu1 %v3183_v48  ;;  %v3229_v48 = vld [vmem:[%s7585_s14 + $0x338] sm:$0xff] }
 0xe19   : > { %3313 = vmatpush1.msra.mxu1 %v3182_v57  ;;  %v3228_v57 = vld [vmem:[%s7585_s14 + $0x330] sm:$0xff] }
 0xe1a   : > { %3314 = vmatprep.subr.mxu1 %v3175_v22  ;;  %v3221_v22 = vld [vmem:[%s7585_s14 + $0x2f8] sm:$0xff] }
 0xe1b   : > { %3315 = vmatpush1.msra.mxu1 %v3174_v15  ;;  %v3220_v15 = vld [vmem:[%s7585_s14 + $0x2f0] sm:$0xff] }
 0xe2a   : > { %v5104_v28 = vpop.f32.mrf.mxu0 }
 0xe2c   : > { %v2907_v39 = vpop.f32.mrf.mxu0 }
 0xe2d   : > { %v5234_v27 = vpack.i.bf16 %v5104_v28, %v2907_v39  ;;  %v3217_v28 = vld [vmem:[%s7585_s14 + $0x2d8] sm:$0xff] }
 0xe2f   : > { %5235 = vrot.lane.b32.xlu0 %v5234_v27, %s5391_s20 }
 0xea1   : > { %v5236_v19 = vpop.permute.xlu0 %5235 }
 0xea2   : > { %v5238_v4 = vunpack.i.h.bf16 %v5236_v19  ;;  %v5237_v13 = vunpack.i.l.bf16 %v5236_v19  ;;  %v3167_v19 = vld [vmem:[%s7585_s14 + $0x148] sm:$0xff] }
 0xea3   : > { %3316 = vmatprep.subr.mxu1 %v3167_v19  ;;  %v3213_v19 = vld [vmem:[%s7585_s14 + $0x2b8] sm:$0xff] }
 0xea4   : > { %v2984_v63 = vsel %vm1008_vm13, %v2982_v62, %v5237_v13  ;;  %v2985_v18 = vsel %vm1008_vm13, %v2983_v9, %v5238_v4  ;;  %v3169_v4 = vld [vmem:[%s7585_s14 + $0x158] sm:$0xff]  ;;  %v3166_v13 = vld [vmem:[%s7585_s14 + $0x140] sm:$0xff]  ;;  %v3168_v62 = vld [vmem:[%s7585_s14 + $0x150] sm:$0xff] }
 0xea5   : > { %5137 = vmatprep.mubr.f32.mxu0 %v2984_v63  ;;  %v3159_v9 = vld [vmem:[%s7585_s14 + $0x108] sm:$0xff]  ;;  %v3161_v63 = vld [vmem:[%s7585_s14 + $0x118] sm:$0xff]  ;;  %3317 = vmatpush1.msra.mxu1 %v3166_v13  ;;  %v3212_v13 = vld [vmem:[%s7585_s14 + $0x2b0] sm:$0xff] }
 0xea6   : > { %5138 = vmatmul.mubr.f32.vlgmr.msra.gmra.mxu0 %v2985_v18  ;;  %v3158_v18 = vld [vmem:[%s7585_s14 + $0x100] sm:$0xff]  ;;  %3318 = vmatprep.subr.mxu1 %v3159_v9  ;;  %v3205_v9 = vld [vmem:[%s7585_s14 + $0x278] sm:$0xff] }
 0xea7   : > { %3374 = vmatpush1.msra.mxu0 %v3248_v52  ;;  %3319 = vmatpush1.msra.mxu1 %v3158_v18  ;;  %v3137_v52 = vld [vmem:[%s7585_s14 + $0x58] sm:$0xff]  ;;  %v3204_v18 = vld [vmem:[%s7585_s14 + $0x270] sm:$0xff] }
 0xea8   : > { %3375 = vmatprep.subr.mxu0 %v3241_v54  ;;  %v3136_v54 = vld [vmem:[%s7585_s14 + $0x50] sm:$0xff]  ;;  %3437 = vmatprep.mubr.f32.mxu0 %v5400_v36 }
 0xea9   : > { %3376 = vmatpush1.msra.mxu0 %v3240_v61  ;;  %v3129_v61 = vld [vmem:[%s7585_s14 + $0x18] sm:$0xff] }
 0xeaa   : > { %3377 = vmatprep.subr.mxu0 %v3233_v5  ;;  %v3128_v5 = vld [vmem:[%s7585_s14 + $0x10] sm:$0xff] }
 0xeab   : > { %3378 = vmatpush1.msra.mxu0 %v3232_v35  ;;  %v3253_v35 = vld [vmem:[%s7585_s14 + $0x3f8] sm:$0xff] }
 0xeac   : > { %3379 = vmatprep.subr.mxu0 %v3225_v37 }
 0xead   : > { %3380 = vmatpush1.msra.mxu0 %v3224_v60 }
 0xeae   : > { %3381 = vmatprep.subr.mxu0 %v3217_v28 }
 0xeaf   : > { %3382 = vmatpush1.msra.mxu0 %v3216_v11 }
 0xeb0   : > { %3383 = vmatprep.subr.mxu0 %v3209_v29  ;;  %v3252_v29 = vld [vmem:[%s7585_s14 + $0x3f0] sm:$0xff] }
 0xeb1   : > { %3384 = vmatpush1.msra.mxu0 %v3208_v55  ;;  %v3245_v55 = vld [vmem:[%s7585_s14 + $0x3b8] sm:$0xff] }
 0xeb2   : > { %3385 = vmatprep.subr.mxu0 %v3201_v44 }
 0xeb3   : > { %3386 = vmatpush1.msra.mxu0 %v3200_v14  ;;  %v3237_v14 = vld [vmem:[%s7585_s14 + $0x378] sm:$0xff] }
 0xeb4   : > { %3387 = vmatprep.subr.mxu0 %v3193_v25  ;;  %v3234_v25 = vld [vmem:[%s7585_s14 + $0x360] sm:$0xff] }
 0xeb5   : > { %3388 = vmatpush1.msra.mxu0 %v3192_v17  ;;  %v3227_v17 = vld [vmem:[%s7585_s14 + $0x328] sm:$0xff] }
 0xeb6   : > { %3389 = vmatprep.subr.mxu0 %v3185_v58  ;;  %v3226_v58 = vld [vmem:[%s7585_s14 + $0x320] sm:$0xff] }
 0xeb7   : > { %3390 = vmatpush1.msra.mxu0 %v3184_v51  ;;  %v3219_v51 = vld [vmem:[%s7585_s14 + $0x2e8] sm:$0xff] }
 0xeb8   : > { %3391 = vmatprep.subr.mxu0 %v3177_v2  ;;  %v3218_v2 = vld [vmem:[%s7585_s14 + $0x2e0] sm:$0xff] }
 0xeb9   : > { %3392 = vmatpush1.msra.mxu0 %v3176_v7  ;;  %v3211_v7 = vld [vmem:[%s7585_s14 + $0x2a8] sm:$0xff] }
 0xeba   : > { %3393 = vmatprep.subr.mxu0 %v3169_v4  ;;  %v3210_v4 = vld [vmem:[%s7585_s14 + $0x2a0] sm:$0xff] }
 0xebb   : > { %3394 = vmatpush1.msra.mxu0 %v3168_v62  ;;  %v3203_v62 = vld [vmem:[%s7585_s14 + $0x268] sm:$0xff] }
 0xebc   : > { %3395 = vmatprep.subr.mxu0 %v3161_v63  ;;  %v3202_v63 = vld [vmem:[%s7585_s14 + $0x260] sm:$0xff] }
 0xf66   : > { %v5139_v16 = vpop.f32.mrf.mxu0 }
 0xf67   : > { %v3081_v12 = vadd.f32 %v5139_v16, %v4592_v31  ;;  %v3151_v16 = vld [vmem:[%s7585_s14 + $0xc8] sm:$0xff] }
 0xf68   : > { %v3075_v24 = vpop.f32.mrf.mxu0  ;;  %3320 = vmatprep.subr.mxu1 %v3151_v16  ;;  %v3197_v16 = vld [vmem:[%s7585_s14 + $0x238] sm:$0xff] }
 0xf69   : > { %v6339_v46 = vadd.f32 %v5375_v26, %v3081_v12  ;;  %v3076_v20 = vadd.f32 %v4592_v31, %v3075_v24  ;;  %v3160_v31 = vld [vmem:[%s7585_s14 + $0x110] sm:$0xff]  ;;  %v3153_v12 = vld [vmem:[%s7585_s14 + $0xd8] sm:$0xff]  ;;  %v3150_v24 = vld [vmem:[%s7585_s14 + $0xc0] sm:$0xff] }
 0xf6a   : > { %v3152_v26 = vld [vmem:[%s7585_s14 + $0xd0] sm:$0xff]  ;;  %3396 = vmatpush1.msra.mxu0 %v3160_v31  ;;  %3321 = vmatpush1.msra.mxu1 %v3150_v24  ;;  %v3195_v31 = vld [vmem:[%s7585_s14 + $0x228] sm:$0xff] }
 0xf6b   : > { %7622 = vst [vmem:[#allocation2_spill] sm:$0xff] %v6339_v46  ;;  %v6342_v33 = vadd.f32 %v5376_v32, %v3076_v20  ;;  %3090 = vadd.xlane.f32.xlu0 %v6339_v46  ;;  %v3143_v20 = vld [vmem:[%s7585_s14 + $0x88] sm:$0xff]  ;;  %v3145_v32 = vld [vmem:[%s7585_s14 + $0x98] sm:$0xff]  ;;  %3397 = vmatprep.subr.mxu0 %v3153_v12  ;;  %v3194_v12 = vld [vmem:[%s7585_s14 + $0x220] sm:$0xff] }
 0xf6c   : > { %3398 = vmatpush1.msra.mxu0 %v3152_v26  ;;  %3322 = vmatprep.subr.mxu1 %v3143_v20  ;;  %v3196_v24 = vld [vmem:[%s7585_s14 + $0x230] sm:$0xff]  ;;  %v3187_v26 = vld [vmem:[%s7585_s14 + $0x1e8] sm:$0xff]  ;;  %v3189_v20 = vld [vmem:[%s7585_s14 + $0x1f8] sm:$0xff] }
 0xf6d   : > { %7623 = vst [vmem:[#allocation3_spill] sm:$0xff] %v6342_v33  ;;  %3088 = vadd.xlane.f32.xlu1 %v6342_v33  ;;  %3399 = vmatprep.subr.mxu0 %v3145_v32  ;;  %v3186_v32 = vld [vmem:[%s7585_s14 + $0x1e0] sm:$0xff] }
 0xf6e   : > { %3323 = vmatpush1.msra.mxu1 %v3142_v34  ;;  %3400 = vmatpush1.msra.mxu0 %v3144_v21  ;;  %v3188_v34 = vld [vmem:[%s7585_s14 + $0x1f0] sm:$0xff]  ;;  %v3179_v21 = vld [vmem:[%s7585_s14 + $0x1a8] sm:$0xff] }
 0xf6f   : > { %3324 = vmatprep.subr.mxu1 %v3135_v50  ;;  %3401 = vmatprep.subr.mxu0 %v3137_v52  ;;  %v3181_v50 = vld [vmem:[%s7585_s14 + $0x1b8] sm:$0xff]  ;;  %v3178_v52 = vld [vmem:[%s7585_s14 + $0x1a0] sm:$0xff] }
 0xf70   : > { %3325 = vmatpush1.msra.mxu1 %v3134_v56  ;;  %3402 = vmatpush1.msra.mxu0 %v3136_v54  ;;  %v3180_v56 = vld [vmem:[%s7585_s14 + $0x1b0] sm:$0xff]  ;;  %v3171_v54 = vld [vmem:[%s7585_s14 + $0x168] sm:$0xff] }
 0xf71   : > { %3326 = vmatprep.subr.mxu1 %v3127_v59  ;;  %3403 = vmatprep.subr.mxu0 %v3129_v61  ;;  %v3173_v59 = vld [vmem:[%s7585_s14 + $0x178] sm:$0xff]  ;;  %v3170_v61 = vld [vmem:[%s7585_s14 + $0x160] sm:$0xff] }
 0xf72   : > { %3327 = vmatpush1.msra.mxu1 %v3126_v0  ;;  %3404 = vmatpush1.msra.mxu0 %v3128_v5  ;;  %v3172_v0 = vld [vmem:[%s7585_s14 + $0x170] sm:$0xff]  ;;  %v3163_v5 = vld [vmem:[%s7585_s14 + $0x128] sm:$0xff] }
 0xf73   : > { %3450 = vmatprep.subr.mxu1 %v3251_v53  ;;  %3527 = vmatprep.subr.mxu0 %v3253_v35  ;;  %v3165_v53 = vld [vmem:[%s7585_s14 + $0x138] sm:$0xff]  ;;  %v3162_v35 = vld [vmem:[%s7585_s14 + $0x120] sm:$0xff] }
 0xff4   : > { %v3091_v39 = vpop.xlane.xlu0 %3090 }
 0xff5   : > { %v3093_v8 = vmul.f32 0.0078125, %v3091_v39 }
 0xff6   : > { %v3089_v27 = vpop.xlane.xlu1 %3088 }
 0xff7   : > { %v3092_v3 = vmul.f32 0.0078125, %v3089_v27  ;;  %v6404_v42 = vsub.f32 %v6339_v46, %v3093_v8  ;;  %v4593_v8 = vld [vmem:[%s7583_s12] ss:$0 sm:$0xff] }
 0xff9   : > { %v6401_v40 = vsub.f32 %v6342_v33, %v3092_v3  ;;  %v3097_v6 = vmul.f32 %v6404_v42, %v6404_v42 }
 0xffb   : > { %v3096_v43 = vmul.f32 %v6401_v40, %v6401_v40 }
 0xffd   : > { %3098 = vadd.xlane.f32.xlu0 %v3096_v43  ;;  %v4594_v43 = vld [vmem:[%s7584_s13] ss:$0 sm:$0xff] }
0x1001   : > { %3100 = vadd.xlane.f32.xlu0 %v3097_v6 }
0x1086   : > { %v3099_v37 = vpop.xlane.xlu0 %3098 }
0x1087   : > { %v3102_v38 = vmul.f32 0.0078125, %v3099_v37  ;;  %v3164_v37 = vld [vmem:[%s7585_s14 + $0x130] sm:$0xff] }
0x1089   : > { %v3104_v60 = vadd.f32 1e-05, %v3102_v38  ;;  %v3155_v38 = vld [vmem:[%s7585_s14 + $0xe8] sm:$0xff] }
0x108a   : > { %v3101_v1 = vpop.xlane.xlu0 %3100 }
0x108b   : > { %5307 = vrsqrt.f32 %v3104_v60  ;;  %v3103_v28 = vmul.f32 0.0078125, %v3101_v1  ;;  %v3157_v60 = vld [vmem:[%s7585_s14 + $0xf8] sm:$0xff]  ;;  %v3154_v1 = vld [vmem:[%s7585_s14 + $0xe0] sm:$0xff] }
0x108d   : > { %v3105_v39 = vadd.f32 1e-05, %v3103_v28  ;;  %v3156_v28 = vld [vmem:[%s7585_s14 + $0xf0] sm:$0xff] }
0x108f   : > { %5309 = vrsqrt.f32 %v3105_v39  ;;  %v3147_v39 = vld [vmem:[%s7585_s14 + $0xa8] sm:$0xff] }
0x1098   : > { %v5308_v27 = vpop.eup %5307 }
0x1099   : > { %v3108_v3 = vmul.f32 %v5308_v27, %v6401_v40  ;;  %v3243_v40 = vld [vmem:[%s7585_s14 + $0x3a8] sm:$0xff]  ;;  %v3149_v27 = vld [vmem:[%s7585_s14 + $0xb8] sm:$0xff] }
0x109b   : > { %v3116_v6 = vmul.f32 %v4593_v8, %v3108_v3  ;;  %v3148_v3 = vld [vmem:[%s7585_s14 + $0xb0] sm:$0xff] }
0x109c   : > { %v5310_v10 = vpop.eup %5309 }
0x109d   : > { %v6563_v11 = vadd.f32 %v4594_v43, %v3116_v6  ;;  %v3109_v41 = vmul.f32 %v5310_v10, %v6404_v42  ;;  %v3244_v42 = vld [vmem:[%s7585_s14 + $0x3b0] sm:$0xff]  ;;  %v3141_v6 = vld [vmem:[%s7585_s14 + $0x78] sm:$0xff]  ;;  %v3138_v10 = vld [vmem:[%s7585_s14 + $0x60] sm:$0xff] }
0x109f   : > { %3361 = vmatmul.mubr.f32.vlgmr.msra.gmra.mxu1 %v6563_v11  ;;  %3438 = vmatmul.mubr.f32.vlgmr.msra.gmra.mxu0 %v6563_v11  ;;  %v3117_v44 = vmul.f32 %v4593_v8, %v3109_v41  ;;  %v3146_v8 = vld [vmem:[%s7585_s14 + $0xa0] sm:$0xff]  ;;  %v3133_v41 = vld [vmem:[%s7585_s14 + $0x38] sm:$0xff] }
0x10a0   : > { %3451 = vmatpush1.msra.mxu1 %v3250_v23  ;;  %3528 = vmatpush1.msra.mxu0 %v3252_v29  ;;  %v3140_v23 = vld [vmem:[%s7585_s14 + $0x70] sm:$0xff]  ;;  %v3131_v29 = vld [vmem:[%s7585_s14 + $0x28] sm:$0xff] }
0x10a1   : > { %3452 = vmatprep.subr.mxu1 %v3243_v40  ;;  %3529 = vmatprep.subr.mxu0 %v3245_v55  ;;  %v6592_v47 = vadd.f32 %v4594_v43, %v3117_v44  ;;  %v3139_v43 = vld [vmem:[%s7585_s14 + $0x68] sm:$0xff]  ;;  %v3130_v40 = vld [vmem:[%s7585_s14 + $0x20] sm:$0xff]  ;;  %v3132_v55 = vld [vmem:[%s7585_s14 + $0x30] sm:$0xff] }
0x10a2   : > { %3453 = vmatpush1.msra.mxu1 %v3242_v30  ;;  %3530 = vmatpush1.msra.mxu0 %v3244_v42  ;;  %v4067_v30 = vld [vmem:[%s7587_s16 + $0xf8] sm:$0xff]  ;;  %v4066_v44 = vld [vmem:[%s7587_s16 + $0xf0] sm:$0xff] }
0x10a3   : > { %3366 = vmatprep.mubr.f32.mxu1 %v5400_v36  ;;  %3443 = vmatprep.mubr.f32.mxu0 %v5400_v36  ;;  %v4099_v42 = vld [vmem:[%s7587_s16 + $0x1f8] sm:$0xff] }
0x10a4   : > { %3454 = vmatprep.subr.mxu1 %v3235_v45  ;;  %3531 = vmatprep.subr.mxu0 %v3237_v14  ;;  %v4098_v45 = vld [vmem:[%s7587_s16 + $0x1f0] sm:$0xff] }
0x10a5   : > { %3367 = vmatmul.mubr.f32.gmra.mxu1 %v6592_v47  ;;  %3444 = vmatmul.mubr.f32.gmra.mxu0 %v6592_v47  ;;  %v4050_v14 = vld [vmem:[%s7587_s16 + $0x70] sm:$0xff] }
0x10a6   : > { %3455 = vmatpush1.msra.mxu1 %v3234_v25  ;;  %3532 = vmatpush1.msra.mxu0 %v3236_v49  ;;  %v4065_v25 = vld [vmem:[%s7587_s16 + $0xe8] sm:$0xff] }
0x10a7   : > { %3456 = vmatprep.subr.mxu1 %v3227_v17  ;;  %3533 = vmatprep.subr.mxu0 %v3229_v48  ;;  %v4097_v49 = vld [vmem:[%s7587_s16 + $0x1e8] sm:$0xff] }
0x10a8   : > { %3457 = vmatpush1.msra.mxu1 %v3226_v58  ;;  %3534 = vmatpush1.msra.mxu0 %v3228_v57  ;;  %v4049_v17 = vld [vmem:[%s7587_s16 + $0x68] sm:$0xff]  ;;  %v4064_v58 = vld [vmem:[%s7587_s16 + $0xe0] sm:$0xff] }
0x10a9   : > { %3458 = vmatprep.subr.mxu1 %v3219_v51  ;;  %3535 = vmatprep.subr.mxu0 %v3221_v22  ;;  %v4081_v48 = vld [vmem:[%s7587_s16 + $0x168] sm:$0xff]  ;;  %v4096_v57 = vld [vmem:[%s7587_s16 + $0x1e0] sm:$0xff] }
0x10aa   : > { %3459 = vmatpush1.msra.mxu1 %v3218_v2  ;;  %3536 = vmatpush1.msra.mxu0 %v3220_v15  ;;  %v4048_v51 = vld [vmem:[%s7587_s16 + $0x60] sm:$0xff]  ;;  %v4063_v2 = vld [vmem:[%s7587_s16 + $0xd8] sm:$0xff] }
0x10ab   : > { %3460 = vmatprep.subr.mxu1 %v3211_v7  ;;  %3537 = vmatprep.subr.mxu0 %v3213_v19  ;;  %v4080_v22 = vld [vmem:[%s7587_s16 + $0x160] sm:$0xff]  ;;  %v4095_v15 = vld [vmem:[%s7587_s16 + $0x1d8] sm:$0xff] }
0x10ac   : > { %3461 = vmatpush1.msra.mxu1 %v3210_v4  ;;  %3538 = vmatpush1.msra.mxu0 %v3212_v13  ;;  %v4047_v7 = vld [vmem:[%s7587_s16 + $0x58] sm:$0xff]  ;;  %v4062_v4 = vld [vmem:[%s7587_s16 + $0xd0] sm:$0xff] }
0x10ad   : > { %3462 = vmatprep.subr.mxu1 %v3203_v62  ;;  %3539 = vmatprep.subr.mxu0 %v3205_v9  ;;  %v4079_v19 = vld [vmem:[%s7587_s16 + $0x158] sm:$0xff]  ;;  %v4094_v13 = vld [vmem:[%s7587_s16 + $0x1d0] sm:$0xff] }
0x10ae   : > { %3463 = vmatpush1.msra.mxu1 %v3202_v63  ;;  %3540 = vmatpush1.msra.mxu0 %v3204_v18  ;;  %v4046_v62 = vld [vmem:[%s7587_s16 + $0x50] sm:$0xff]  ;;  %v4061_v63 = vld [vmem:[%s7587_s16 + $0xc8] sm:$0xff] }
0x10af   : > { %3464 = vmatprep.subr.mxu1 %v3195_v31  ;;  %3541 = vmatprep.subr.mxu0 %v3197_v16  ;;  %v4078_v9 = vld [vmem:[%s7587_s16 + $0x150] sm:$0xff]  ;;  %v4093_v18 = vld [vmem:[%s7587_s16 + $0x1c8] sm:$0xff] }
0x10b0   : > { %3465 = vmatpush1.msra.mxu1 %v3194_v12  ;;  %3542 = vmatpush1.msra.mxu0 %v3196_v24  ;;  %v4045_v31 = vld [vmem:[%s7587_s16 + $0x48] sm:$0xff]  ;;  %v4060_v12 = vld [vmem:[%s7587_s16 + $0xc0] sm:$0xff] }
0x10b1   : > { %3466 = vmatprep.subr.mxu1 %v3187_v26  ;;  %3543 = vmatprep.subr.mxu0 %v3189_v20  ;;  %v4077_v16 = vld [vmem:[%s7587_s16 + $0x148] sm:$0xff]  ;;  %v4092_v24 = vld [vmem:[%s7587_s16 + $0x1c0] sm:$0xff] }
0x10b2   : > { %3467 = vmatpush1.msra.mxu1 %v3186_v32  ;;  %3544 = vmatpush1.msra.mxu0 %v3188_v34  ;;  %v4044_v26 = vld [vmem:[%s7587_s16 + $0x40] sm:$0xff]  ;;  %v4059_v32 = vld [vmem:[%s7587_s16 + $0xb8] sm:$0xff] }
0x10b3   : > { %3468 = vmatprep.subr.mxu1 %v3179_v21  ;;  %3545 = vmatprep.subr.mxu0 %v3181_v50  ;;  %v4076_v20 = vld [vmem:[%s7587_s16 + $0x140] sm:$0xff]  ;;  %v4091_v34 = vld [vmem:[%s7587_s16 + $0x1b8] sm:$0xff] }
0x10b4   : > { %3469 = vmatpush1.msra.mxu1 %v3178_v52  ;;  %3546 = vmatpush1.msra.mxu0 %v3180_v56  ;;  %v4043_v21 = vld [vmem:[%s7587_s16 + $0x38] sm:$0xff]  ;;  %v4058_v52 = vld [vmem:[%s7587_s16 + $0xb0] sm:$0xff] }
0x10b5   : > { %3470 = vmatprep.subr.mxu1 %v3171_v54  ;;  %3547 = vmatprep.subr.mxu0 %v3173_v59  ;;  %v4075_v50 = vld [vmem:[%s7587_s16 + $0x138] sm:$0xff]  ;;  %v4090_v56 = vld [vmem:[%s7587_s16 + $0x1b0] sm:$0xff] }
0x10b6   : > { %3471 = vmatpush1.msra.mxu1 %v3170_v61  ;;  %3548 = vmatpush1.msra.mxu0 %v3172_v0  ;;  %v4042_v54 = vld [vmem:[%s7587_s16 + $0x30] sm:$0xff]  ;;  %v4057_v61 = vld [vmem:[%s7587_s16 + $0xa8] sm:$0xff] }
0x10b7   : > { %3472 = vmatprep.subr.mxu1 %v3163_v5  ;;  %3549 = vmatprep.subr.mxu0 %v3165_v53  ;;  %v4074_v59 = vld [vmem:[%s7587_s16 + $0x130] sm:$0xff]  ;;  %v4089_v0 = vld [vmem:[%s7587_s16 + $0x1a8] sm:$0xff] }
0x10b8   : > { %3473 = vmatpush1.msra.mxu1 %v3162_v35  ;;  %3550 = vmatpush1.msra.mxu0 %v3164_v37  ;;  %v4041_v5 = vld [vmem:[%s7587_s16 + $0x28] sm:$0xff]  ;;  %v4056_v35 = vld [vmem:[%s7587_s16 + $0xa0] sm:$0xff] }
0x10b9   : > { %3474 = vmatprep.subr.mxu1 %v3155_v38  ;;  %3551 = vmatprep.subr.mxu0 %v3157_v60  ;;  %v4073_v53 = vld [vmem:[%s7587_s16 + $0x128] sm:$0xff]  ;;  %v4088_v37 = vld [vmem:[%s7587_s16 + $0x1a0] sm:$0xff] }
0x10ba   : > { %3475 = vmatpush1.msra.mxu1 %v3154_v1  ;;  %3552 = vmatpush1.msra.mxu0 %v3156_v28  ;;  %v4040_v38 = vld [vmem:[%s7587_s16 + $0x20] sm:$0xff]  ;;  %v4055_v1 = vld [vmem:[%s7587_s16 + $0x98] sm:$0xff] }
0x10bb   : > { %3476 = vmatprep.subr.mxu1 %v3147_v39  ;;  %3553 = vmatprep.subr.mxu0 %v3149_v27  ;;  %v4072_v60 = vld [vmem:[%s7587_s16 + $0x120] sm:$0xff]  ;;  %v4087_v28 = vld [vmem:[%s7587_s16 + $0x198] sm:$0xff] }
0x10bc   : > { %3477 = vmatpush1.msra.mxu1 %v3146_v8  ;;  %3554 = vmatpush1.msra.mxu0 %v3148_v3  ;;  %v4039_v39 = vld [vmem:[%s7587_s16 + $0x18] sm:$0xff]  ;;  %v4054_v8 = vld [vmem:[%s7587_s16 + $0x90] sm:$0xff] }
0x10bd   : > { %3478 = vmatprep.subr.mxu1 %v3139_v43  ;;  %3555 = vmatprep.subr.mxu0 %v3141_v6  ;;  %v4071_v27 = vld [vmem:[%s7587_s16 + $0x118] sm:$0xff]  ;;  %v4086_v3 = vld [vmem:[%s7587_s16 + $0x190] sm:$0xff] }
0x10be   : > { %3479 = vmatpush1.msra.mxu1 %v3138_v10  ;;  %3556 = vmatpush1.msra.mxu0 %v3140_v23  ;;  %v4038_v43 = vld [vmem:[%s7587_s16 + $0x10] sm:$0xff]  ;;  %v4053_v10 = vld [vmem:[%s7587_s16 + $0x88] sm:$0xff] }
0x10bf   : > { %3480 = vmatprep.subr.mxu1 %v3131_v29  ;;  %3557 = vmatprep.subr.mxu0 %v3133_v41  ;;  %v4070_v6 = vld [vmem:[%s7587_s16 + $0x110] sm:$0xff]  ;;  %v4085_v23 = vld [vmem:[%s7587_s16 + $0x188] sm:$0xff] }
0x10c0   : > { %3481 = vmatpush1.msra.mxu1 %v3130_v40  ;;  %3514 = vmatprep.mubr.f32.mxu1 %v5400_v36  ;;  %v4037_v29 = vld [vmem:[%s7587_s16 + $0x8] sm:$0xff]  ;;  %v4052_v40 = vld [vmem:[%s7587_s16 + $0x80] sm:$0xff] }
0x10c1   : > { %3558 = vmatpush1.msra.mxu0 %v3132_v55  ;;  %3591 = vmatprep.mubr.f32.mxu0 %v5400_v36  ;;  %v4069_v41 = vld [vmem:[%s7587_s16 + $0x108] sm:$0xff]  ;;  %v4084_v55 = vld [vmem:[%s7587_s16 + $0x180] sm:$0xff] }
0x10c2   : > { %3515 = vmatmul.mubr.f32.vlgmr.msra.gmra.mxu1 %v6563_v11  ;;  %3592 = vmatmul.mubr.f32.vlgmr.msra.gmra.mxu0 %v6563_v11  ;;  %v4051_v11 = vld [vmem:[%s7587_s16 + $0x78] sm:$0xff] }
0x10c3   : > { %3520 = vmatprep.mubr.f32.mxu1 %v5400_v36  ;;  %3597 = vmatprep.mubr.f32.mxu0 %v5400_v36  ;;  %v4083_v36 = vld [vmem:[%s7587_s16 + $0x178] sm:$0xff] }
0x10c4   : > { %4736 = vmatprep.subr.mxu1 %v4067_v30  ;;  %4774 = vmatprep.subr.mxu0 %v4099_v42  ;;  %v4036_v30 = vld [vmem:[%s7587_s16] sm:$0xff] }
0x10c5   : > { %4737 = vmatpush3.msra.mxu1 %v4051_v11  ;;  %4775 = vmatpush3.msra.mxu0 %v4083_v36  ;;  %v4068_v42 = vld [vmem:[%s7587_s16 + $0x100] sm:$0xff]  ;;  %v4131_v11 = vld [vmem:[%s7587_s16 + $0x2f8] sm:$0xff] }
0x10c6   : > { %3521 = vmatmul.mubr.f32.gmra.mxu1 %v6592_v47  ;;  %3598 = vmatmul.mubr.f32.gmra.mxu0 %v6592_v47  ;;  %v4082_v47 = vld [vmem:[%s7587_s16 + $0x170] sm:$0xff]  ;;  %v4163_v36 = vld [vmem:[%s7587_s16 + $0x3f8] sm:$0xff] }
0x10c7   : > { %4738 = vmatprep.subr.mxu1 %v4066_v44  ;;  %4776 = vmatprep.subr.mxu0 %v4098_v45  ;;  %v3256_v44 = vlaneseq }
0x10c8   : > { %4739 = vmatpush3.msra.mxu1 %v4050_v14  ;;  %4777 = vmatpush3.msra.mxu0 %v4082_v47 }
0x10c9   : > { %4740 = vmatprep.subr.mxu1 %v4065_v25  ;;  %4778 = vmatprep.subr.mxu0 %v4097_v49  ;;  %v6966_v45 = vshrl.u32 %v3256_v44, 7  ;;  %v6973_v25 = vld [vmem:[%s7586_s15] sm:$0xff] }
0x10ca   : > { %4741 = vmatpush3.msra.mxu1 %v4049_v17  ;;  %4779 = vmatpush3.msra.mxu0 %v4081_v48 }
0x10cb   : > { %4742 = vmatprep.subr.mxu1 %v4064_v58  ;;  %4780 = vmatprep.subr.mxu0 %v4096_v57  ;;  %v3258_v14 = vsub.s32 0, %v6966_v45  ;;  %v3266_v47 = vsub.s32 2, %v6966_v45  ;;  %v3262_v49 = vsub.s32 1, %v6966_v45 }
0x10cc   : > { %4743 = vmatpush3.msra.mxu1 %v4048_v51  ;;  %4781 = vmatpush3.msra.mxu0 %v4080_v22  ;;  %v3270_v22 = vsub.s32 3, %v6966_v45 }
0x10cd   : > { %4744 = vmatprep.subr.mxu1 %v4063_v2  ;;  %4782 = vmatprep.subr.mxu0 %v4095_v15  ;;  %v3259_v17 = vrot.slane %v6973_v25, %v3258_v14  ;;  %v3267_v48 = vrot.slane %v6973_v25, %v3266_v47  ;;  %v3263_v51 = vrot.slane %v6973_v25, %v3262_v49 }
0x10ce   : > { %4745 = vmatpush3.msra.mxu1 %v4047_v7  ;;  %4783 = vmatpush3.msra.mxu0 %v4079_v19 }
0x10cf   : > { %4746 = vmatprep.subr.mxu1 %v4062_v4  ;;  %4784 = vmatprep.subr.mxu0 %v4094_v13 }
0x10d0   : > { %4747 = vmatpush3.msra.mxu1 %v4046_v62  ;;  %4785 = vmatpush3.msra.mxu0 %v4078_v9  ;;  %v3271_v62 = vrot.slane %v6973_v25, %v3270_v22 }
0x10d1   : > { %4748 = vmatprep.subr.mxu1 %v4061_v63  ;;  %4786 = vmatprep.subr.mxu0 %v4093_v18 }
0x10d2   : > { %4749 = vmatpush3.msra.mxu1 %v4045_v31  ;;  %4787 = vmatpush3.msra.mxu0 %v4077_v16 }
0x10d3   : > { %4750 = vmatprep.subr.mxu1 %v4060_v12  ;;  %4788 = vmatprep.subr.mxu0 %v4092_v24 }
0x10d4   : > { %4751 = vmatpush3.msra.mxu1 %v4044_v26  ;;  %4789 = vmatpush3.msra.mxu0 %v4076_v20 }
0x10d5   : > { %4752 = vmatprep.subr.mxu1 %v4059_v32  ;;  %4790 = vmatprep.subr.mxu0 %v4091_v34 }
0x10d6   : > { %4753 = vmatpush3.msra.mxu1 %v4043_v21  ;;  %4791 = vmatpush3.msra.mxu0 %v4075_v50 }
0x10d7   : > { %4754 = vmatprep.subr.mxu1 %v4058_v52  ;;  %4792 = vmatprep.subr.mxu0 %v4090_v56 }
0x10d8   : > { %4755 = vmatpush3.msra.mxu1 %v4042_v54  ;;  %4793 = vmatpush3.msra.mxu0 %v4074_v59 }
0x10d9   : > { %4756 = vmatprep.subr.mxu1 %v4057_v61  ;;  %4794 = vmatprep.subr.mxu0 %v4089_v0 }
0x10da   : > { %4757 = vmatpush3.msra.mxu1 %v4041_v5  ;;  %4795 = vmatpush3.msra.mxu0 %v4073_v53 }
0x10db   : > { %4758 = vmatprep.subr.mxu1 %v4056_v35  ;;  %4796 = vmatprep.subr.mxu0 %v4088_v37  ;;  %v3274_v37 = vsub.s32 4, %v6966_v45 }
0x10dc   : > { %4759 = vmatpush3.msra.mxu1 %v4040_v38  ;;  %4797 = vmatpush3.msra.mxu0 %v4072_v60 }
0x10dd   : > { %4760 = vmatprep.subr.mxu1 %v4055_v1  ;;  %4798 = vmatprep.subr.mxu0 %v4087_v28 }
0x10de   : > { %4761 = vmatpush3.msra.mxu1 %v4039_v39  ;;  %4799 = vmatpush3.msra.mxu0 %v4071_v27 }
0x10df   : > { %4762 = vmatprep.subr.mxu1 %v4054_v8  ;;  %4800 = vmatprep.subr.mxu0 %v4086_v3 }
0x10e0   : > { %4763 = vmatpush3.msra.mxu1 %v4038_v43  ;;  %4801 = vmatpush3.msra.mxu0 %v4070_v6  ;;  %v3282_v43 = vsub.s32 6, %v6966_v45  ;;  %v7021_v6 = vrot.slane %v6973_v25, %v3274_v37 }
0x10e1   : > { %4764 = vmatprep.subr.mxu1 %v4053_v10  ;;  %4802 = vmatprep.subr.mxu0 %v4085_v23 }
0x10e2   : > { %4765 = vmatpush3.msra.mxu1 %v4037_v29  ;;  %4803 = vmatpush3.msra.mxu0 %v4069_v41 }
0x10e3   : > { %4766 = vmatprep.subr.mxu1 %v4052_v40  ;;  %4804 = vmatprep.subr.mxu0 %v4084_v55  ;;  %v3278_v55 = vsub.s32 5, %v6966_v45 }
0x10e4   : > { %4767 = vmatpush3.msra.mxu1 %v4036_v30  ;;  %4805 = vmatpush3.msra.mxu0 %v4068_v42 }
0x10e5   : > { %4812 = vmatprep.subr.mxu1 %v4131_v11  ;;  %4850 = vmatprep.subr.mxu0 %v4163_v36 }
0x115f   : > { %v3362_v58 = vpop.f32.mrf.mxu1  ;;  %v3439_v57 = vpop.f32.mrf.mxu0 }
0x1160   : > { %v6980_v2 = vadd.f32 %v3362_v58, %v3259_v17  ;;  %v6982_v15 = vadd.f32 %v3439_v57, %v3267_v48 }
0x1161   : > { %v3364_v7 = vpop.f32.mrf.mxu1  ;;  %v3441_v18 = vpop.f32.mrf.mxu0 }
0x1162   : > { %v6985_v19 = vmul.f32 0.70710677, %v6980_v2  ;;  %v6988_v4 = vmul.f32 0.70710677, %v6982_v15  ;;  %v6990_v13 = vadd.f32 %v3364_v7, %v3263_v51  ;;  %v6998_v24 = vadd.f32 %v3441_v18, %v3271_v62 }
0x1163   : > { %v7057_v37 = vmul.f32 0.5, %v6982_v15 }
0x1164   : > { %v3636_v9 = vand.u32 2147483647, %v6985_v19  ;;  %v3638_v63 = vand.u32 2147483647, %v6988_v4  ;;  %v6996_v31 = vmul.f32 0.70710677, %v6990_v13 }
0x1165   : > { %v3368_v34 = vpop.f32.mrf.mxu1  ;;  %v7002_v21 = vmul.f32 0.70710677, %v6998_v24  ;;  %v3445_v56 = vpop.f32.mrf.mxu0  ;;  %vm3956_vm15 = vcmp.ge.f32.partialorder %v6985_v19, 0.0  ;;  %vm3958_vm0 = vcmp.ge.f32.partialorder %v6988_v4, 0.0 }
0x1166   : > { %v3652_v16 = vmul.f32 0.3275911, %v3636_v9  ;;  %v3654_v12 = vmul.f32 0.3275911, %v3638_v63  ;;  %v3637_v32 = vand.u32 2147483647, %v6996_v31  ;;  %v7004_v50 = vadd.f32 %v3368_v34, %v3259_v17 }
0x1167   : > { %v3860_v54 = vmul.f32 %v3636_v9, %v3636_v9  ;;  %v3639_v59 = vand.u32 2147483647, %v7002_v21  ;;  %v3862_v61 = vmul.f32 %v3638_v63, %v3638_v63  ;;  %v7010_v53 = vadd.f32 %v3445_v56, %v3267_v48  ;;  %v3370_v35 = vpop.f32.mrf.mxu1  ;;  %v3447_v40 = vpop.f32.mrf.mxu0 }
0x1168   : > { %v3668_v26 = vadd.f32 1.0, %v3652_v16  ;;  %v3670_v20 = vadd.f32 1.0, %v3654_v12  ;;  %v3653_v52 = vmul.f32 0.3275911, %v3637_v32  ;;  %v7008_v0 = vmul.f32 0.70710677, %v7004_v50 }
0x1169   : > { %v3876_v38 = vsub.f32 0.0, %v3860_v54  ;;  %v3861_v60 = vmul.f32 %v3637_v32, %v3637_v32  ;;  %v3655_v1 = vmul.f32 0.3275911, %v3639_v59  ;;  %v3878_v28 = vsub.f32 0.0, %v3862_v61 }
0x116a   : > { %5311 = vrcp.f32 %v3668_v26  ;;  %v3669_v5 = vadd.f32 1.0, %v3653_v52  ;;  %v3644_v39 = vand.u32 2147483647, %v7008_v0  ;;  %v7014_v27 = vadd.f32 %v3370_v35, %v3263_v51 }
0x116b   : > { %5313 = vrcp.f32 %v3670_v20  ;;  %v3863_v8 = vmul.f32 %v3639_v59, %v3639_v59  ;;  %v7017_v3 = vmul.f32 0.70710677, %v7010_v53  ;;  %v3892_v23 = vmul.f32 1.442695, %v3876_v38 }
0x116c   : > { %5315 = vrcp.f32 %v3669_v5  ;;  %v3877_v29 = vsub.f32 0.0, %v3861_v60  ;;  %v3671_v41 = vadd.f32 1.0, %v3655_v1  ;;  %v3896_v11 = vmul.f32 1.442695, %v3878_v28 }
0x116d   : > { %v3868_v36 = vmul.f32 %v3644_v39, %v3644_v39  ;;  %v7030_v44 = vmul.f32 0.70710677, %v7014_v27  ;;  %v3879_v47 = vsub.f32 0.0, %v3863_v8  ;;  %v3646_v49 = vand.u32 2147483647, %v7017_v3 }
0x116e   : > { %v7035_v17 = vrot.slane %v6973_v25, %v3282_v43  ;;  %v3660_v58 = vmul.f32 0.3275911, %v3644_v39  ;;  %v7037_v57 = vadd.f32 %v3447_v40, %v3271_v62  ;;  %v3286_v51 = vsub.s32 7, %v6966_v45 }
0x116f   : > { %v3894_v7 = vmul.f32 1.442695, %v3877_v29  ;;  %5317 = vrcp.f32 %v3671_v41  ;;  %v7041_v9 = vrot.slane %v6973_v25, %v3278_v55  ;;  %v3884_v18 = vsub.f32 0.0, %v3868_v36 }
0x1170   : > { %5319 = vpow2.f32 %v3892_v23  ;;  %v3645_v16 = vand.u32 2147483647, %v7030_v44  ;;  %v3898_v26 = vmul.f32 1.442695, %v3879_v47  ;;  %v3870_v62 = vmul.f32 %v3646_v49, %v3646_v49 }
0x1171   : > { %5321 = vpow2.f32 %v3896_v11  ;;  %v3676_v32 = vadd.f32 1.0, %v3660_v58  ;;  %v7047_v45 = vmul.f32 0.70710677, %v7037_v57  ;;  %v7050_v34 = vrot.slane %v6973_v25, %v3286_v51 }
0x1172   : > { %v7053_v52 = vmul.f32 0.5, %v6980_v2  ;;  %5323 = vpow2.f32 %v3894_v7  ;;  %v3662_v54 = vmul.f32 0.3275911, %v3646_v49  ;;  %v3908_v61 = vmul.f32 1.442695, %v3884_v18 }
0x1173   : > { %v3661_v5 = vmul.f32 0.3275911, %v3645_v16  ;;  %v3869_v35 = vmul.f32 %v3645_v16, %v3645_v16  ;;  %5325 = vpow2.f32 %v3898_v26  ;;  %v3886_v60 = vsub.f32 0.0, %v3870_v62 }
0x1174   : > { %v7063_v2 = vmul.f32 0.5, %v6990_v13  ;;  %5327 = vrcp.f32 %v3676_v32  ;;  %v3647_v28 = vand.u32 2147483647, %v7047_v45  ;;  %v3678_v23 = vadd.f32 1.0, %v3662_v54 }
0x1175   : > { %5329 = vpow2.f32 %v3908_v61  ;;  %v3677_v40 = vadd.f32 1.0, %v3661_v5  ;;  %v3885_v55 = vsub.f32 0.0, %v3869_v35  ;;  %v3912_v11 = vmul.f32 1.442695, %v3886_v60 }
0x1176   : > { %v3871_v49 = vmul.f32 %v3647_v28, %v3647_v28  ;;  %5331 = vrcp.f32 %v3678_v23  ;;  %vm3957_vm1 = vcmp.ge.f32.partialorder %v6996_v31, 0.0  ;;  %vm3959_vm2 = vcmp.ge.f32.partialorder %v7002_v21, 0.0 }
0x1177   : > { %v7023_v10 = vpop.eup %5311  ;;  %5333 = vrcp.f32 %v3677_v40  ;;  %v3910_v16 = vmul.f32 1.442695, %v3885_v55  ;;  %vm3964_vm3 = vcmp.ge.f32.partialorder %v7008_v0, 0.0  ;;  %vm3965_vm4 = vcmp.ge.f32.partialorder %v7030_v44, 0.0  ;;  %v4160_v0 = vld [vmem:[%s7587_s16 + $0x3e0] sm:$0xff] }
0x1178   : > { %v7026_v30 = vpop.eup %5313  ;;  %v3716_v42 = vmul.f32 1.0614054, %v7023_v10  ;;  %5335 = vpow2.f32 %v3912_v11  ;;  %v3887_v61 = vsub.f32 0.0, %v3871_v49  ;;  %vm3967_vm5 = vcmp.ge.f32.partialorder %v7047_v45, 0.0  ;;  %v4144_v44 = vld [vmem:[%s7587_s16 + $0x360] sm:$0xff]  ;;  %v4110_v45 = vld [vmem:[%s7587_s16 + $0x250] sm:$0xff] }
0x1179   : > { %v3718_v14 = vmul.f32 1.0614054, %v7026_v30  ;;  %v7060_v25 = vpop.eup %5315  ;;  %5337 = vpow2.f32 %v3910_v16  ;;  %vm3966_vm6 = vcmp.ge.f32.partialorder %v7017_v3, 0.0 }
0x117a   : > { %v3732_v48 = vadd.f32 -1.4531521, %v3716_v42 }
0x117b   : > { %v3734_v22 = vadd.f32 -1.4531521, %v3718_v14  ;;  %v3717_v14 = vmul.f32 1.0614054, %v7060_v25 }
0x117c   : > { %v3748_v63 = vmul.f32 %v7023_v10, %v3732_v48 }
0x117d   : > { %v3750_v12 = vmul.f32 %v7026_v30, %v3734_v22  ;;  %v3663_v22 = vmul.f32 0.3275911, %v3647_v28 }
0x117e   : > { %v3764_v20 = vadd.f32 1.4214138, %v3748_v63  ;;  %v7085_v63 = vpop.eup %5317 }
0x117f   : > { %v3766_v56 = vadd.f32 1.4214138, %v3750_v12  ;;  %v5320_v62 = vpop.eup %5319  ;;  %v3719_v28 = vmul.f32 1.0614054, %v7085_v63 }
0x1180   : > { %v3780_v59 = vmul.f32 %v7023_v10, %v3764_v20  ;;  %v5322_v54 = vpop.eup %5321 }
0x1181   : > { %v3782_v38 = vmul.f32 %v7026_v30, %v3766_v56  ;;  %v3733_v56 = vadd.f32 -1.4531521, %v3717_v14 }
0x1182   : > { %v3796_v1 = vadd.f32 -0.28449672, %v3780_v59  ;;  %v3516_v39 = vpop.f32.mrf.mxu1  ;;  %v3593_v8 = vpop.f32.mrf.mxu0 }
0x1183   : > { %v3798_v43 = vadd.f32 -0.28449672, %v3782_v38  ;;  %v7067_v15 = vadd.f32 %v3516_v39, %v7021_v6  ;;  %v7070_v29 = vadd.f32 %v3593_v8, %v7035_v17  ;;  %v7103_v39 = vmul.f32 0.5, %v6998_v24 }
0x1184   : > { %v3812_v41 = vmul.f32 %v7023_v10, %v3796_v1  ;;  %v3518_v13 = vpop.f32.mrf.mxu1  ;;  %v3595_v26 = vpop.f32.mrf.mxu0  ;;  %v3679_v8 = vadd.f32 1.0, %v3663_v22  ;;  %v3749_v40 = vmul.f32 %v7060_v25, %v3733_v56  ;;  %v7120_v22 = vmul.f32 0.5, %v7004_v50 }
0x1185   : > { %7624 = vst [vmem:[#allocation4_spill] sm:$0xff] %v7067_v15  ;;  %7625 = vst [vmem:[#allocation5_spill] sm:$0xff] %v7070_v29  ;;  %v3814_v42 = vmul.f32 %v7026_v30, %v3798_v43  ;;  %v7075_v36 = vmul.f32 0.70710677, %v7067_v15  ;;  %v7079_v48 = vmul.f32 0.70710677, %v7070_v29  ;;  %v7082_v58 = vadd.f32 %v3518_v13, %v7041_v9 }
0x1186   : > { %v3828_v47 = vadd.f32 0.2548296, %v3812_v41  ;;  %v7096_v60 = vadd.f32 %v3595_v26, %v7050_v34  ;;  %v3522_v1 = vpop.f32.mrf.mxu1  ;;  %v3914_v13 = vmul.f32 1.442695, %v3887_v61 }
0x1187   : > { %v3830_v51 = vadd.f32 0.2548296, %v3814_v42  ;;  %v3640_v7 = vand.u32 2147483647, %v7075_v36  ;;  %v3642_v12 = vand.u32 2147483647, %v7079_v48  ;;  %v7111_v11 = vadd.f32 %v3522_v1, %v7021_v6  ;;  %v3599_v6 = vpop.f32.mrf.mxu0 }
0x1188   : > { %v3844_v18 = vmul.f32 %v7023_v10, %v3828_v47  ;;  %v7091_v35 = vmul.f32 0.70710677, %v7082_v58  ;;  %v7117_v49 = vmul.f32 0.70710677, %v7096_v60  ;;  %vm3960_vm7 = vcmp.ge.f32.partialorder %v7075_v36, 0.0 }
0x1189   : > { %v3846_v20 = vmul.f32 %v7026_v30, %v3830_v51  ;;  %v3656_v32 = vmul.f32 0.3275911, %v3640_v7  ;;  %v3658_v5 = vmul.f32 0.3275911, %v3642_v12  ;;  %v7099_v30 = vpop.eup %5323  ;;  %v3864_v41 = vmul.f32 %v3640_v7, %v3640_v7  ;;  %7626 = vst [vmem:[#allocation6_spill] sm:$0xff] %v7111_v11  ;;  %v3601_v1 = vpop.f32.mrf.mxu0 }
0x118a   : > { %v3924_v59 = vmul.f32 %v5320_v62, %v3844_v18  ;;  %v7106_v55 = vpop.eup %5325  ;;  %v3641_v42 = vand.u32 2147483647, %v7091_v35  ;;  %v3866_v47 = vmul.f32 %v3642_v12, %v3642_v12  ;;  %v3735_v51 = vadd.f32 -1.4531521, %v3719_v28 }
0x118b   : > { %v7093_v38 = vmul.f32 %v5322_v54, %v3846_v20  ;;  %v3672_v10 = vadd.f32 1.0, %v3656_v32  ;;  %v3674_v43 = vadd.f32 1.0, %v3658_v5  ;;  %v7113_v24 = vpop.eup %5327  ;;  %v7123_v7 = vmul.f32 0.5, %v7010_v53 }
0x118c   : > { %v3940_v23 = vsub.f32 1.0, %v3924_v59  ;;  %v7126_v18 = vmul.f32 0.5, %v7014_v27  ;;  %v7128_v16 = vpop.eup %5329  ;;  %v3880_v62 = vsub.f32 0.0, %v3864_v41  ;;  %v3643_v12 = vand.u32 2147483647, %v7117_v49  ;;  %v3524_v59 = vpop.f32.mrf.mxu1 }
0x118d   : > { %5339 = vrcp.f32 %v3672_v10  ;;  %v3942_v14 = vsub.f32 1.0, %v7093_v38  ;;  %v3765_v20 = vadd.f32 1.4214138, %v3749_v40  ;;  %v7132_v32 = vmul.f32 0.5, %v7037_v57  ;;  %v7141_v5 = vpop.eup %5331 }
0x118e   : > { %5341 = vrcp.f32 %v3674_v43  ;;  %v3972_v26 = vsub.f32 0.0, %v3940_v23  ;;  %v3865_v50 = vmul.f32 %v3641_v42, %v3641_v42  ;;  %v7135_v53 = vmul.f32 0.70710677, %v7111_v11 }
0x118f   : > { %5343 = vrcp.f32 %v3679_v8  ;;  %v3974_v56 = vsub.f32 0.0, %v3942_v14  ;;  %v3882_v27 = vsub.f32 0.0, %v3866_v47  ;;  %v7138_v54 = vadd.f32 %v3599_v6, %v7035_v17  ;;  %v7145_v8 = vpop.eup %5333 }
0x1190   : > { %5345 = vpow2.f32 %v3914_v13  ;;  %7627 = vst [vmem:[#allocation7_spill] sm:$0xff] %v7135_v53  ;;  %v3751_v61 = vmul.f32 %v7085_v63, %v3735_v51  ;;  %v3657_v38 = vmul.f32 0.3275911, %v3641_v42  ;;  %v3867_v10 = vmul.f32 %v3643_v12, %v3643_v12  ;;  %v7153_v13 = vpop.eup %5335 }
0x1191   : > { %7628 = vst [vmem:[#allocation8_spill] sm:$0xff] %v7138_v54  ;;  %v3648_v57 = vand.u32 2147483647, %v7135_v53  ;;  %v3724_v28 = vmul.f32 1.0614054, %v7113_v24  ;;  %v3988_v43 = vsel %vm3956_vm15, %v3940_v23, %v3972_v26  ;;  %v3781_v40 = vmul.f32 %v7060_v25, %v3765_v20 }
0x1192   : > { %v3900_v41 = vmul.f32 1.442695, %v3880_v62  ;;  %v7150_v17 = vmul.f32 0.70710677, %v7138_v54  ;;  %v3881_v42 = vsub.f32 0.0, %v3865_v50  ;;  %v7156_v6 = vadd.f32 %v3524_v59, %v7041_v9 }
0x1193   : > { %v3659_v47 = vmul.f32 0.3275911, %v3643_v12  ;;  %v3872_v51 = vmul.f32 %v3648_v57, %v3648_v57  ;;  %v3990_v46 = vsel %vm3958_vm0, %v3942_v14, %v3974_v56  ;;  %v3904_v33 = vmul.f32 1.442695, %v3882_v27  ;;  %v7167_v12 = vpop.eup %5337 }
0x1194   : > { %7629 = vst [vmem:[#allocation9_spill] sm:$0xff] %v7150_v17  ;;  %v7161_v19 = vadd.f32 %v3601_v1, %v7050_v34  ;;  %v3767_v23 = vadd.f32 1.4214138, %v3751_v61  ;;  %v3673_v26 = vadd.f32 1.0, %v3657_v38  ;;  %v3883_v62 = vsub.f32 0.0, %v3867_v10 }
0x1195   : > { %v3650_v20 = vand.u32 2147483647, %v7150_v17  ;;  %v7165_v54 = vmul.f32 0.70710677, %v7156_v6  ;;  %v4004_v50 = vadd.f32 1.0, %v3988_v43  ;;  %5347 = vpow2.f32 %v3900_v41 }
0x1196   : > { %7630 = vst [vmem:[#allocation10_spill] sm:$0xff] %v7161_v19  ;;  %v3664_v9 = vmul.f32 0.3275911, %v3648_v57  ;;  %v3740_v59 = vadd.f32 -1.4531521, %v3724_v28  ;;  %v4006_v14 = vadd.f32 1.0, %v3990_v46  ;;  %5349 = vpow2.f32 %v3904_v33 }
0x1197   : > { %v3902_v56 = vmul.f32 1.442695, %v3881_v42  ;;  %v3675_v34 = vadd.f32 1.0, %v3659_v47  ;;  %v3888_v27 = vsub.f32 0.0, %v3872_v51  ;;  %v3649_v10 = vand.u32 2147483647, %v7165_v54 }
0x1198   : > { %v7176_v1 = vmul.f32 0.70710677, %v7161_v19  ;;  %5351 = vrcp.f32 %v3673_v26  ;;  %v3906_v57 = vmul.f32 1.442695, %v3883_v62  ;;  %v3666_v28 = vmul.f32 0.3275911, %v3650_v20 }
0x1199   : > { %v3680_v42 = vadd.f32 1.0, %v3664_v9  ;;  %v7181_v47 = vmul.f32 %v3650_v20, %v3650_v20  ;;  %v7185_v33 = vmul.f32 %v4004_v50, %v7053_v52  ;;  %5353 = vpow2.f32 %v3902_v56 }
0x119a   : > { %v7169_v4 = vpop.eup %5339  ;;  %v3651_v51 = vand.u32 2147483647, %v7176_v1  ;;  %v3916_v11 = vmul.f32 1.442695, %v3888_v27  ;;  %v7190_v26 = vmul.f32 %v4006_v14, %v7057_v37  ;;  %5355 = vrcp.f32 %v3675_v34 }
0x119b   : > { %v7171_v61 = vpop.eup %5341  ;;  %v3720_v38 = vmul.f32 1.0614054, %v7169_v4  ;;  %5357 = vpow2.f32 %v3906_v57  ;;  %v3682_v9 = vadd.f32 1.0, %v3666_v28  ;;  %v3797_v29 = vadd.f32 -0.28449672, %v3781_v40 }
0x119c   : > { %v3722_v43 = vmul.f32 1.0614054, %v7171_v61  ;;  %v7179_v41 = vpop.eup %5343  ;;  %5359 = vrcp.f32 %v3680_v42  ;;  %v3667_v50 = vmul.f32 0.3275911, %v3651_v51  ;;  %v3783_v56 = vmul.f32 %v7085_v63, %v3767_v23 }
0x119d   : > { %v3736_v46 = vadd.f32 -1.4531521, %v3720_v38  ;;  %v7187_v53 = vpop.eup %5345  ;;  %v3665_v38 = vmul.f32 0.3275911, %v3649_v10  ;;  %5361 = vpow2.f32 %v3916_v11  ;;  %v3813_v37 = vmul.f32 %v7060_v25, %v3797_v29 }
0x119e   : > { %v3738_v17 = vadd.f32 -1.4531521, %v3722_v43  ;;  %v3725_v14 = vmul.f32 1.0614054, %v7145_v8  ;;  %v3799_v19 = vadd.f32 -0.28449672, %v3783_v56  ;;  %5363 = vrcp.f32 %v3682_v9 }
0x119f   : > { %v3752_v62 = vmul.f32 %v7169_v4, %v3736_v46  ;;  %v3681_v34 = vadd.f32 1.0, %v3665_v38  ;;  %v3873_v46 = vmul.f32 %v3649_v10, %v3649_v10  ;;  %v3727_v40 = vmul.f32 1.0614054, %v7179_v41 }
0x11a0   : > { %v3754_v20 = vmul.f32 %v7171_v61, %v3738_v17  ;;  %v3829_v17 = vadd.f32 0.2548296, %v3813_v37  ;;  %v3741_v57 = vadd.f32 -1.4531521, %v3725_v14  ;;  %v3683_v28 = vadd.f32 1.0, %v3667_v50 }
0x11a1   : > { %v3768_v27 = vadd.f32 1.4214138, %v3752_v62  ;;  %v3875_v42 = vmul.f32 %v3651_v51, %v3651_v51  ;;  %v3815_v23 = vmul.f32 %v7085_v63, %v3799_v19  ;;  %v3756_v11 = vmul.f32 %v7113_v24, %v3740_v59 }
0x11a2   : > { %v3770_v43 = vadd.f32 1.4214138, %v3754_v20  ;;  %v7202_v29 = vpop.eup %5347  ;;  %v3845_v10 = vmul.f32 %v7060_v25, %v3829_v17  ;;  %v3757_v38 = vmul.f32 %v7145_v8, %v3741_v57  ;;  %v3743_v20 = vadd.f32 -1.4531521, %v3727_v40 }
0x11a3   : > { %v3784_v62 = vmul.f32 %v7169_v4, %v3768_v27  ;;  %v3831_v56 = vadd.f32 0.2548296, %v3815_v23  ;;  %v3772_v37 = vadd.f32 1.4214138, %v3756_v11  ;;  %v3726_v50 = vmul.f32 1.0614054, %v7141_v5  ;;  %v7209_v51 = vpop.eup %5349 }
0x11a4   : > { %v3786_v9 = vmul.f32 %v7171_v61, %v3770_v43  ;;  %5365 = vrcp.f32 %v3681_v34  ;;  %v3925_v19 = vmul.f32 %v7099_v30, %v3845_v10  ;;  %v3773_v59 = vadd.f32 1.4214138, %v3757_v38 }
0x11a5   : > { %v3759_v27 = vmul.f32 %v7179_v41, %v3743_v20  ;;  %v7214_v25 = vpop.eup %5351  ;;  %5367 = vrcp.f32 %v3683_v28  ;;  %v3847_v14 = vmul.f32 %v7085_v63, %v3831_v56  ;;  %v3788_v43 = vmul.f32 %v7113_v24, %v3772_v37 }
0x11a6   : > { %v3742_v17 = vadd.f32 -1.4531521, %v3726_v50  ;;  %v3800_v57 = vadd.f32 -0.28449672, %v3784_v62  ;;  %v3941_v40 = vsub.f32 1.0, %v3925_v19  ;;  %v3789_v23 = vmul.f32 %v7145_v8, %v3773_v59  ;;  %v7219_v52 = vpop.eup %5353 }
0x11a7   : > { %v3775_v11 = vadd.f32 1.4214138, %v3759_v27  ;;  %v3802_v34 = vadd.f32 -0.28449672, %v3786_v9  ;;  %v3927_v30 = vmul.f32 %v7106_v55, %v3847_v14  ;;  %v3804_v10 = vadd.f32 -0.28449672, %v3788_v43  ;;  %v7223_v20 = vpop.eup %5355 }
0x11a8   : > { %v3758_v38 = vmul.f32 %v7141_v5, %v3742_v17  ;;  %v3889_v28 = vsub.f32 0.0, %v3873_v46  ;;  %v3973_v63 = vsub.f32 0.0, %v3941_v40  ;;  %v3805_v56 = vadd.f32 -0.28449672, %v3789_v23  ;;  %v7226_v62 = vpop.eup %5357 }
0x11a9   : > { %v3791_v37 = vmul.f32 %v7179_v41, %v3775_v11  ;;  %v3891_v50 = vsub.f32 0.0, %v3875_v42  ;;  %v3943_v19 = vsub.f32 1.0, %v3927_v30  ;;  %v3820_v59 = vmul.f32 %v7113_v24, %v3804_v10  ;;  %v7229_v9 = vpop.eup %5359 }
0x11aa   : > { %v3774_v27 = vadd.f32 1.4214138, %v3758_v38  ;;  %v3816_v55 = vmul.f32 %v7169_v4, %v3800_v57  ;;  %v3989_v14 = vsel %vm3957_vm1, %v3941_v40, %v3973_v63  ;;  %v3821_v46 = vmul.f32 %v7145_v8, %v3805_v56  ;;  %v7235_v17 = vpop.eup %5361  ;;  %v4115_v56 = vld [vmem:[%s7587_s16 + $0x278] sm:$0xff] }
0x11ab   : > { %v3807_v43 = vadd.f32 -0.28449672, %v3791_v37  ;;  %v3818_v23 = vmul.f32 %v7171_v61, %v3802_v34  ;;  %v4005_v11 = vadd.f32 1.0, %v3989_v14  ;;  %v3975_v42 = vsub.f32 0.0, %v3943_v19  ;;  %v7241_v31 = vpop.eup %5363 }
0x11ac   : > { %v3836_v30 = vadd.f32 0.2548296, %v3820_v59  ;;  %v3918_v10 = vmul.f32 1.442695, %v3889_v28  ;;  %v3837_v38 = vadd.f32 0.2548296, %v3821_v46  ;;  %v3790_v57 = vmul.f32 %v7141_v5, %v3774_v27 }
0x11ad   : > { %v3823_v15 = vmul.f32 %v7179_v41, %v3807_v43  ;;  %v3922_v40 = vmul.f32 1.442695, %v3891_v50  ;;  %v4021_v63 = vmul.f32 %v4005_v11, %v7063_v2  ;;  %v3991_v34 = vsel %vm3959_vm2, %v3943_v19, %v3975_v42  ;;  %v4130_v27 = vld [vmem:[%s7587_s16 + $0x2f0] sm:$0xff] }
0x11ae   : > { %v3852_v28 = vmul.f32 %v7113_v24, %v3836_v30  ;;  %v3832_v37 = vadd.f32 0.2548296, %v3816_v55  ;;  %v4007_v59 = vadd.f32 1.0, %v3991_v34  ;;  %v3853_v14 = vmul.f32 %v7145_v8, %v3837_v38  ;;  %v4113_v38 = vld [vmem:[%s7587_s16 + $0x268] sm:$0xff] }
0x11af   : > { %v3839_v50 = vadd.f32 0.2548296, %v3823_v15  ;;  %v3834_v46 = vadd.f32 0.2548296, %v3818_v23  ;;  %4235 = vmatprep.mubr.f32.mxu1 %v4021_v63  ;;  %v3806_v2 = vadd.f32 -0.28449672, %v3790_v57  ;;  %5369 = vpow2.f32 %v3918_v10 }
0x11b0   : > { %v3932_v21 = vmul.f32 %v7128_v16, %v3852_v28  ;;  %v3721_v19 = vmul.f32 1.0614054, %v7214_v25  ;;  %v7631_v24 = vsub.f32 0.0, %v7181_v47  ;;  %v4023_v43 = vmul.f32 %v4007_v59, %v7103_v39  ;;  %4236 = vmatmul.mubr.f32.vlgmr.msra.gmra.mxu1 %v7185_v33  ;;  %v4114_v15 = vld [vmem:[%s7587_s16 + $0x270] sm:$0xff]  ;;  %v4147_v47 = vld [vmem:[%s7587_s16 + $0x378] sm:$0xff]  ;;  %v4129_v23 = vld [vmem:[%s7587_s16 + $0x2e8] sm:$0xff] }
0x11b1   : > { %v3933_v16 = vmul.f32 %v7167_v12, %v3853_v14  ;;  %v7268_v8 = vpop.eup %5365  ;;  %5371 = vpow2.f32 %v3922_v40  ;;  %4813 = vmatpush3.msra.mxu1 %v4115_v56  ;;  %v4162_v39 = vld [vmem:[%s7587_s16 + $0x3f0] sm:$0xff]  ;;  %v3855_v33 = vmul.f32 %v7179_v41, %v3839_v50  ;;  %v3822_v12 = vmul.f32 %v7141_v5, %v3806_v2  ;;  %v4161_v34 = vld [vmem:[%s7587_s16 + $0x3e8] sm:$0xff]  ;;  %v4127_v2 = vld [vmem:[%s7587_s16 + $0x2d8] sm:$0xff] }
0x11b2   : > { %v7260_v55 = vmul.f32 1.442695, %v7631_v24  ;;  %v3948_v11 = vsub.f32 1.0, %v3932_v21  ;;  %v7281_v42 = vpop.eup %5367  ;;  %v7284_v30 = vmul.f32 %v7169_v4, %v3832_v37  ;;  %4310 = vmatprep.mubr.f32.mxu0 %v4023_v43  ;;  %4814 = vmatprep.subr.mxu1 %v4130_v27  ;;  %v3737_v41 = vadd.f32 -1.4531521, %v3721_v19  ;;  %v4146_v4 = vld [vmem:[%s7587_s16 + $0x370] sm:$0xff] }
0x11b3   : > { %v3949_v10 = vsub.f32 1.0, %v3933_v16  ;;  %v3723_v57 = vmul.f32 1.0614054, %v7223_v20  ;;  %v7291_v40 = vmul.f32 %v7171_v61, %v3834_v46  ;;  %4311 = vmatmul.mubr.f32.vlgmr.msra.gmra.mxu0 %v7190_v26  ;;  %4815 = vmatpush3.msra.mxu1 %v4114_v15  ;;  %v3935_v63 = vmul.f32 %v7187_v53, %v3855_v33  ;;  %v4128_v61 = vld [vmem:[%s7587_s16 + $0x2e0] sm:$0xff]  ;;  %v4145_v21 = vld [vmem:[%s7587_s16 + $0x368] sm:$0xff] }
0x11b4   : > { %v3980_v56 = vsub.f32 0.0, %v3948_v11  ;;  %v3838_v28 = vadd.f32 0.2548296, %v3822_v12  ;;  %4851 = vmatpush3.msra.mxu0 %v4147_v47  ;;  %4816 = vmatprep.subr.mxu1 %v4129_v23  ;;  %v4112_v37 = vld [vmem:[%s7587_s16 + $0x260] sm:$0xff]  ;;  %v3753_v53 = vmul.f32 %v7214_v25, %v3737_v41  ;;  %v3729_v27 = vmul.f32 1.0614054, %v7268_v8 }
0x11b5   : > { %v3981_v26 = vsub.f32 0.0, %v3949_v10  ;;  %v3739_v59 = vadd.f32 -1.4531521, %v3723_v57  ;;  %4852 = vmatprep.subr.mxu0 %v4162_v39  ;;  %v3951_v14 = vsub.f32 1.0, %v3935_v63  ;;  %4817 = vmatpush3.msra.mxu1 %v4113_v38  ;;  %v3731_v19 = vmul.f32 1.0614054, %v7281_v42 }
0x11b6   : > { %v3996_v50 = vsel %vm3964_vm3, %v3948_v11, %v3980_v56  ;;  %v3854_v46 = vmul.f32 %v7141_v5, %v3838_v28  ;;  %4853 = vmatpush3.msra.mxu0 %v4146_v4  ;;  %4818 = vmatprep.subr.mxu1 %v4128_v61  ;;  %v4111_v5 = vld [vmem:[%s7587_s16 + $0x258] sm:$0xff]  ;;  %v3769_v15 = vadd.f32 1.4214138, %v3753_v53  ;;  %v4126_v23 = vld [vmem:[%s7587_s16 + $0x2d0] sm:$0xff]  ;;  %v3745_v11 = vadd.f32 -1.4531521, %v3729_v27 }
0x11b7   : > { %v3997_v24 = vsel %vm3965_vm4, %v3949_v10, %v3981_v26  ;;  %v4012_v43 = vadd.f32 1.0, %v3996_v50  ;;  %v3755_v16 = vmul.f32 %v7223_v20, %v3739_v59  ;;  %v3983_v39 = vsub.f32 0.0, %v3951_v14  ;;  %4854 = vmatprep.subr.mxu0 %v4161_v34  ;;  %4819 = vmatpush3.msra.mxu1 %v4112_v37  ;;  %v4159_v10 = vld [vmem:[%s7587_s16 + $0x3d8] sm:$0xff]  ;;  %v4158_v28 = vld [vmem:[%s7587_s16 + $0x3d0] sm:$0xff] }
0x11b8   : > { %v4013_v47 = vadd.f32 1.0, %v3997_v24  ;;  %v3934_v33 = vmul.f32 %v7153_v13, %v3854_v46  ;;  %4855 = vmatpush3.msra.mxu0 %v4145_v21  ;;  %4820 = vmatprep.subr.mxu1 %v4127_v2  ;;  %v3785_v13 = vmul.f32 %v7214_v25, %v3769_v15  ;;  %v3747_v41 = vadd.f32 -1.4531521, %v3731_v19  ;;  %v4142_v59 = vld [vmem:[%s7587_s16 + $0x350] sm:$0xff]  ;;  %v4125_v46 = vld [vmem:[%s7587_s16 + $0x2c8] sm:$0xff] }
0x11b9   : > { %v4028_v12 = vmul.f32 %v4012_v43, %v7120_v22  ;;  %v3771_v38 = vadd.f32 1.4214138, %v3755_v16  ;;  %v3999_v4 = vsel %vm3967_vm5, %v3951_v14, %v3983_v39  ;;  %4856 = vmatprep.subr.mxu0 %v4160_v0  ;;  %4821 = vmatpush3.msra.mxu1 %v4111_v5  ;;  %v4143_v22 = vld [vmem:[%s7587_s16 + $0x358] sm:$0xff]  ;;  %v3761_v34 = vmul.f32 %v7268_v8, %v3745_v11  ;;  %v4141_v43 = vld [vmem:[%s7587_s16 + $0x348] sm:$0xff]  ;;  %v4156_v39 = vld [vmem:[%s7587_s16 + $0x3c0] sm:$0xff] }
0x11ba   : > { %v4029_v57 = vmul.f32 %v4013_v47, %v7126_v18  ;;  %v3950_v63 = vsub.f32 1.0, %v3934_v33  ;;  %v4015_v56 = vadd.f32 1.0, %v3999_v4  ;;  %4857 = vmatpush3.msra.mxu0 %v4144_v44  ;;  %4822 = vmatprep.subr.mxu1 %v4126_v23  ;;  %v3801_v18 = vadd.f32 -0.28449672, %v3785_v13  ;;  %v4124_v47 = vld [vmem:[%s7587_s16 + $0x2c0] sm:$0xff] }
0x11bb   : > { %v3787_v61 = vmul.f32 %v7223_v20, %v3771_v38  ;;  %v3763_v26 = vmul.f32 %v7281_v42, %v3747_v41  ;;  %v7358_v37 = vmul.f32 %v7202_v29, %v7284_v30  ;;  %4858 = vmatprep.subr.mxu0 %v4159_v10  ;;  %v3777_v27 = vadd.f32 1.4214138, %v3761_v34  ;;  %v4157_v29 = vld [vmem:[%s7587_s16 + $0x3c8] sm:$0xff]  ;;  %4823 = vmatpush3.msra.mxu1 %v4110_v45  ;;  %v4122_v45 = vld [vmem:[%s7587_s16 + $0x2b0] sm:$0xff] }
0x11bc   : > { %4240 = vmatprep.mubr.f32.mxu1 %v4029_v57  ;;  %v3982_v53 = vsub.f32 0.0, %v3950_v63  ;;  %v3728_v14 = vmul.f32 1.0614054, %v7229_v9  ;;  %v4031_v50 = vmul.f32 %v4015_v56, %v7132_v32  ;;  %4859 = vmatpush3.msra.mxu0 %v4143_v22  ;;  %v3817_v30 = vmul.f32 %v7214_v25, %v3801_v18  ;;  %v7372_v19 = vpop.eup %5369  ;;  %v4109_v32 = vld [vmem:[%s7587_s16 + $0x248] sm:$0xff]  ;;  %v4140_v57 = vld [vmem:[%s7587_s16 + $0x340] sm:$0xff]  ;;  %v4107_v22 = vld [vmem:[%s7587_s16 + $0x238] sm:$0xff] }
0x11bd   : > { %4241 = vmatmul.mubr.f32.gmra.mxu1 %v4028_v12  ;;  %v3803_v21 = vadd.f32 -0.28449672, %v3787_v61  ;;  %v3779_v2 = vadd.f32 1.4214138, %v3763_v26  ;;  %4860 = vmatprep.subr.mxu0 %v4158_v28  ;;  %v3793_v0 = vmul.f32 %v7268_v8, %v3777_v27  ;;  %v3730_v15 = vmul.f32 1.0614054, %v7241_v31 }
0x11be   : > { %v3998_v24 = vsel %vm3966_vm6, %v3950_v63, %v3982_v53  ;;  %v3744_v5 = vadd.f32 -1.4531521, %v3728_v14  ;;  %v7384_v16 = vpop.eup %5371  ;;  %4315 = vmatprep.mubr.f32.mxu0 %v4031_v50  ;;  %4861 = vmatpush3.msra.mxu0 %v4142_v59  ;;  %v3833_v33 = vadd.f32 0.2548296, %v3817_v30  ;;  %v7396_v11 = vmul.f32 %v7209_v51, %v7291_v40  ;;  %v4108_v12 = vld [vmem:[%s7587_s16 + $0x240] sm:$0xff]  ;;  %v4123_v51 = vld [vmem:[%s7587_s16 + $0x2b8] sm:$0xff] }
0x11bf   : > { %v4014_v3 = vadd.f32 1.0, %v3998_v24  ;;  %v3819_v44 = vmul.f32 %v7223_v20, %v3803_v21  ;;  %v3795_v23 = vmul.f32 %v7281_v42, %v3779_v2  ;;  %4824 = vmatprep.subr.mxu1 %v4125_v46  ;;  %4862 = vmatprep.subr.mxu0 %v4157_v29  ;;  %v3809_v10 = vadd.f32 -0.28449672, %v3793_v0  ;;  %v4154_v18 = vld [vmem:[%s7587_s16 + $0x3b0] sm:$0xff]  ;;  %v4121_v46 = vld [vmem:[%s7587_s16 + $0x2a8] sm:$0xff] }
0x11c0   : > { %v3760_v13 = vmul.f32 %v7229_v9, %v3744_v5  ;;  %v3746_v38 = vadd.f32 -1.4531521, %v3730_v15  ;;  %4825 = vmatpush3.msra.mxu1 %v4109_v32  ;;  %4863 = vmatpush3.msra.mxu0 %v4141_v43  ;;  %v3849_v40 = vmul.f32 %v7214_v25, %v3833_v33  ;;  %5373 = vpow2.f32 %v7260_v55  ;;  %v4139_v25 = vld [vmem:[%s7587_s16 + $0x338] sm:$0xff]  ;;  %v4106_v59 = vld [vmem:[%s7587_s16 + $0x230] sm:$0xff]  ;;  %v4153_v24 = vld [vmem:[%s7587_s16 + $0x3a8] sm:$0xff] }
0x11c1   : > { %v4030_v41 = vmul.f32 %v4014_v3, %v7123_v7  ;;  %v3835_v4 = vadd.f32 0.2548296, %v3819_v44  ;;  %v3811_v63 = vadd.f32 -0.28449672, %v3795_v23  ;;  %4826 = vmatprep.subr.mxu1 %v4124_v47  ;;  %4864 = vmatprep.subr.mxu0 %v4156_v39  ;;  %v4155_v7 = vld [vmem:[%s7587_s16 + $0x3b8] sm:$0xff]  ;;  %v3825_v34 = vmul.f32 %v7268_v8, %v3809_v10  ;;  %v4105_v32 = vld [vmem:[%s7587_s16 + $0x228] sm:$0xff] }
0x11c2   : > { %v3776_v56 = vadd.f32 1.4214138, %v3760_v13  ;;  %v3762_v28 = vmul.f32 %v7241_v31, %v3746_v38  ;;  %4827 = vmatpush3.msra.mxu1 %v4108_v12  ;;  %v3929_v61 = vmul.f32 %v7219_v52, %v3849_v40  ;;  %v3944_v53 = vsub.f32 1.0, %v7358_v37  ;;  %4865 = vmatpush3.msra.mxu0 %v4140_v57  ;;  %v4152_v39 = vld [vmem:[%s7587_s16 + $0x3a0] sm:$0xff]  ;;  %v4119_v13 = vld [vmem:[%s7587_s16 + $0x298] sm:$0xff]  ;;  %v4134_v37 = vld [vmem:[%s7587_s16 + $0x310] sm:$0xff] }
0x11c3   : > { %4316 = vmatmul.mubr.f32.gmra.mxu0 %v4030_v41  ;;  %v3851_v26 = vmul.f32 %v7223_v20, %v3835_v4  ;;  %v3827_v55 = vmul.f32 %v7281_v42, %v3811_v63  ;;  %vm3962_vm8 = vcmp.ge.f32.partialorder %v7079_v48, 0.0  ;;  %4828 = vmatprep.subr.mxu1 %v4123_v51  ;;  %v3841_v27 = vadd.f32 0.2548296, %v3825_v34  ;;  %v4138_v20 = vld [vmem:[%s7587_s16 + $0x330] sm:$0xff]  ;;  %v4104_v33 = vld [vmem:[%s7587_s16 + $0x220] sm:$0xff]  ;;  %v4151_v57 = vld [vmem:[%s7587_s16 + $0x398] sm:$0xff] }
0x11c4   : > { %v3792_v14 = vmul.f32 %v7229_v9, %v3776_v56  ;;  %v3778_v50 = vadd.f32 1.4214138, %v3762_v28  ;;  %v3946_v52 = vsub.f32 1.0, %v7396_v11  ;;  %4866 = vmatprep.subr.mxu0 %v4155_v7  ;;  %4829 = vmatpush3.msra.mxu1 %v4107_v22  ;;  %v3945_v29 = vsub.f32 1.0, %v3929_v61  ;;  %v4136_v10 = vld [vmem:[%s7587_s16 + $0x320] sm:$0xff]  ;;  %v4103_v51 = vld [vmem:[%s7587_s16 + $0x218] sm:$0xff] }
0x11c5   : > { %v3931_v30 = vmul.f32 %v7226_v62, %v3851_v26  ;;  %v3843_v21 = vadd.f32 0.2548296, %v3827_v55  ;;  %v7447_v2 = vmul.f32 0.5, %v7082_v58  ;;  %4867 = vmatpush3.msra.mxu0 %v4139_v25  ;;  %4830 = vmatprep.subr.mxu1 %v4122_v45  ;;  %v3857_v43 = vmul.f32 %v7268_v8, %v3841_v27  ;;  %v4137_v58 = vld [vmem:[%s7587_s16 + $0x328] sm:$0xff]  ;;  %v4120_v62 = vld [vmem:[%s7587_s16 + $0x2a0] sm:$0xff]  ;;  %v4102_v56 = vld [vmem:[%s7587_s16 + $0x210] sm:$0xff] }
0x11c6   : > { %v3808_v0 = vadd.f32 -0.28449672, %v3792_v14  ;;  %v3794_v5 = vmul.f32 %v7241_v31, %v3778_v50  ;;  %vm3961_vm9 = vcmp.ge.f32.partialorder %v7091_v35, 0.0  ;;  %4868 = vmatprep.subr.mxu0 %v4154_v18  ;;  %4831 = vmatpush3.msra.mxu1 %v4106_v59  ;;  %v3977_v15 = vsub.f32 0.0, %v3945_v29  ;;  %v4117_v18 = vld [vmem:[%s7587_s16 + $0x288] sm:$0xff] }
0x11c7   : > { %v3947_v3 = vsub.f32 1.0, %v3931_v30  ;;  %v3859_v47 = vmul.f32 %v7281_v42, %v3843_v21  ;;  %v3976_v8 = vsub.f32 0.0, %v3944_v53  ;;  %4869 = vmatpush3.msra.mxu0 %v4138_v20  ;;  %4832 = vmatprep.subr.mxu1 %v4121_v46  ;;  %v3937_v44 = vmul.f32 %v7372_v19, %v3857_v43  ;;  %v4149_v48 = vld [vmem:[%s7587_s16 + $0x388] sm:$0xff]  ;;  %v4100_v46 = vld [vmem:[%s7587_s16 + $0x200] sm:$0xff] }
0x11c8   : > { %v3824_v23 = vmul.f32 %v7229_v9, %v3808_v0  ;;  %v3810_v12 = vadd.f32 -0.28449672, %v3794_v5  ;;  %v3978_v42 = vsub.f32 0.0, %v3946_v52  ;;  %4870 = vmatprep.subr.mxu0 %v4153_v24  ;;  %4833 = vmatpush3.msra.mxu1 %v4105_v32  ;;  %v3993_v38 = vsel %vm3961_vm9, %v3945_v29, %v3977_v15  ;;  %v4101_v11 = vld [vmem:[%s7587_s16 + $0x208] sm:$0xff]  ;;  %v7632_v24 = vld [vmem:[#allocation4_spill] sm:$0xff]  ;;  %v7633_v43 = vld [vmem:[#allocation10_spill] sm:$0xff] }
0x11c9   : > { %v3979_v19 = vsub.f32 0.0, %v3947_v3  ;;  %v3939_v41 = vmul.f32 %v7384_v16, %v3859_v47  ;;  %vm3963_vm10 = vcmp.ge.f32.partialorder %v7117_v49, 0.0  ;;  %4871 = vmatpush3.msra.mxu0 %v4137_v58  ;;  %4834 = vmatprep.subr.mxu1 %v4120_v62  ;;  %v3953_v40 = vsub.f32 1.0, %v3937_v44  ;;  %v4135_v49 = vld [vmem:[%s7587_s16 + $0x318] sm:$0xff]  ;;  %v4118_v16 = vld [vmem:[%s7587_s16 + $0x290] sm:$0xff]  ;;  %v4132_v0 = vld [vmem:[%s7587_s16 + $0x300] sm:$0xff] }
0x11ca   : > { %v3840_v4 = vadd.f32 0.2548296, %v3824_v23  ;;  %v3826_v35 = vmul.f32 %v7241_v31, %v3810_v12  ;;  %v3611_v63 = vmul.f32 0.5, %v7096_v60  ;;  %vm3969_vm11 = vcmp.ge.f32.partialorder %v7165_v54, 0.0  ;;  %4872 = vmatprep.subr.mxu0 %v4152_v39  ;;  %4835 = vmatpush3.msra.mxu1 %v4104_v33  ;;  %v4150_v60 = vld [vmem:[%s7587_s16 + $0x390] sm:$0xff]  ;;  %v7634_v62 = vld [vmem:[#allocation5_spill] sm:$0xff] }
0x11cb   : > { %v3995_v7 = vsel %vm3963_vm10, %v3947_v3, %v3979_v19  ;;  %v3955_v22 = vsub.f32 1.0, %v3939_v41  ;;  %v3992_v34 = vsel %vm3960_vm7, %v3944_v53, %v3976_v8  ;;  %4873 = vmatpush3.msra.mxu0 %v4136_v10  ;;  %4836 = vmatprep.subr.mxu1 %v4119_v13  ;;  %v4009_v28 = vadd.f32 1.0, %v3993_v38  ;;  %v7635_v8 = vld [vmem:[#allocation7_spill] sm:$0xff]  ;;  %v7636_v12 = vld [vmem:[#allocation6_spill] sm:$0xff]  ;;  %v7637_v38 = vld [vmem:[#allocation9_spill] sm:$0xff] }
0x11cc   : > { %v3985_v25 = vsub.f32 0.0, %v3953_v40  ;;  %v3856_v45 = vmul.f32 %v7229_v9, %v3840_v4  ;;  %v3994_v36 = vsel %vm3962_vm8, %v3946_v52, %v3978_v42  ;;  %4874 = vmatprep.subr.mxu0 %v4151_v57  ;;  %4837 = vmatpush3.msra.mxu1 %v4103_v51  ;;  %v4011_v61 = vadd.f32 1.0, %v3995_v7  ;;  %v7638_v57 = vld [vmem:[#allocation8_spill] sm:$0xff] }
0x11cd   : > { %v3987_v26 = vsub.f32 0.0, %v3955_v22  ;;  %v3842_v55 = vadd.f32 0.2548296, %v3826_v35  ;;  %v3617_v9 = vmul.f32 0.5, %v7156_v6  ;;  %vm3971_vm12 = vcmp.ge.f32.partialorder %v7176_v1, 0.0  ;;  %4875 = vmatpush3.msra.mxu0 %v4135_v49  ;;  %4838 = vmatprep.subr.mxu1 %v4118_v16  ;;  %v4133_v6 = vld [vmem:[%s7587_s16 + $0x308] sm:$0xff]  ;;  %v5374_v20 = vpop.eup %5373 }
0x11ce   : > { %v4001_v53 = vsel %vm3969_vm11, %v3953_v40, %v3985_v25  ;;  %v3936_v59 = vmul.f32 %v7235_v17, %v3856_v45  ;;  %v4008_v27 = vadd.f32 1.0, %v3992_v34  ;;  %4876 = vmatprep.subr.mxu0 %v4150_v60  ;;  %4839 = vmatpush3.msra.mxu1 %v4102_v56  ;;  %v4116_v1 = vld [vmem:[%s7587_s16 + $0x280] sm:$0xff]  ;;  %v4010_v54 = vadd.f32 1.0, %v3994_v36 }
0x11cf   : > { %v4017_v14 = vadd.f32 1.0, %v4001_v53  ;;  %v4003_v50 = vsel %vm3971_vm12, %v3955_v22, %v3987_v26  ;;  %v3858_v52 = vmul.f32 %v7241_v31, %v3842_v55  ;;  %4877 = vmatpush3.msra.mxu0 %v4134_v37  ;;  %4840 = vmatprep.subr.mxu1 %v4117_v18  ;;  %v4148_v17 = vld [vmem:[%s7587_s16 + $0x380] sm:$0xff]  ;;  %v4025_v29 = vmul.f32 %v4009_v28, %v7447_v2 }
0x11d0   : > { %v4019_v30 = vadd.f32 1.0, %v4003_v50  ;;  %v3952_v21 = vsub.f32 1.0, %v3936_v59  ;;  %v3608_v32 = vmul.f32 0.5, %v7632_v24  ;;  %v3619_v31 = vmul.f32 0.5, %v7633_v43  ;;  %4878 = vmatprep.subr.mxu0 %v4149_v48  ;;  %4841 = vmatpush3.msra.mxu1 %v4101_v11  ;;  %v4595_v60 = vld [vmem:[%s7588_s17] ss:$0 sm:$0xff] }
0x11d1   : > { %v4027_v5 = vmul.f32 %v4011_v61, %v3611_v63  ;;  %v3938_v58 = vmul.f32 %v5374_v20, %v3858_v52  ;;  %v3610_v15 = vmul.f32 0.5, %v7634_v62  ;;  %4879 = vmatpush3.msra.mxu0 %v4133_v6  ;;  %4842 = vmatprep.subr.mxu1 %v4116_v1  ;;  %v4033_v3 = vmul.f32 %v4017_v14, %v3617_v9  ;;  %v7640_v20 = vld [vmem:[#allocation3_spill] sm:$0xff] }
0x11d2   : > { %v3984_v2 = vsub.f32 0.0, %v3952_v21  ;;  %v4024_v47 = vmul.f32 %v4008_v27, %v3608_v32  ;;  %vm3968_vm13 = vcmp.ge.f32.partialorder %v7635_v8, 0.0  ;;  %4880 = vmatprep.subr.mxu0 %v4148_v17  ;;  %4843 = vmatpush3.msra.mxu1 %v4100_v46  ;;  %v4035_v39 = vmul.f32 %v4019_v30, %v3619_v31 }
0x11d3   : > { %v3954_v33 = vsub.f32 1.0, %v3938_v58  ;;  %v4026_v44 = vmul.f32 %v4010_v54, %v3610_v15  ;;  %4385 = vmatprep.mubr.f32.mxu1 %v4025_v29  ;;  %4881 = vmatpush3.msra.mxu0 %v4132_v0  ;;  %v3616_v42 = vmul.f32 0.5, %v7636_v12  ;;  %vm3970_vm14 = vcmp.ge.f32.partialorder %v7637_v38, 0.0 }
0x11d4   : > { %v4000_v23 = vsel %vm3968_vm13, %v3952_v21, %v3984_v2  ;;  %4460 = vmatprep.mubr.f32.mxu0 %v4027_v5  ;;  %4386 = vmatmul.mubr.f32.vlgmr.msra.gmra.mxu1 %v4024_v47  ;;  %v3618_v51 = vmul.f32 0.5, %v7638_v57  ;;  %v7641_v21 = vld [vmem:[#allocation2_spill] sm:$0xff] }
0x11d5   : > { %v4016_v10 = vadd.f32 1.0, %v4000_v23  ;;  %v3986_v13 = vsub.f32 0.0, %v3954_v33  ;;  %4461 = vmatmul.mubr.f32.vlgmr.msra.gmra.mxu0 %v4026_v44  ;;  %4390 = vmatprep.mubr.f32.mxu1 %v4033_v3 }
0x11d6   : > { %4465 = vmatprep.mubr.f32.mxu0 %v4035_v39 }
0x11d7   : > { %v4032_v19 = vmul.f32 %v4016_v10, %v3616_v42  ;;  %v4002_v41 = vsel %vm3970_vm14, %v3954_v33, %v3986_v13 }
0x11d8   : > { %v4018_v40 = vadd.f32 1.0, %v4002_v41 }
0x11d9   : > { %4391 = vmatmul.mubr.f32.gmra.mxu1 %v4032_v19 }
0x11da   : > { %v4034_v4 = vmul.f32 %v4018_v40, %v3618_v51 }
0x11dc   : > { %4466 = vmatmul.mubr.f32.gmra.mxu0 %v4034_v4 }
0x1270   : > { %v4768_v35 = vpop.f32.mrf.mxu1 }
0x1272   : > { %v4769_v49 = vpop.f32.mrf.mxu1 }
0x1273   : > { %v4806_v63 = vpop.f32.mrf.mxu0  ;;  %v4770_v22 = vadd.f32 %v4769_v49, %v4768_v35 }
0x1275   : > { %v4807_v16 = vpop.f32.mrf.mxu0  ;;  %v4238_v28 = vadd.f32 %v4770_v22, %v4595_v60 }
0x1276   : > { %v4808_v37 = vadd.f32 %v4807_v16, %v4806_v63 }
0x1278   : > { %v4313_v26 = vadd.f32 %v4808_v37, %v4238_v28 }
0x127d   : > { %v4771_v7 = vpop.f32.mrf.mxu1 }
0x127f   : > { %v4772_v56 = vpop.f32.mrf.mxu1 }
0x1280   : > { %v4773_v25 = vadd.f32 %v4772_v56, %v4771_v7 }
0x1282   : > { %v4243_v55 = vadd.f32 %v4773_v25, %v4595_v60 }
0x1283   : > { %v4809_v34 = vpop.f32.mrf.mxu0 }
0x1285   : > { %v4810_v45 = vpop.f32.mrf.mxu0 }
0x1286   : > { %v4811_v53 = vadd.f32 %v4810_v45, %v4809_v34 }
0x1288   : > { %v4318_v1 = vadd.f32 %v4811_v53, %v4243_v55 }
0x1294   : > { %v4844_v36 = vpop.f32.mrf.mxu1 }
0x1295   : > { %v4882_v18 = vpop.f32.mrf.mxu0 }
0x1296   : > { %v4845_v61 = vpop.f32.mrf.mxu1 }
0x1297   : > { %v4846_v9 = vadd.f32 %v4845_v61, %v4844_v36  ;;  %v4883_v48 = vpop.f32.mrf.mxu0 }
0x1298   : > { %v4884_v27 = vadd.f32 %v4883_v48, %v4882_v18 }
0x1299   : > { %v4847_v11 = vpop.f32.mrf.mxu1  ;;  %v4388_v59 = vadd.f32 %v4846_v9, %v4313_v26 }
0x129b   : > { %v4848_v6 = vpop.f32.mrf.mxu1  ;;  %v4463_v14 = vadd.f32 %v4884_v27, %v4388_v59 }
0x129c   : > { %v4885_v50 = vpop.f32.mrf.mxu0  ;;  %v4849_v52 = vadd.f32 %v4848_v6, %v4847_v11 }
0x129d   : > { %v4471_v54 = vadd.f32 %v4463_v14, %v7640_v20 }
0x129e   : > { %v4393_v17 = vadd.f32 %v4849_v52, %v4318_v1  ;;  %v4886_v46 = vpop.f32.mrf.mxu0 }
0x129f   : > { %v4887_v29 = vadd.f32 %v4886_v46, %v4885_v50  ;;  %4473 = vst [vmem:[%s575_s2] sm:$0xff] %v4471_v54 }
0x12a1   : > { %v4468_v30 = vadd.f32 %v4887_v29, %v4393_v17 }
0x12a3   : > { %v4472_v24 = vadd.f32 %v4468_v30, %v7641_v21 }
0x12a5   : > { %4474 = vst [vmem:[%s575_s2 + $0x8] sm:$0xff] %v4472_v24 }
0x12a6 PF: > { %s28_s27 = sadd.s32 1, %s5383_s27  }
0x12a7   : > { %p25_p4 = scmp.ge.s32.totalorder %s28_s27, 4  }
0x12a9   :  { %27 = sbr.rel (!%p25_p4) target bundleno = 4 (0x4), region = 122 }

</bundles_post_ra>
